<compile_context>
chip_gen: v5e
topology: v5e:2x2
jax: 0.10.0
libtpu: 0.0.40
codegen_flags: <defaults>
</compile_context>

<pallas_src>
import functools

import jax
import jax.numpy as jnp
from jax.experimental import pallas as pl
from jax.experimental.pallas import tpu as pltpu


def _pointnet_kernel(x_ref,
                     w1_ref, b1_ref, w2_ref, b2_ref, w3_ref, b3_ref,
                     w4_ref, b4_ref, w5_ref, b5_ref, w6_ref, b6_ref,
                     w7_ref, b7_ref, w8_ref, b8_ref,
                     o_ref,
                     gmax_ref,
                     *, tb, tn, co_chunk):
    """Grid = (batch_blocks, point_chunks).

    x_ref    : (tb, tn, F) bf16   chunk of points for tb batch elements
    wK       : (Cin, Cout) bf16   folded (BN-eval) conv/linear weights
    bK       : (1, Cout)   f32    folded biases
    o_ref    : (tb, OUT_PAD) f32  lane-dense padded output (written on last chunk)
    gmax_ref : (tb, 1024)  f32    running max over points (VMEM scratch)
    """
    f32 = jnp.float32
    bf16 = jnp.bfloat16
    ni = pl.program_id(1)
    n_chunks = pl.num_programs(1)

    def dense(h_bf16, w_ref, b_ref, relu=True):
        # bf16 x bf16 on the MXU, f32 accumulation; bias + ReLU in f32.
        y = jnp.dot(h_bf16, w_ref[...], preferred_element_type=f32) + b_ref[...]
        return jnp.maximum(y, 0.0) if relu else y

    @pl.when(ni == 0)
    def _():
        gmax_ref[...] = jnp.full(gmax_ref.shape, -jnp.inf, gmax_ref.dtype)

    # ---- input_transform layers 1-2 on this point chunk (M = tb*tn rows) ----
    x = x_ref[...].reshape(tb * tn, x_ref.shape[-1])            # (tb*tn, F) bf16
    h = dense(x, w1_ref, b1_ref).astype(bf16)                   # (tb*tn, 64)
    h = dense(h, w2_ref, b2_ref).astype(bf16)                   # (tb*tn, 128)

    # ---- layer 3 (128 -> 1024) fused with the point max-pool, column-chunked ----
    # Keeps the live f32 activation at (tb*tn, co_chunk) instead of (tb*tn, 1024).
    n_feat = w3_ref.shape[1]                                    # 1024
    for co in range(0, n_feat, co_chunk):
        y = jnp.dot(h, w3_ref[:, co:co + co_chunk], preferred_element_type=f32)
        y = jnp.maximum(y + b3_ref[:, co:co + co_chunk], 0.0)   # (tb*tn, co_chunk)
        y = jnp.max(y.reshape(tb, tn, co_chunk), axis=1)        # (tb, co_chunk)
        gmax_ref[:, co:co + co_chunk] = jnp.maximum(gmax_ref[:, co:co + co_chunk], y)

    # ---- head: feature_transform + fc_regression, only on the last chunk ----
    @pl.when(ni == n_chunks - 1)
    def _():
        g = gmax_ref[...]                                       # (tb, 1024) f32
        g = dense(g.astype(bf16), w4_ref, b4_ref)               # (tb, 512)
        g = dense(g.astype(bf16), w5_ref, b5_ref)               # (tb, 256)
        g = dense(g.astype(bf16), w6_ref, b6_ref)               # (tb, 128)
        # second torch.max over a length-1 dim is the identity.
        g = dense(g.astype(bf16), w7_ref, b7_ref)               # (tb, 64)
        out = dense(g.astype(bf16), w8_ref, b8_ref, relu=False) # (tb, OUT_PAD)
        o_ref[...] = out.astype(o_ref.dtype)


def pointnet_forward(x_ncl, params):
    """x_ncl: (B, C, N) float32, PyTorch Conv1d layout. Returns (B, num_output) f32."""
    B, C, N = x_ncl.shape
    num_out = params["w8"].shape[1]

    def rup(a, m):
        return (a + m - 1) // m * m

    # ---- tiling choices ----
    # Point chunk: full (16-aligned) N if small, else 256-row chunks.
    n_pad = rup(N, 16)
    TN = n_pad if n_pad <= 256 else 256
    n_pad = rup(n_pad, TN)
    n_chunks = n_pad // TN

    # Batch block sized so each grid step feeds ~2048 rows to the MXU.
    TB = max(1, min(B, 2048 // TN))
    b_pad = rup(B, TB)

    OUT_PAD = rup(max(num_out, 1), 128)   # lane-dense output block
    CO_CHUNK = 256                        # divides 1024 (global-feature width)

    # (B, C, N) -> (B, N, C), bf16.  Pad points with edge replication (max-safe,
    # no in-kernel masking needed); pad batch with zeros (sliced off afterwards).
    x = jnp.transpose(x_ncl, (0, 2, 1)).astype(jnp.bfloat16)
    if n_pad != N:
        x = jnp.pad(x, ((0, 0), (0, n_pad - N), (0, 0)), mode="edge")
    if b_pad != B:
        x = jnp.pad(x, ((0, b_pad - B), (0, 0), (0, 0)))

    # ---- pack weights: bf16 weights, f32 biases; final layer padded to OUT_PAD lanes ----
    flat_wb = []
    weight_specs = []
    for i in range(1, 9):
        w = params[f"w{i}"]
        b = params[f"b{i}"]
        if i == 8:
            w = jnp.pad(w, ((0, 0), (0, OUT_PAD - w.shape[1])))
            b = jnp.pad(b, ((0, 0), (0, OUT_PAD - b.shape[1])))
        w = w.astype(jnp.bfloat16)
        b = b.astype(jnp.float32)
        flat_wb += [w, b]
        # Constant index_map -> blocks stay resident, no per-step re-DMA.
        weight_specs.append(pl.BlockSpec(w.shape, lambda bi, ni: (0, 0)))
        weight_specs.append(pl.BlockSpec(b.shape, lambda bi, ni: (0, 0)))

    kernel = functools.partial(_pointnet_kernel, tb=TB, tn=TN, co_chunk=CO_CHUNK)

    grid_spec = pltpu.PrefetchScalarGridSpec(
        num_scalar_prefetch=0,
        grid=(b_pad // TB, n_chunks),
        in_specs=[pl.BlockSpec((TB, TN, C), lambda bi, ni: (bi, ni, 0))] + weight_specs,
        out_specs=pl.BlockSpec((TB, OUT_PAD), lambda bi, ni: (bi, 0)),
        scratch_shapes=[pltpu.VMEM((TB, 1024), jnp.float32)],
    )

    out = pl.pallas_call(
        kernel,
        out_shape=jax.ShapeDtypeStruct((b_pad, OUT_PAD), jnp.float32),
        grid_spec=grid_spec,
        compiler_params=pltpu.CompilerParams(
            dimension_semantics=("parallel", "arbitrary"),
            vmem_limit_bytes=48 * 1024 * 1024),
    )(x, *flat_wb)

    return out[:B, :num_out]


def init_params(key, num_features, num_output):
    """Deterministic synthetic params; BN (eval-mode, running stats 0/1) folded into conv/linear."""
    eps = 1e-5

    conv_dims = [(num_features, 64), (64, 128), (128, 1024),      # input_transform
                 (1024, 512), (512, 256), (256, 128)]             # feature_transform
    fc_dims = [(128, 64), (64, num_output)]                       # fc_regression

    params = {}
    keys = jax.random.split(key, 4 * len(conv_dims) + 2 * len(fc_dims))
    ki = 0

    # Conv1d(k=1) + BatchNorm1d folded:  y = (x @ W + b) * s + t,
    # s = gamma/sqrt(var+eps), t = beta - mean*s   (running_var=1, running_mean=0)
    for li, (cin, cout) in enumerate(conv_dims, start=1):
        w = 0.1 * jax.random.normal(keys[ki], (cin, cout), jnp.float32); ki += 1
        b = 0.1 * jax.random.normal(keys[ki], (cout,), jnp.float32);     ki += 1
        gamma = 1.0 + 0.1 * jax.random.normal(keys[ki], (cout,), jnp.float32); ki += 1
        beta = 0.1 * jax.random.normal(keys[ki], (cout,), jnp.float32);        ki += 1
        scale = gamma / jnp.sqrt(1.0 + eps)
        shift = beta
        params[f"w{li}"] = w * scale[None, :]
        params[f"b{li}"] = (b * scale + shift)[None, :]

    for li, (cin, cout) in enumerate(fc_dims, start=len(conv_dims) + 1):
        w = 0.1 * jax.random.normal(keys[ki], (cin, cout), jnp.float32); ki += 1
        b = 0.1 * jax.random.normal(keys[ki], (cout,), jnp.float32);     ki += 1
        params[f"w{li}"] = w
        params[f"b{li}"] = b[None, :]

    return params


if __name__ == "__main__":
    B, num_features, N = 2, 4, 16
    num_output = 3

    key = jax.random.PRNGKey(0)
    k_x, k_p = jax.random.split(key)
    x = jax.random.normal(k_x, (B, num_features, N), jnp.float32)   # PyTorch NCL layout
    params = init_params(k_p, num_features, num_output)

    fwd = jax.jit(pointnet_forward)
    y = fwd(x, params)
    jax.block_until_ready(y)

    assert y.shape == (B, num_output), y.shape
    assert bool(jnp.all(jnp.isfinite(y)))
    print("KERNEL_OK")
</pallas_src>

<mosaic_0001>
module attributes {stable_mosaic.version = 11 : i64} {
  func.func @_pointnet_kernel(%arg0: i32, %arg1: i32, %arg2: memref<2x16x4xbf16, #tpu.memory_space<vmem>>, %arg3: memref<4x64xbf16, #tpu.memory_space<vmem>>, %arg4: memref<1x64xf32, #tpu.memory_space<vmem>>, %arg5: memref<64x128xbf16, #tpu.memory_space<vmem>>, %arg6: memref<1x128xf32, #tpu.memory_space<vmem>>, %arg7: memref<128x1024xbf16, #tpu.memory_space<vmem>>, %arg8: memref<1x1024xf32, #tpu.memory_space<vmem>>, %arg9: memref<1024x512xbf16, #tpu.memory_space<vmem>>, %arg10: memref<1x512xf32, #tpu.memory_space<vmem>>, %arg11: memref<512x256xbf16, #tpu.memory_space<vmem>>, %arg12: memref<1x256xf32, #tpu.memory_space<vmem>>, %arg13: memref<256x128xbf16, #tpu.memory_space<vmem>>, %arg14: memref<1x128xf32, #tpu.memory_space<vmem>>, %arg15: memref<128x64xbf16, #tpu.memory_space<vmem>>, %arg16: memref<1x64xf32, #tpu.memory_space<vmem>>, %arg17: memref<64x128xbf16, #tpu.memory_space<vmem>>, %arg18: memref<1x128xf32, #tpu.memory_space<vmem>>, %arg19: memref<2x128xf32, #tpu.memory_space<vmem>>, %arg20: memref<2x1024xf32, #tpu.memory_space<vmem>>) attributes {dimension_semantics = [#tpu.dimension_semantics<parallel>, #tpu.dimension_semantics<arbitrary>], iteration_bounds = array<i64: 1, 1>, scalar_prefetch = 0 : i64, scratch_operands = 1 : i64, tpu.core_type = #tpu.core_type<tc>, window_params = [{transform_indices = @transform_0, window_bounds = array<i64: 2, 16, 4>}, {pipeline_mode = #tpu.pipeline_mode<synchronous>, transform_indices = @transform_1, window_bounds = array<i64: 4, 64>}, {pipeline_mode = #tpu.pipeline_mode<synchronous>, transform_indices = @transform_2, window_bounds = array<i64: 1, 64>}, {pipeline_mode = #tpu.pipeline_mode<synchronous>, transform_indices = @transform_3, window_bounds = array<i64: 64, 128>}, {pipeline_mode = #tpu.pipeline_mode<synchronous>, transform_indices = @transform_4, window_bounds = array<i64: 1, 128>}, {pipeline_mode = #tpu.pipeline_mode<synchronous>, transform_indices = @transform_5, window_bounds = array<i64: 128, 1024>}, {pipeline_mode = #tpu.pipeline_mode<synchronous>, transform_indices = @transform_6, window_bounds = array<i64: 1, 1024>}, {pipeline_mode = #tpu.pipeline_mode<synchronous>, transform_indices = @transform_7, window_bounds = array<i64: 1024, 512>}, {pipeline_mode = #tpu.pipeline_mode<synchronous>, transform_indices = @transform_8, window_bounds = array<i64: 1, 512>}, {pipeline_mode = #tpu.pipeline_mode<synchronous>, transform_indices = @transform_9, window_bounds = array<i64: 512, 256>}, {pipeline_mode = #tpu.pipeline_mode<synchronous>, transform_indices = @transform_10, window_bounds = array<i64: 1, 256>}, {pipeline_mode = #tpu.pipeline_mode<synchronous>, transform_indices = @transform_11, window_bounds = array<i64: 256, 128>}, {pipeline_mode = #tpu.pipeline_mode<synchronous>, transform_indices = @transform_12, window_bounds = array<i64: 1, 128>}, {pipeline_mode = #tpu.pipeline_mode<synchronous>, transform_indices = @transform_13, window_bounds = array<i64: 128, 64>}, {pipeline_mode = #tpu.pipeline_mode<synchronous>, transform_indices = @transform_14, window_bounds = array<i64: 1, 64>}, {pipeline_mode = #tpu.pipeline_mode<synchronous>, transform_indices = @transform_15, window_bounds = array<i64: 64, 128>}, {pipeline_mode = #tpu.pipeline_mode<synchronous>, transform_indices = @transform_16, window_bounds = array<i64: 1, 128>}, {transform_indices = @transform_17, window_bounds = array<i64: 2, 128>}]} {
    %c0_i32 = arith.constant 0 : i32
    %0 = arith.cmpi eq, %arg1, %c0_i32 : i32
    %1 = arith.extui %0 : i1 to i32
    %c0_i32_0 = arith.constant 0 : i32
    %2 = arith.cmpi ne, %1, %c0_i32_0 : i32
    scf.if %2 {
      %cst_57 = arith.constant 0xFF800000 : f32
      %72 = vector.broadcast %cst_57 : f32 to vector<2x1024xf32>
      %c0_58 = arith.constant 0 : index
      %c0_59 = arith.constant 0 : index
      %73 = vector.load %arg20[%c0_58, %c0_59] : memref<2x1024xf32, #tpu.memory_space<vmem>>, vector<2x1024xf32>
      tpu.vector_store %arg20[%c0_58, %c0_59], %72 {strides = array<i32>} : memref<2x1024xf32, #tpu.memory_space<vmem>>, vector<2x1024xf32>,
    } else {
    }
    %c0 = arith.constant 0 : index
    %c0_1 = arith.constant 0 : index
    %c0_2 = arith.constant 0 : index
    %3 = vector.load %arg2[%c0, %c0_1, %c0_2] : memref<2x16x4xbf16, #tpu.memory_space<vmem>>, vector<2x16x4xbf16>
    %4 = vector.shape_cast %3 : vector<2x16x4xbf16> to vector<32x4xbf16>
    %c0_3 = arith.constant 0 : index
    %c0_4 = arith.constant 0 : index
    %5 = vector.load %arg3[%c0_3, %c0_4] : memref<4x64xbf16, #tpu.memory_space<vmem>>, vector<4x64xbf16>
    %cst = arith.constant dense<0.000000e+00> : vector<32x64xf32>
    %6 = tpu.matmul %4, %5, %cst {dimension_numbers = #tpu.dot_dimension_numbers<[1], [0], [0], [1], [0, 0, 1, 1], [], []>} : vector<32x4xbf16>, vector<4x64xbf16>, vector<32x64xf32> -> vector<32x64xf32>
    %c0_5 = arith.constant 0 : index
    %c0_6 = arith.constant 0 : index
    %7 = vector.load %arg4[%c0_5, %c0_6] : memref<1x64xf32, #tpu.memory_space<vmem>>, vector<1x64xf32>
    %8 = vector.broadcast %7 : vector<1x64xf32> to vector<32x64xf32>
    %9 = arith.addf %6, %8 : vector<32x64xf32>
    %cst_7 = arith.constant 0.000000e+00 : f32
    %10 = vector.broadcast %cst_7 : f32 to vector<32x64xf32>
    %11 = arith.maximumf %9, %10 : vector<32x64xf32>
    %12 = arith.truncf %11 : vector<32x64xf32> to vector<32x64xbf16>
    %c0_8 = arith.constant 0 : index
    %c0_9 = arith.constant 0 : index
    %13 = vector.load %arg5[%c0_8, %c0_9] : memref<64x128xbf16, #tpu.memory_space<vmem>>, vector<64x128xbf16>
    %cst_10 = arith.constant dense<0.000000e+00> : vector<32x128xf32>
    %14 = tpu.matmul %12, %13, %cst_10 {dimension_numbers = #tpu.dot_dimension_numbers<[1], [0], [0], [1], [0, 0, 1, 1], [], []>} : vector<32x64xbf16>, vector<64x128xbf16>, vector<32x128xf32> -> vector<32x128xf32>
    %c0_11 = arith.constant 0 : index
    %c0_12 = arith.constant 0 : index
    %15 = vector.load %arg6[%c0_11, %c0_12] : memref<1x128xf32, #tpu.memory_space<vmem>>, vector<1x128xf32>
    %16 = vector.broadcast %15 : vector<1x128xf32> to vector<32x128xf32>
    %17 = arith.addf %14, %16 : vector<32x128xf32>
    %cst_13 = arith.constant 0.000000e+00 : f32
    %18 = vector.broadcast %cst_13 : f32 to vector<32x128xf32>
    %19 = arith.maximumf %17, %18 : vector<32x128xf32>
    %20 = arith.truncf %19 : vector<32x128xf32> to vector<32x128xbf16>
    %c0_14 = arith.constant 0 : index
    %c0_15 = arith.constant 0 : index
    %21 = vector.load %arg7[%c0_14, %c0_15] : memref<128x1024xbf16, #tpu.memory_space<vmem>>, vector<128x256xbf16>
    %cst_16 = arith.constant dense<0.000000e+00> : vector<32x256xf32>
    %22 = tpu.matmul %20, %21, %cst_16 {dimension_numbers = #tpu.dot_dimension_numbers<[1], [0], [0], [1], [0, 0, 1, 1], [], []>} : vector<32x128xbf16>, vector<128x256xbf16>, vector<32x256xf32> -> vector<32x256xf32>
    %c0_17 = arith.constant 0 : index
    %c0_18 = arith.constant 0 : index
    %23 = vector.load %arg8[%c0_17, %c0_18] : memref<1x1024xf32, #tpu.memory_space<vmem>>, vector<1x256xf32>
    %24 = vector.broadcast %23 : vector<1x256xf32> to vector<32x256xf32>
    %25 = arith.addf %22, %24 : vector<32x256xf32>
    %cst_19 = arith.constant 0.000000e+00 : f32
    %26 = vector.broadcast %cst_19 : f32 to vector<32x256xf32>
    %27 = arith.maximumf %25, %26 : vector<32x256xf32>
    %28 = vector.shape_cast %27 : vector<32x256xf32> to vector<2x16x256xf32>
    %cst_20 = arith.constant dense<0xFF800000> : vector<2x256xf32>
    %29 = vector.multi_reduction <maximumf>, %28, %cst_20 [1] : vector<2x16x256xf32> to vector<2x256xf32>
    %c0_21 = arith.constant 0 : index
    %c0_22 = arith.constant 0 : index
    %30 = vector.load %arg20[%c0_21, %c0_22] : memref<2x1024xf32, #tpu.memory_space<vmem>>, vector<2x256xf32>
    %31 = arith.maximumf %30, %29 : vector<2x256xf32>
    %c0_23 = arith.constant 0 : index
    %c0_24 = arith.constant 0 : index
    %32 = vector.load %arg20[%c0_23, %c0_24] : memref<2x1024xf32, #tpu.memory_space<vmem>>, vector<2x256xf32>
    tpu.vector_store %arg20[%c0_23, %c0_24], %31 {strides = array<i32>} : memref<2x1024xf32, #tpu.memory_space<vmem>>, vector<2x256xf32>,
    %c0_25 = arith.constant 0 : index
    %c256 = arith.constant 256 : index
    %33 = vector.load %arg7[%c0_25, %c256] : memref<128x1024xbf16, #tpu.memory_space<vmem>>, vector<128x256xbf16>
    %cst_26 = arith.constant dense<0.000000e+00> : vector<32x256xf32>
    %34 = tpu.matmul %20, %33, %cst_26 {dimension_numbers = #tpu.dot_dimension_numbers<[1], [0], [0], [1], [0, 0, 1, 1], [], []>} : vector<32x128xbf16>, vector<128x256xbf16>, vector<32x256xf32> -> vector<32x256xf32>
    %c0_27 = arith.constant 0 : index
    %c256_28 = arith.constant 256 : index
    %35 = vector.load %arg8[%c0_27, %c256_28] : memref<1x1024xf32, #tpu.memory_space<vmem>>, vector<1x256xf32>
    %36 = vector.broadcast %35 : vector<1x256xf32> to vector<32x256xf32>
    %37 = arith.addf %34, %36 : vector<32x256xf32>
    %cst_29 = arith.constant 0.000000e+00 : f32
    %38 = vector.broadcast %cst_29 : f32 to vector<32x256xf32>
    %39 = arith.maximumf %37, %38 : vector<32x256xf32>
    %40 = vector.shape_cast %39 : vector<32x256xf32> to vector<2x16x256xf32>
    %cst_30 = arith.constant dense<0xFF800000> : vector<2x256xf32>
    %41 = vector.multi_reduction <maximumf>, %40, %cst_30 [1] : vector<2x16x256xf32> to vector<2x256xf32>
    %c0_31 = arith.constant 0 : index
    %c256_32 = arith.constant 256 : index
    %42 = vector.load %arg20[%c0_31, %c256_32] : memref<2x1024xf32, #tpu.memory_space<vmem>>, vector<2x256xf32>
    %43 = arith.maximumf %42, %41 : vector<2x256xf32>
    %c0_33 = arith.constant 0 : index
    %c256_34 = arith.constant 256 : index
    %44 = vector.load %arg20[%c0_33, %c256_34] : memref<2x1024xf32, #tpu.memory_space<vmem>>, vector<2x256xf32>
    tpu.vector_store %arg20[%c0_33, %c256_34], %43 {strides = array<i32>} : memref<2x1024xf32, #tpu.memory_space<vmem>>, vector<2x256xf32>,
    %c0_35 = arith.constant 0 : index
    %c512 = arith.constant 512 : index
    %45 = vector.load %arg7[%c0_35, %c512] : memref<128x1024xbf16, #tpu.memory_space<vmem>>, vector<128x256xbf16>
    %cst_36 = arith.constant dense<0.000000e+00> : vector<32x256xf32>
    %46 = tpu.matmul %20, %45, %cst_36 {dimension_numbers = #tpu.dot_dimension_numbers<[1], [0], [0], [1], [0, 0, 1, 1], [], []>} : vector<32x128xbf16>, vector<128x256xbf16>, vector<32x256xf32> -> vector<32x256xf32>
    %c0_37 = arith.constant 0 : index
    %c512_38 = arith.constant 512 : index
    %47 = vector.load %arg8[%c0_37, %c512_38] : memref<1x1024xf32, #tpu.memory_space<vmem>>, vector<1x256xf32>
    %48 = vector.broadcast %47 : vector<1x256xf32> to vector<32x256xf32>
    %49 = arith.addf %46, %48 : vector<32x256xf32>
    %cst_39 = arith.constant 0.000000e+00 : f32
    %50 = vector.broadcast %cst_39 : f32 to vector<32x256xf32>
    %51 = arith.maximumf %49, %50 : vector<32x256xf32>
    %52 = vector.shape_cast %51 : vector<32x256xf32> to vector<2x16x256xf32>
    %cst_40 = arith.constant dense<0xFF800000> : vector<2x256xf32>
    %53 = vector.multi_reduction <maximumf>, %52, %cst_40 [1] : vector<2x16x256xf32> to vector<2x256xf32>
    %c0_41 = arith.constant 0 : index
    %c512_42 = arith.constant 512 : index
    %54 = vector.load %arg20[%c0_41, %c512_42] : memref<2x1024xf32, #tpu.memory_space<vmem>>, vector<2x256xf32>
    %55 = arith.maximumf %54, %53 : vector<2x256xf32>
    %c0_43 = arith.constant 0 : index
    %c512_44 = arith.constant 512 : index
    %56 = vector.load %arg20[%c0_43, %c512_44] : memref<2x1024xf32, #tpu.memory_space<vmem>>, vector<2x256xf32>
    tpu.vector_store %arg20[%c0_43, %c512_44], %55 {strides = array<i32>} : memref<2x1024xf32, #tpu.memory_space<vmem>>, vector<2x256xf32>,
    %c0_45 = arith.constant 0 : index
    %c768 = arith.constant 768 : index
    %57 = vector.load %arg7[%c0_45, %c768] : memref<128x1024xbf16, #tpu.memory_space<vmem>>, vector<128x256xbf16>
    %cst_46 = arith.constant dense<0.000000e+00> : vector<32x256xf32>
    %58 = tpu.matmul %20, %57, %cst_46 {dimension_numbers = #tpu.dot_dimension_numbers<[1], [0], [0], [1], [0, 0, 1, 1], [], []>} : vector<32x128xbf16>, vector<128x256xbf16>, vector<32x256xf32> -> vector<32x256xf32>
    %c0_47 = arith.constant 0 : index
    %c768_48 = arith.constant 768 : index
    %59 = vector.load %arg8[%c0_47, %c768_48] : memref<1x1024xf32, #tpu.memory_space<vmem>>, vector<1x256xf32>
    %60 = vector.broadcast %59 : vector<1x256xf32> to vector<32x256xf32>
    %61 = arith.addf %58, %60 : vector<32x256xf32>
    %cst_49 = arith.constant 0.000000e+00 : f32
    %62 = vector.broadcast %cst_49 : f32 to vector<32x256xf32>
    %63 = arith.maximumf %61, %62 : vector<32x256xf32>
    %64 = vector.shape_cast %63 : vector<32x256xf32> to vector<2x16x256xf32>
    %cst_50 = arith.constant dense<0xFF800000> : vector<2x256xf32>
    %65 = vector.multi_reduction <maximumf>, %64, %cst_50 [1] : vector<2x16x256xf32> to vector<2x256xf32>
    %c0_51 = arith.constant 0 : index
    %c768_52 = arith.constant 768 : index
    %66 = vector.load %arg20[%c0_51, %c768_52] : memref<2x1024xf32, #tpu.memory_space<vmem>>, vector<2x256xf32>
    %67 = arith.maximumf %66, %65 : vector<2x256xf32>
    %c0_53 = arith.constant 0 : index
    %c768_54 = arith.constant 768 : index
    %68 = vector.load %arg20[%c0_53, %c768_54] : memref<2x1024xf32, #tpu.memory_space<vmem>>, vector<2x256xf32>
    tpu.vector_store %arg20[%c0_53, %c768_54], %67 {strides = array<i32>} : memref<2x1024xf32, #tpu.memory_space<vmem>>, vector<2x256xf32>,
    %c0_i32_55 = arith.constant 0 : i32
    %69 = arith.cmpi eq, %arg1, %c0_i32_55 : i32
    %70 = arith.extui %69 : i1 to i32
    %c0_i32_56 = arith.constant 0 : i32
    %71 = arith.cmpi ne, %70, %c0_i32_56 : i32
    scf.if %71 {
      %c0_57 = arith.constant 0 : index
      %c0_58 = arith.constant 0 : index
      %72 = vector.load %arg20[%c0_57, %c0_58] : memref<2x1024xf32, #tpu.memory_space<vmem>>, vector<2x1024xf32>
      %73 = arith.truncf %72 : vector<2x1024xf32> to vector<2x1024xbf16>
      %c0_59 = arith.constant 0 : index
      %c0_60 = arith.constant 0 : index
      %74 = vector.load %arg9[%c0_59, %c0_60] : memref<1024x512xbf16, #tpu.memory_space<vmem>>, vector<1024x512xbf16>
      %cst_61 = arith.constant dense<0.000000e+00> : vector<2x512xf32>
      %75 = tpu.matmul %73, %74, %cst_61 {dimension_numbers = #tpu.dot_dimension_numbers<[1], [0], [0], [1], [0, 0, 1, 1], [], []>} : vector<2x1024xbf16>, vector<1024x512xbf16>, vector<2x512xf32> -> vector<2x512xf32>
      %c0_62 = arith.constant 0 : index
      %c0_63 = arith.constant 0 : index
      %76 = vector.load %arg10[%c0_62, %c0_63] : memref<1x512xf32, #tpu.memory_space<vmem>>, vector<1x512xf32>
      %77 = vector.broadcast %76 : vector<1x512xf32> to vector<2x512xf32>
      %78 = arith.addf %75, %77 : vector<2x512xf32>
      %cst_64 = arith.constant 0.000000e+00 : f32
      %79 = vector.broadcast %cst_64 : f32 to vector<2x512xf32>
      %80 = arith.maximumf %78, %79 : vector<2x512xf32>
      %81 = arith.truncf %80 : vector<2x512xf32> to vector<2x512xbf16>
      %c0_65 = arith.constant 0 : index
      %c0_66 = arith.constant 0 : index
      %82 = vector.load %arg11[%c0_65, %c0_66] : memref<512x256xbf16, #tpu.memory_space<vmem>>, vector<512x256xbf16>
      %cst_67 = arith.constant dense<0.000000e+00> : vector<2x256xf32>
      %83 = tpu.matmul %81, %82, %cst_67 {dimension_numbers = #tpu.dot_dimension_numbers<[1], [0], [0], [1], [0, 0, 1, 1], [], []>} : vector<2x512xbf16>, vector<512x256xbf16>, vector<2x256xf32> -> vector<2x256xf32>
      %c0_68 = arith.constant 0 : index
      %c0_69 = arith.constant 0 : index
      %84 = vector.load %arg12[%c0_68, %c0_69] : memref<1x256xf32, #tpu.memory_space<vmem>>, vector<1x256xf32>
      %85 = vector.broadcast %84 : vector<1x256xf32> to vector<2x256xf32>
      %86 = arith.addf %83, %85 : vector<2x256xf32>
      %cst_70 = arith.constant 0.000000e+00 : f32
      %87 = vector.broadcast %cst_70 : f32 to vector<2x256xf32>
      %88 = arith.maximumf %86, %87 : vector<2x256xf32>
      %89 = arith.truncf %88 : vector<2x256xf32> to vector<2x256xbf16>
      %c0_71 = arith.constant 0 : index
      %c0_72 = arith.constant 0 : index
      %90 = vector.load %arg13[%c0_71, %c0_72] : memref<256x128xbf16, #tpu.memory_space<vmem>>, vector<256x128xbf16>
      %cst_73 = arith.constant dense<0.000000e+00> : vector<2x128xf32>
      %91 = tpu.matmul %89, %90, %cst_73 {dimension_numbers = #tpu.dot_dimension_numbers<[1], [0], [0], [1], [0, 0, 1, 1], [], []>} : vector<2x256xbf16>, vector<256x128xbf16>, vector<2x128xf32> -> vector<2x128xf32>
      %c0_74 = arith.constant 0 : index
      %c0_75 = arith.constant 0 : index
      %92 = vector.load %arg14[%c0_74, %c0_75] : memref<1x128xf32, #tpu.memory_space<vmem>>, vector<1x128xf32>
      %93 = vector.broadcast %92 : vector<1x128xf32> to vector<2x128xf32>
      %94 = arith.addf %91, %93 : vector<2x128xf32>
      %cst_76 = arith.constant 0.000000e+00 : f32
      %95 = vector.broadcast %cst_76 : f32 to vector<2x128xf32>
      %96 = arith.maximumf %94, %95 : vector<2x128xf32>
      %97 = arith.truncf %96 : vector<2x128xf32> to vector<2x128xbf16>
      %c0_77 = arith.constant 0 : index
      %c0_78 = arith.constant 0 : index
      %98 = vector.load %arg15[%c0_77, %c0_78] : memref<128x64xbf16, #tpu.memory_space<vmem>>, vector<128x64xbf16>
      %cst_79 = arith.constant dense<0.000000e+00> : vector<2x64xf32>
      %99 = tpu.matmul %97, %98, %cst_79 {dimension_numbers = #tpu.dot_dimension_numbers<[1], [0], [0], [1], [0, 0, 1, 1], [], []>} : vector<2x128xbf16>, vector<128x64xbf16>, vector<2x64xf32> -> vector<2x64xf32>
      %c0_80 = arith.constant 0 : index
      %c0_81 = arith.constant 0 : index
      %100 = vector.load %arg16[%c0_80, %c0_81] : memref<1x64xf32, #tpu.memory_space<vmem>>, vector<1x64xf32>
      %101 = vector.broadcast %100 : vector<1x64xf32> to vector<2x64xf32>
      %102 = arith.addf %99, %101 : vector<2x64xf32>
      %cst_82 = arith.constant 0.000000e+00 : f32
      %103 = vector.broadcast %cst_82 : f32 to vector<2x64xf32>
      %104 = arith.maximumf %102, %103 : vector<2x64xf32>
      %105 = arith.truncf %104 : vector<2x64xf32> to vector<2x64xbf16>
      %c0_83 = arith.constant 0 : index
      %c0_84 = arith.constant 0 : index
      %106 = vector.load %arg17[%c0_83, %c0_84] : memref<64x128xbf16, #tpu.memory_space<vmem>>, vector<64x128xbf16>
      %cst_85 = arith.constant dense<0.000000e+00> : vector<2x128xf32>
      %107 = tpu.matmul %105, %106, %cst_85 {dimension_numbers = #tpu.dot_dimension_numbers<[1], [0], [0], [1], [0, 0, 1, 1], [], []>} : vector<2x64xbf16>, vector<64x128xbf16>, vector<2x128xf32> -> vector<2x128xf32>
      %c0_86 = arith.constant 0 : index
      %c0_87 = arith.constant 0 : index
      %108 = vector.load %arg18[%c0_86, %c0_87] : memref<1x128xf32, #tpu.memory_space<vmem>>, vector<1x128xf32>
      %109 = vector.broadcast %108 : vector<1x128xf32> to vector<2x128xf32>
      %110 = arith.addf %107, %109 : vector<2x128xf32>
      %c0_88 = arith.constant 0 : index
      %c0_89 = arith.constant 0 : index
      %111 = vector.load %arg19[%c0_88, %c0_89] : memref<2x128xf32, #tpu.memory_space<vmem>>, vector<2x128xf32>
      tpu.vector_store %arg19[%c0_88, %c0_89], %110 {strides = array<i32>} : memref<2x128xf32, #tpu.memory_space<vmem>>, vector<2x128xf32>,
    } else {
    }
    return
  }
  func.func @transform_0(%arg0: i32, %arg1: i32) -> (i32, i32, i32) {
    %c0_i32 = arith.constant 0 : i32
    %c0_i32_0 = arith.constant 0 : i32
    return %arg0, %arg1, %c0_i32 : i32, i32, i32
  }
  func.func @transform_1(%arg0: i32, %arg1: i32) -> (i32, i32) {
    %c0_i32 = arith.constant 0 : i32
    %c0_i32_0 = arith.constant 0 : i32
    %c0_i32_1 = arith.constant 0 : i32
    return %c0_i32, %c0_i32_0 : i32, i32
  }
  func.func @transform_2(%arg0: i32, %arg1: i32) -> (i32, i32) {
    %c0_i32 = arith.constant 0 : i32
    %c0_i32_0 = arith.constant 0 : i32
    %c0_i32_1 = arith.constant 0 : i32
    return %c0_i32, %c0_i32_0 : i32, i32
  }
  func.func @transform_3(%arg0: i32, %arg1: i32) -> (i32, i32) {
    %c0_i32 = arith.constant 0 : i32
    %c0_i32_0 = arith.constant 0 : i32
    %c0_i32_1 = arith.constant 0 : i32
    return %c0_i32, %c0_i32_0 : i32, i32
  }
  func.func @transform_4(%arg0: i32, %arg1: i32) -> (i32, i32) {
    %c0_i32 = arith.constant 0 : i32
    %c0_i32_0 = arith.constant 0 : i32
    %c0_i32_1 = arith.constant 0 : i32
    return %c0_i32, %c0_i32_0 : i32, i32
  }
  func.func @transform_5(%arg0: i32, %arg1: i32) -> (i32, i32) {
    %c0_i32 = arith.constant 0 : i32
    %c0_i32_0 = arith.constant 0 : i32
    %c0_i32_1 = arith.constant 0 : i32
    return %c0_i32, %c0_i32_0 : i32, i32
  }
  func.func @transform_6(%arg0: i32, %arg1: i32) -> (i32, i32) {
    %c0_i32 = arith.constant 0 : i32
    %c0_i32_0 = arith.constant 0 : i32
    %c0_i32_1 = arith.constant 0 : i32
    return %c0_i32, %c0_i32_0 : i32, i32
  }
  func.func @transform_7(%arg0: i32, %arg1: i32) -> (i32, i32) {
    %c0_i32 = arith.constant 0 : i32
    %c0_i32_0 = arith.constant 0 : i32
    %c0_i32_1 = arith.constant 0 : i32
    return %c0_i32, %c0_i32_0 : i32, i32
  }
  func.func @transform_8(%arg0: i32, %arg1: i32) -> (i32, i32) {
    %c0_i32 = arith.constant 0 : i32
    %c0_i32_0 = arith.constant 0 : i32
    %c0_i32_1 = arith.constant 0 : i32
    return %c0_i32, %c0_i32_0 : i32, i32
  }
  func.func @transform_9(%arg0: i32, %arg1: i32) -> (i32, i32) {
    %c0_i32 = arith.constant 0 : i32
    %c0_i32_0 = arith.constant 0 : i32
    %c0_i32_1 = arith.constant 0 : i32
    return %c0_i32, %c0_i32_0 : i32, i32
  }
  func.func @transform_10(%arg0: i32, %arg1: i32) -> (i32, i32) {
    %c0_i32 = arith.constant 0 : i32
    %c0_i32_0 = arith.constant 0 : i32
    %c0_i32_1 = arith.constant 0 : i32
    return %c0_i32, %c0_i32_0 : i32, i32
  }
  func.func @transform_11(%arg0: i32, %arg1: i32) -> (i32, i32) {
    %c0_i32 = arith.constant 0 : i32
    %c0_i32_0 = arith.constant 0 : i32
    %c0_i32_1 = arith.constant 0 : i32
    return %c0_i32, %c0_i32_0 : i32, i32
  }
  func.func @transform_12(%arg0: i32, %arg1: i32) -> (i32, i32) {
    %c0_i32 = arith.constant 0 : i32
    %c0_i32_0 = arith.constant 0 : i32
    %c0_i32_1 = arith.constant 0 : i32
    return %c0_i32, %c0_i32_0 : i32, i32
  }
  func.func @transform_13(%arg0: i32, %arg1: i32) -> (i32, i32) {
    %c0_i32 = arith.constant 0 : i32
    %c0_i32_0 = arith.constant 0 : i32
    %c0_i32_1 = arith.constant 0 : i32
    return %c0_i32, %c0_i32_0 : i32, i32
  }
  func.func @transform_14(%arg0: i32, %arg1: i32) -> (i32, i32) {
    %c0_i32 = arith.constant 0 : i32
    %c0_i32_0 = arith.constant 0 : i32
    %c0_i32_1 = arith.constant 0 : i32
    return %c0_i32, %c0_i32_0 : i32, i32
  }
  func.func @transform_15(%arg0: i32, %arg1: i32) -> (i32, i32) {
    %c0_i32 = arith.constant 0 : i32
    %c0_i32_0 = arith.constant 0 : i32
    %c0_i32_1 = arith.constant 0 : i32
    return %c0_i32, %c0_i32_0 : i32, i32
  }
  func.func @transform_16(%arg0: i32, %arg1: i32) -> (i32, i32) {
    %c0_i32 = arith.constant 0 : i32
    %c0_i32_0 = arith.constant 0 : i32
    %c0_i32_1 = arith.constant 0 : i32
    return %c0_i32, %c0_i32_0 : i32, i32
  }
  func.func @transform_17(%arg0: i32, %arg1: i32) -> (i32, i32) {
    %c0_i32 = arith.constant 0 : i32
    %c0_i32_0 = arith.constant 0 : i32
    return %arg0, %c0_i32 : i32, i32
  }
}

</mosaic_0001>

<bundles_post_ra>
// kernel: pointnet_forward.1
= control target key start
LH: loop header
LB: loop body
LE: loop exit
PB: predicated region body
PF: predicated region fallthrough
CT: control target
= control target key end

     0   :  { %s8702_s0 = inlined_call_operand.vmem [shape: bf16[2,16,4], index: 0, kind: input, shape index: {}]   ;;  %s8703_s1 = inlined_call_operand.vmem [shape: bf16[4,64], index: 1, kind: input, shape index: {}]   ;;  %s8704_s2 = inlined_call_operand.vmem [shape: f32[1,64], index: 2, kind: input, shape index: {}]   ;;  %s8705_s3 = inlined_call_operand.vmem [shape: bf16[64,128], index: 3, kind: input, shape index: {}]   ;;  %s8706_s4 = inlined_call_operand.vmem [shape: f32[1,128], index: 4, kind: input, shape index: {}]   ;;  %s8707_s5 = inlined_call_operand.vmem [shape: bf16[128,1024], index: 5, kind: input, shape index: {}]   ;;  %s8708_s6 = inlined_call_operand.vmem [shape: f32[1,1024], index: 6, kind: input, shape index: {}]   ;;  %s8709_s7 = inlined_call_operand.vmem [shape: bf16[1024,512], index: 7, kind: input, shape index: {}]   ;;  %s8710_s8 = inlined_call_operand.vmem [shape: f32[1,512], index: 8, kind: input, shape index: {}]   ;;  %s8711_s9 = inlined_call_operand.vmem [shape: bf16[512,256], index: 9, kind: input, shape index: {}]   ;;  %s8712_s10 = inlined_call_operand.vmem [shape: f32[1,256], index: 10, kind: input, shape index: {}]   ;;  %s8713_s11 = inlined_call_operand.vmem [shape: bf16[256,128], index: 11, kind: input, shape index: {}]   ;;  %s8714_s12 = inlined_call_operand.vmem [shape: f32[1,128], index: 12, kind: input, shape index: {}]   ;;  %s8715_s13 = inlined_call_operand.vmem [shape: bf16[128,64], index: 13, kind: input, shape index: {}]   ;;  %s8716_s14 = inlined_call_operand.vmem [shape: f32[1,64], index: 14, kind: input, shape index: {}]   ;;  %s8717_s15 = inlined_call_operand.vmem [shape: bf16[64,128], index: 15, kind: input, shape index: {}]   ;;  %s8718_s16 = inlined_call_operand.vmem [shape: f32[1,128], index: 16, kind: input, shape index: {}]   ;;  %s8719_s17 = inlined_call_operand.hbm [shape: f32[2,128], index: 17, kind: output, shape index: {}]  }
   0x1   :  { %8721 = sst [smem:[#allocation6_spill]] %s8702_s0 }
   0x2   :  { %8722 = sst [smem:[#allocation7_spill]] %s8703_s1 }
   0x3   :  { %s8723_s26 = sld [smem:[#allocation7_spill]]  ;;  %vm90_vm0 = vcmask 1041408   ;;  %vm83_vm1 = vcmask 31744  }
   0x4   :  { %s8724_s29 = sld [smem:[#allocation6_spill]] }
   0x9   :  { %v68_v0 = vld [vmem:[%s8723_s26] sm:$0x3] }
   0xa   :  { %v92_v1 = vsel %vm90_vm0, %v68_v0, 0  ;;  %v5464_v2 = vld [vmem:[%s8724_s29] sm:$0xff] }
   0xb   :  { %101 = vmatpush.bf16.msra.mxu0 %v92_v1 }
   0xc   :  { %22 = vsyncpa [#allocation4], 0  ;;  %v5465_v3 = vld [vmem:[%s8724_s29 + $0x8] sm:$0xff]  ;;  %v5469_v4 = vld [vmem:[%s8705_s3 + $0x18] sm:$0xff]  ;;  %vm155_vm2 = vcmask 523264   ;;  %vm377_vm3 = vcmask 1041409  }
   0xd   :  { %166 = vmatpush.bf16.msra.mxu1 %v5469_v4  ;;  %v5468_v5 = vld [vmem:[%s8705_s3 + $0x10] sm:$0xff]  ;;  %v5467_v6 = vld [vmem:[%s8705_s3 + $0x8] sm:$0xff]  ;;  %v5466_v7 = vld [vmem:[%s8705_s3] sm:$0xff]  ;;  %vm379_vm4 = vcmask 1043459   ;;  %vm381_vm5 = vcmask 1045509   ;;  %vm383_vm6 = vcmask 1047559  }
   0xe   :  { %3795 = vmatmul.msk.bf16.vlgmr.msra.gmra.mxu0 %vm83_vm1, %v5464_v2  ;;  %v3873_v8 = vld [vmem:[%s8707_s5 + $0x1c0] sm:$0xf]  ;;  %v5484_v10 = vld [vmem:[%s8707_s5 + $0x1c4] sm:$0xf]  ;;  %v3937_v14 = vld [vmem:[%s8707_s5 + $0x1c8] sm:$0xf] }
   0xf   :  { %v5485_v9 = vld [vmem:[%s8707_s5 + $0x1dc] sm:$0xf0]  ;;  %v3875_v13 = vld [vmem:[%s8707_s5 + $0x1e0] sm:$0xf0]  ;;  %v5501_v15 = vld [vmem:[%s8707_s5 + $0x1e4] sm:$0xf0] }
  0x10   :  { %v3874_v12 = vor.u32 %v5485_v9, %v3873_v8  ;;  %v3878_v16 = vor.u32 %v5484_v10, %v3875_v13  ;;  %v3938_v17 = vor.u32 %v5501_v15, %v3937_v14  ;;  %v5500_v18 = vld [vmem:[%s8707_s5 + $0x1cc] sm:$0xf]  ;;  %v3865_v20 = vld [vmem:[%s8707_s5 + $0x180] sm:$0xf]  ;;  %v5482_v23 = vld [vmem:[%s8707_s5 + $0x184] sm:$0xf] }
  0x11   :  { %167 = vmatpush.bf16.msra.mxu1 %v5468_v5  ;;  %v3939_v19 = vld [vmem:[%s8707_s5 + $0x1e8] sm:$0xf0]  ;;  %v5483_v22 = vld [vmem:[%s8707_s5 + $0x19c] sm:$0xf0]  ;;  %v3867_v24 = vld [vmem:[%s8707_s5 + $0x1a0] sm:$0xf0] }
  0x12   :  { %289 = vmatpush.bf16.msra.mxu2 %v3874_v12  ;;  %v3942_v21 = vor.u32 %v5500_v18, %v3939_v19  ;;  %v5884_v25 = vld [vmem:[%s8704_s2] ss:$0 sm:$0xff]  ;;  %308 = vmatpush.bf16.msra.mxu3 %v3878_v16  ;;  %v3866_v26 = vor.u32 %v5483_v22, %v3865_v20  ;;  %v3870_v27 = vor.u32 %v5482_v23, %v3867_v24  ;;  %v3929_v28 = vld [vmem:[%s8707_s5 + $0x188] sm:$0xf]  ;;  %v5498_v31 = vld [vmem:[%s8707_s5 + $0x18c] sm:$0xf] }
  0x13   :  { %490 = vmatpush.bf16.msrb.mxu0 %v3938_v17  ;;  %v5499_v29 = vld [vmem:[%s8707_s5 + $0x1a4] sm:$0xf0]  ;;  %v3931_v32 = vld [vmem:[%s8707_s5 + $0x1a8] sm:$0xf0]  ;;  %v3857_v33 = vld [vmem:[%s8707_s5 + $0x140] sm:$0xf] }
  0x14   :  { %v3930_v30 = vor.u32 %v5499_v29, %v3929_v28  ;;  %v3934_v34 = vor.u32 %v5498_v31, %v3931_v32  ;;  %v5481_v35 = vld [vmem:[%s8707_s5 + $0x15c] sm:$0xf0]  ;;  %v5480_v36 = vld [vmem:[%s8707_s5 + $0x144] sm:$0xf]  ;;  %v3921_v39 = vld [vmem:[%s8707_s5 + $0x148] sm:$0xf] }
  0x15   :  { %168 = vmatpush.bf16.msra.mxu1 %v5467_v6  ;;  %v3859_v37 = vld [vmem:[%s8707_s5 + $0x160] sm:$0xf0]  ;;  %v3858_v38 = vor.u32 %v5481_v35, %v3857_v33  ;;  %v5497_v40 = vld [vmem:[%s8707_s5 + $0x164] sm:$0xf0]  ;;  %v5496_v41 = vld [vmem:[%s8707_s5 + $0x14c] sm:$0xf] }
  0x16   :  { %290 = vmatpush.bf16.msra.mxu2 %v3866_v26  ;;  %309 = vmatpush.bf16.msra.mxu3 %v3870_v27  ;;  %v3862_v43 = vor.u32 %v5480_v36, %v3859_v37  ;;  %v3922_v44 = vor.u32 %v5497_v40, %v3921_v39  ;;  %v3923_v45 = vld [vmem:[%s8707_s5 + $0x168] sm:$0xf0]  ;;  %v3849_v46 = vld [vmem:[%s8707_s5 + $0x100] sm:$0xf]  ;;  %v5478_v50 = vld [vmem:[%s8707_s5 + $0x104] sm:$0xf] }
  0x17   :  { %491 = vmatpush.bf16.msrb.mxu0 %v3930_v30  ;;  %v5479_v47 = vld [vmem:[%s8707_s5 + $0x11c] sm:$0xf0]  ;;  %v3926_v49 = vor.u32 %v5496_v41, %v3923_v45  ;;  %v3851_v51 = vld [vmem:[%s8707_s5 + $0x120] sm:$0xf0]  ;;  %v3913_v52 = vld [vmem:[%s8707_s5 + $0x108] sm:$0xf] }
  0x18   :  { %v5495_v54 = vld [vmem:[%s8707_s5 + $0x124] sm:$0xf0]  ;;  %v5494_v55 = vld [vmem:[%s8707_s5 + $0x10c] sm:$0xf]  ;;  %v3850_v57 = vor.u32 %v5479_v47, %v3849_v46  ;;  %v3854_v60 = vor.u32 %v5478_v50, %v3851_v51  ;;  %v5477_v8 = vld [vmem:[%s8707_s5 + $0xdc] sm:$0xf0] }
  0x19   :  { %169 = vmatpush.bf16.msra.mxu1 %v5466_v7  ;;  %v3915_v56 = vld [vmem:[%s8707_s5 + $0x128] sm:$0xf0]  ;;  %v3914_v61 = vor.u32 %v5495_v54, %v3913_v52  ;;  %v3841_v7 = vld [vmem:[%s8707_s5 + $0xc0] sm:$0xf]  ;;  %v5476_v9 = vld [vmem:[%s8707_s5 + $0xc4] sm:$0xf] }
  0x1a   :  { %291 = vmatpush.bf16.msra.mxu2 %v3858_v38  ;;  %310 = vmatpush.bf16.msra.mxu3 %v3862_v43  ;;  %v3918_v62 = vor.u32 %v5494_v55, %v3915_v56  ;;  %v3842_v10 = vor.u32 %v5477_v8, %v3841_v7  ;;  %v3905_v12 = vld [vmem:[%s8707_s5 + $0xc8] sm:$0xf]  ;;  %v5492_v16 = vld [vmem:[%s8707_s5 + $0xcc] sm:$0xf]  ;;  %v3833_v19 = vld [vmem:[%s8707_s5 + $0x80] sm:$0xf] }
  0x1b   :  { %492 = vmatpush.bf16.msrb.mxu0 %v3922_v44  ;;  %v5493_v13 = vld [vmem:[%s8707_s5 + $0xe4] sm:$0xf0]  ;;  %v3907_v17 = vld [vmem:[%s8707_s5 + $0xe8] sm:$0xf0]  ;;  %v5475_v20 = vld [vmem:[%s8707_s5 + $0x9c] sm:$0xf0] }
  0x1c   :  { %v3906_v15 = vor.u32 %v5493_v13, %v3905_v12  ;;  %v3910_v18 = vor.u32 %v5492_v16, %v3907_v17  ;;  %v3834_v22 = vor.u32 %v5475_v20, %v3833_v19  ;;  %v3835_v23 = vld [vmem:[%s8707_s5 + $0xa0] sm:$0xf0]  ;;  %v3897_v24 = vld [vmem:[%s8707_s5 + $0x88] sm:$0xf]  ;;  %v5490_v28 = vld [vmem:[%s8707_s5 + $0x8c] sm:$0xf] }
  0x1d   :  { %509 = vmatpush.bf16.msrb.mxu1 %v3942_v21  ;;  %v5474_v21 = vld [vmem:[%s8707_s5 + $0x84] sm:$0xf]  ;;  %v3899_v29 = vld [vmem:[%s8707_s5 + $0xa8] sm:$0xf0]  ;;  %v3825_v31 = vld [vmem:[%s8707_s5 + $0x40] sm:$0xf] }
  0x1e   :  { %3796 = vmatmul.msk.bf16.gmra.mxu0 %vm83_vm1, %v5465_v3  ;;  %292 = vmatpush.bf16.msra.mxu2 %v3850_v57  ;;  %v3838_v26 = vor.u32 %v5474_v21, %v3835_v23  ;;  %v3902_v30 = vor.u32 %v5490_v28, %v3899_v29  ;;  %v5473_v32 = vld [vmem:[%s8707_s5 + $0x5c] sm:$0xf0]  ;;  %v5472_v33 = vld [vmem:[%s8707_s5 + $0x44] sm:$0xf]  ;;  %v3889_v36 = vld [vmem:[%s8707_s5 + $0x48] sm:$0xf] }
  0x1f   :  { %311 = vmatpush.bf16.msra.mxu3 %v3854_v60  ;;  %493 = vmatpush.bf16.msrb.mxu0 %v3914_v61  ;;  %v3827_v35 = vld [vmem:[%s8707_s5 + $0x60] sm:$0xf0]  ;;  %v5489_v37 = vld [vmem:[%s8707_s5 + $0x64] sm:$0xf0]  ;;  %v5488_v40 = vld [vmem:[%s8707_s5 + $0x4c] sm:$0xf] }
  0x20   :  { %v3830_v38 = vor.u32 %v5472_v33, %v3827_v35  ;;  %v3890_v39 = vor.u32 %v5489_v37, %v3889_v36  ;;  %v3891_v41 = vld [vmem:[%s8707_s5 + $0x68] sm:$0xf0]  ;;  %v3817_v43 = vld [vmem:[%s8707_s5] sm:$0xf]  ;;  %v5470_v45 = vld [vmem:[%s8707_s5 + $0x4] sm:$0xf] }
  0x21   :  { %510 = vmatpush.bf16.msrb.mxu1 %v3934_v34  ;;  %v3826_v34 = vor.u32 %v5473_v32, %v3825_v31  ;;  %v5471_v44 = vld [vmem:[%s8707_s5 + $0x1c] sm:$0xf0]  ;;  %v3819_v47 = vld [vmem:[%s8707_s5 + $0x20] sm:$0xf0]  ;;  %v5486_v52 = vld [vmem:[%s8707_s5 + $0xc] sm:$0xf] }
  0x22   :  { %293 = vmatpush.bf16.msra.mxu2 %v3842_v10  ;;  %v3818_v46 = vor.u32 %v5471_v44, %v3817_v43  ;;  %v3822_v50 = vor.u32 %v5470_v45, %v3819_v47  ;;  %v4001_v55 = vld [vmem:[%s8707_s5 + $0x1d0] sm:$0xf]  ;;  %v5516_v57 = vld [vmem:[%s8707_s5 + $0x1d4] sm:$0xf]  ;;  %v4065_v60 = vld [vmem:[%s8707_s5 + $0x1d8] sm:$0xf] }
  0x23   :  { %494 = vmatpush.bf16.msrb.mxu0 %v3906_v15  ;;  %v5517_v56 = vld [vmem:[%s8707_s5 + $0x1ec] sm:$0xf0]  ;;  %v5533_v61 = vld [vmem:[%s8707_s5 + $0x1f4] sm:$0xf0]  ;;  %v3995_v7 = vld [vmem:[%s8707_s5 + $0x1b0] sm:$0xf0] }
  0x24   :  { %v4057_v8 = vld [vmem:[%s8707_s5 + $0x198] sm:$0xf]  ;;  %v5530_v12 = vld [vmem:[%s8707_s5 + $0x19c] sm:$0xf]  ;;  %v3985_v15 = vld [vmem:[%s8707_s5 + $0x150] sm:$0xf] }
  0x25   :  { %511 = vmatpush.bf16.msrb.mxu1 %v3926_v49  ;;  %v5487_v49 = vld [vmem:[%s8707_s5 + $0x24] sm:$0xf0]  ;;  %v4059_v13 = vld [vmem:[%s8707_s5 + $0x1b8] sm:$0xf0]  ;;  %v5513_v16 = vld [vmem:[%s8707_s5 + $0x16c] sm:$0xf0] }
  0x26   :  { %294 = vmatpush.bf16.msra.mxu2 %v3834_v22  ;;  %v5512_v17 = vld [vmem:[%s8707_s5 + $0x154] sm:$0xf]  ;;  %v4049_v20 = vld [vmem:[%s8707_s5 + $0x158] sm:$0xf]  ;;  %v5511_v28 = vld [vmem:[%s8707_s5 + $0x12c] sm:$0xf0] }
  0x27   :  { %v3987_v19 = vld [vmem:[%s8707_s5 + $0x170] sm:$0xf0]  ;;  %v5529_v21 = vld [vmem:[%s8707_s5 + $0x174] sm:$0xf0]  ;;  %v5526_v36 = vld [vmem:[%s8707_s5 + $0x11c] sm:$0xf] }
  0x28   :  { %v3990_v22 = vor.u32 %v5512_v17, %v3987_v19  ;;  %v4050_v23 = vor.u32 %v5529_v21, %v4049_v20  ;;  %v5510_v29 = vld [vmem:[%s8707_s5 + $0x114] sm:$0xf]  ;;  %v4041_v32 = vld [vmem:[%s8707_s5 + $0x118] sm:$0xf]  ;;  %v4043_v37 = vld [vmem:[%s8707_s5 + $0x138] sm:$0xf0] }
  0x29   :  { %512 = vmatpush.bf16.msrb.mxu1 %v3918_v62  ;;  %v3979_v31 = vld [vmem:[%s8707_s5 + $0x130] sm:$0xf0]  ;;  %v5527_v33 = vld [vmem:[%s8707_s5 + $0x134] sm:$0xf0]  ;;  %s5917_s25 = smov [#allocation3]   ;;  %s3778_s2 = sshll.u32 %s8719_s17, 4  ;;  %s3779_s2 = int_to_ptr.hbm [resolvable:$true] %s3778_s2 }
  0x2a   :  { %295 = vmatpush.bf16.msra.mxu2 %v3826_v34  ;;  %v3982_v34 = vor.u32 %v5510_v29, %v3979_v31  ;;  %v4042_v35 = vor.u32 %v5527_v33, %v4041_v32  ;;  %v3971_v43 = vld [vmem:[%s8707_s5 + $0xf0] sm:$0xf0]  ;;  %v4033_v44 = vld [vmem:[%s8707_s5 + $0xd8] sm:$0xf] }
  0x2b   :  { %v5525_v45 = vld [vmem:[%s8707_s5 + $0xf4] sm:$0xf0]  ;;  %v3947_v17 = vld [vmem:[%s8707_s5 + $0x30] sm:$0xf0] }
  0x2c   :  { %v5519_v20 = vld [vmem:[%s8707_s5 + $0x34] sm:$0xf0] }
  0x2d   :  { %513 = vmatpush.bf16.msrb.mxu1 %v3910_v18  ;;  %v3986_v18 = vor.u32 %v5513_v16, %v3985_v15  ;;  %v5502_v16 = vld [vmem:[%s8707_s5 + $0x14] sm:$0xf] }
  0x2e   :  { %296 = vmatpush.bf16.msra.mxu2 %v3818_v46 }
  0x31   :  { %514 = vmatpush.bf16.msrb.mxu1 %v3902_v30 }
  0x8b   :  { %v103_v11 = vpop.f32.mrf.mxu0 }
  0x8c   :  { %v104_v42 = vadd.f32 %v5884_v25, %v103_v11  ;;  %v3843_v11 = vld [vmem:[%s8707_s5 + $0xe0] sm:$0xf0] }
  0x8d   :  { %v3846_v14 = vor.u32 %v5476_v9, %v3843_v11  ;;  %v5531_v9 = vld [vmem:[%s8707_s5 + $0x1b4] sm:$0xf0] }
  0x8e   :  { %v113_v58 = vmax.f32 %v104_v42, 0.0  ;;  %v3894_v42 = vor.u32 %v5488_v40, %v3891_v41  ;;  %v4058_v11 = vor.u32 %v5531_v9, %v4057_v8  ;;  %v5509_v40 = vld [vmem:[%s8707_s5 + $0xec] sm:$0xf0]  ;;  %v5508_v41 = vld [vmem:[%s8707_s5 + $0xd4] sm:$0xf] }
  0x8f   :  { %312 = vmatpush.bf16.msra.mxu3 %v3846_v14  ;;  %v4062_v14 = vor.u32 %v5530_v12, %v4059_v13  ;;  %v3974_v47 = vor.u32 %v5508_v41, %v3971_v43  ;;  %v5520_v8 = vld [vmem:[%s8707_s5 + $0x5c] sm:$0xf]  ;;  %v3945_v12 = vld [vmem:[%s8707_s5 + $0x10] sm:$0xf]  ;;  %v4441_v43 = vld [vmem:[%s8709_s7 + $0x2e0] sm:$0xf] }
  0x90   :  { %515 = vmatpush.bf16.msrb.mxu1 %v3894_v42  ;;  %v5503_v13 = vld [vmem:[%s8707_s5 + $0x2c] sm:$0xf0] }
  0x93   :  { %v105_v48 = vpop.f32.mrf.mxu0  ;;  %313 = vmatpush.bf16.msra.mxu3 %v3838_v26 }
  0x94   :  { %v106_v53 = vadd.f32 %v5884_v25, %v105_v48  ;;  %v3881_v48 = vld [vmem:[%s8707_s5 + $0x8] sm:$0xf] }
  0x95   :  { %v3882_v51 = vor.u32 %v5487_v49, %v3881_v48  ;;  %v4034_v48 = vor.u32 %v5525_v45, %v4033_v44  ;;  %v5524_v49 = vld [vmem:[%s8707_s5 + $0xdc] sm:$0xf]  ;;  %v5628_v44 = vld [vmem:[%s8709_s7 + $0x2ec] sm:$0xf0] }
  0x96   :  { %v114_v59 = vmax.f32 %v106_v53, 0.0  ;;  %v3883_v53 = vld [vmem:[%s8707_s5 + $0x28] sm:$0xf0] }
  0x97   :  { %314 = vmatpush.bf16.msra.mxu3 %v3830_v38  ;;  %v3886_v54 = vor.u32 %v5486_v52, %v3883_v53  ;;  %v4046_v38 = vor.u32 %v5526_v36, %v4043_v37  ;;  %v5507_v53 = vld [vmem:[%s8707_s5 + $0xac] sm:$0xf0] }
  0x98   :  { %v117_v63 = vpack.c.bf16 %v114_v59, %v113_v58  ;;  %v4002_v58 = vor.u32 %v5517_v56, %v4001_v55  ;;  %v4003_v59 = vld [vmem:[%s8707_s5 + $0x1f0] sm:$0xf0] }
  0x99   :  { %516 = vmatpush.bf16.msrb.mxu1 %v3886_v54  ;;  %v4006_v62 = vor.u32 %v5516_v57, %v4003_v59  ;;  %v5506_v54 = vld [vmem:[%s8707_s5 + $0x94] sm:$0xf]  ;;  %v5523_v59 = vld [vmem:[%s8707_s5 + $0xb4] sm:$0xf0] }
  0x9a   :  { %3813 = vmatmul.msk.bf16.vlgmr.msra.gmra.mxu1 %vm155_vm2, %v117_v63  ;;  %v4066_v63 = vor.u32 %v5533_v61, %v4065_v60  ;;  %685 = vmatpush.bf16.msrb.mxu2 %v4002_v58  ;;  %v3963_v55 = vld [vmem:[%s8707_s5 + $0xb0] sm:$0xf0]  ;;  %v4025_v58 = vld [vmem:[%s8707_s5 + $0x98] sm:$0xf]  ;;  %v5522_v60 = vld [vmem:[%s8707_s5 + $0x9c] sm:$0xf] }
  0x9b   :  { %v108_v0 = vpop.f32.mrf.mxu0  ;;  %315 = vmatpush.bf16.msra.mxu3 %v3822_v50  ;;  %v4035_v50 = vld [vmem:[%s8707_s5 + $0xf8] sm:$0xf0]  ;;  %v3966_v57 = vor.u32 %v5506_v54, %v3963_v55  ;;  %v5885_v61 = vld [vmem:[%s8706_s4] ss:$0 sm:$0xff]  ;;  %v5592_v54 = vld [vmem:[%s8709_s7 + $0x1cc] sm:$0xf0] }
  0x9c   :  { %v109_v1 = vadd.f32 %v5884_v25, %v108_v0  ;;  %v5532_v0 = vld [vmem:[%s8707_s5 + $0x1dc] sm:$0xf]  ;;  %v4038_v52 = vor.u32 %v5524_v49, %v4035_v50  ;;  %v4169_v50 = vld [vmem:[%s8709_s7 + $0xc0] sm:$0xf] }
  0x9d   :  { %v4425_v55 = vld [vmem:[%s8709_s7 + $0x2c0] sm:$0xf] }
  0x9e   :  { %v115_v4 = vmax.f32 %v109_v1, 0.0  ;;  %v4067_v1 = vld [vmem:[%s8707_s5 + $0x1f8] sm:$0xf0] }
  0x9f   :  { %704 = vmatpush.bf16.msrb.mxu3 %v4006_v62  ;;  %v4026_v62 = vor.u32 %v5523_v59, %v4025_v58  ;;  %v4553_v59 = vld [vmem:[%s8709_s7 + $0x3c0] sm:$0xf] }
  0xa3   :  { %v110_v2 = vpop.f32.mrf.mxu0 }
  0xa4   :  { %v111_v3 = vadd.f32 %v5884_v25, %v110_v2  ;;  %v5491_v25 = vld [vmem:[%s8707_s5 + $0xa4] sm:$0xf0]  ;;  %v4070_v2 = vor.u32 %v5532_v0, %v4067_v1  ;;  %v3953_v0 = vld [vmem:[%s8707_s5 + $0x50] sm:$0xf] }
  0xa5   :  { %v3898_v27 = vor.u32 %v5491_v25, %v3897_v24  ;;  %v5528_v24 = vld [vmem:[%s8707_s5 + $0x15c] sm:$0xf] }
  0xa6   :  { %v116_v5 = vmax.f32 %v111_v3, 0.0  ;;  %v3993_v3 = vld [vmem:[%s8707_s5 + $0x190] sm:$0xf]  ;;  %899 = vmatpush.bf16.msra.mxu1 %v4070_v2  ;;  %v4051_v25 = vld [vmem:[%s8707_s5 + $0x178] sm:$0xf0] }
  0xa7   :  { %495 = vmatpush.bf16.msrb.mxu0 %v3898_v27  ;;  %v4054_v26 = vor.u32 %v5528_v24, %v4051_v25  ;;  %v3977_v27 = vld [vmem:[%s8707_s5 + $0x110] sm:$0xf]  ;;  %v5518_v25 = vld [vmem:[%s8707_s5 + $0x1c] sm:$0xf] }
  0xa8   :  { %v118_v6 = vpack.c.bf16 %v116_v5, %v115_v4  ;;  %v5515_v4 = vld [vmem:[%s8707_s5 + $0x1ac] sm:$0xf0]  ;;  %v5514_v5 = vld [vmem:[%s8707_s5 + $0x194] sm:$0xf]  ;;  %v3978_v30 = vor.u32 %v5511_v28, %v3977_v27 }
  0xa9   :  { %v3998_v10 = vor.u32 %v5514_v5, %v3995_v7  ;;  %v5505_v2 = vld [vmem:[%s8707_s5 + $0x6c] sm:$0xf0]  ;;  %v5521_v7 = vld [vmem:[%s8707_s5 + $0x74] sm:$0xf0] }
  0xaa   :  { %3814 = vmatmul.msk.bf16.gmra.mxu1 %vm155_vm2, %v118_v6  ;;  %v3994_v6 = vor.u32 %v5515_v4, %v3993_v3  ;;  %v5504_v3 = vld [vmem:[%s8707_s5 + $0x54] sm:$0xf]  ;;  %v3954_v5 = vor.u32 %v5505_v2, %v3953_v0  ;;  %v4281_v0 = vld [vmem:[%s8709_s7 + $0x1a0] sm:$0xf]  ;;  %v5588_v2 = vld [vmem:[%s8709_s7 + $0x1ac] sm:$0xf0] }
  0xab   :  { %496 = vmatpush.bf16.msrb.mxu0 %v3890_v39  ;;  %705 = vmatpush.bf16.msrb.mxu3 %v3998_v10  ;;  %v3969_v39 = vld [vmem:[%s8707_s5 + $0xd0] sm:$0xf]  ;;  %v3955_v4 = vld [vmem:[%s8707_s5 + $0x70] sm:$0xf0] }
  0xac   :  { %686 = vmatpush.bf16.msrb.mxu2 %v3994_v6  ;;  %900 = vmatpush.bf16.msra.mxu1 %v4062_v14  ;;  %v3970_v42 = vor.u32 %v5509_v40, %v3969_v39  ;;  %v4017_v6 = vld [vmem:[%s8707_s5 + $0x58] sm:$0xf]  ;;  %v3958_v9 = vor.u32 %v5504_v3, %v3955_v4  ;;  %v5564_v39 = vld [vmem:[%s8709_s7 + $0xec] sm:$0xf0]  ;;  %v4313_v40 = vld [vmem:[%s8709_s7 + $0x1e0] sm:$0xf] }
  0xad   :  { %v4018_v10 = vor.u32 %v5521_v7, %v4017_v6  ;;  %v4409_v3 = vld [vmem:[%s8709_s7 + $0x2a0] sm:$0xf]  ;;  %v5620_v4 = vld [vmem:[%s8709_s7 + $0x2ac] sm:$0xf0] }
  0xae   :  { %v4410_v6 = vor.u32 %v5620_v4, %v4409_v3  ;;  %v4537_v7 = vld [vmem:[%s8709_s7 + $0x3a0] sm:$0xf] }
  0xaf   :  { %497 = vmatpush.bf16.msrb.mxu0 %v3882_v51  ;;  %706 = vmatpush.bf16.msrb.mxu3 %v3990_v22  ;;  %v3961_v51 = vld [vmem:[%s8707_s5 + $0x90] sm:$0xf]  ;;  %v3946_v22 = vor.u32 %v5503_v13, %v3945_v12 }
  0xb0   :  { %687 = vmatpush.bf16.msrb.mxu2 %v3986_v18  ;;  %901 = vmatpush.bf16.msra.mxu1 %v4054_v26  ;;  %v3962_v56 = vor.u32 %v5507_v53, %v3961_v51  ;;  %v4009_v18 = vld [vmem:[%s8707_s5 + $0x18] sm:$0xf]  ;;  %v4011_v26 = vld [vmem:[%s8707_s5 + $0x38] sm:$0xf0]  ;;  %v5560_v51 = vld [vmem:[%s8709_s7 + $0xcc] sm:$0xf0] }
  0xb1   :  { %v4010_v24 = vor.u32 %v5519_v20, %v4009_v18  ;;  %v4170_v53 = vor.u32 %v5560_v51, %v4169_v50  ;;  %v5584_v18 = vld [vmem:[%s8709_s7 + $0x18c] sm:$0xf0]  ;;  %v4105_v50 = vld [vmem:[%s8709_s7 + $0x40] sm:$0xf] }
  0xb2   :  { %v5616_v20 = vld [vmem:[%s8709_s7 + $0x28c] sm:$0xf0] }
  0xb3   :  { %880 = vmatpush.bf16.msra.mxu0 %v4066_v63  ;;  %707 = vmatpush.bf16.msrb.mxu3 %v3982_v34  ;;  %v4027_v63 = vld [vmem:[%s8707_s5 + $0xb8] sm:$0xf0]  ;;  %v5544_v51 = vld [vmem:[%s8709_s7 + $0x4c] sm:$0xf0] }
  0xb4   :  { %688 = vmatpush.bf16.msrb.mxu2 %v3978_v30  ;;  %902 = vmatpush.bf16.msra.mxu1 %v4046_v38  ;;  %v4030_v1 = vor.u32 %v5522_v60, %v4027_v63  ;;  %v4014_v30 = vor.u32 %v5518_v25, %v4011_v26  ;;  %v4185_v38 = vld [vmem:[%s8709_s7 + $0xe0] sm:$0xf]  ;;  %v5656_v60 = vld [vmem:[%s8709_s7 + $0x3cc] sm:$0xf0] }
  0xb5   :  { %v4186_v41 = vor.u32 %v5564_v39, %v4185_v38  ;;  %v5556_v63 = vld [vmem:[%s8709_s7 + $0xac] sm:$0xf0]  ;;  %v4377_v38 = vld [vmem:[%s8709_s7 + $0x260] sm:$0xf] }
  0xb6   :  { %v5648_v25 = vld [vmem:[%s8709_s7 + $0x38c] sm:$0xf0] }
  0xb7   :  { %881 = vmatpush.bf16.msra.mxu0 %v4058_v11  ;;  %708 = vmatpush.bf16.msrb.mxu3 %v3974_v47  ;;  %v4019_v11 = vld [vmem:[%s8707_s5 + $0x78] sm:$0xf0]  ;;  %v4569_v47 = vld [vmem:[%s8709_s7 + $0x3e0] sm:$0xf]  ;;  %v5612_v39 = vld [vmem:[%s8709_s7 + $0x26c] sm:$0xf0] }
  0xb8   :  { %689 = vmatpush.bf16.msrb.mxu2 %v3970_v42  ;;  %903 = vmatpush.bf16.msra.mxu1 %v4038_v52  ;;  %v4022_v15 = vor.u32 %v5520_v8, %v4019_v11  ;;  %v5596_v42 = vld [vmem:[%s8709_s7 + $0x1ec] sm:$0xf0]  ;;  %v4297_v52 = vld [vmem:[%s8709_s7 + $0x1c0] sm:$0xf] }
  0xb9   :  { %v4314_v45 = vor.u32 %v5596_v42, %v4313_v40  ;;  %v5652_v8 = vld [vmem:[%s8709_s7 + $0x3ac] sm:$0xf0]  ;;  %v4505_v40 = vld [vmem:[%s8709_s7 + $0x360] sm:$0xf]  ;;  %v794_v42 = vld [vmem:[%s8708_s6 + $0x6] sm:$0x3] }
  0xba   :  { %v4538_v11 = vor.u32 %v5652_v8, %v4537_v7  ;;  %v6588_v4 = vperm.slane %v794_v42, 1  ;;  %v5640_v7 = vld [vmem:[%s8709_s7 + $0x34c] sm:$0xf0] }
  0xbb   :  { %882 = vmatpush.bf16.msra.mxu0 %v4050_v23  ;;  %709 = vmatpush.bf16.msrb.mxu3 %v3966_v57  ;;  %v3950_v23 = vor.u32 %v5502_v16, %v3947_v17  ;;  %v4298_v57 = vor.u32 %v5592_v54, %v4297_v52  ;;  %v4265_v16 = vld [vmem:[%s8709_s7 + $0x180] sm:$0xf] }
  0xbc   :  { %690 = vmatpush.bf16.msrb.mxu2 %v3962_v56  ;;  %904 = vmatpush.bf16.msra.mxu1 %v4030_v1  ;;  %v5624_v56 = vld [vmem:[%s8709_s7 + $0x2cc] sm:$0xf0]  ;;  %v4233_v54 = vld [vmem:[%s8709_s7 + $0x140] sm:$0xf] }
  0xbd   :  { %v4426_v58 = vor.u32 %v5624_v56, %v4425_v55  ;;  %v5576_v55 = vld [vmem:[%s8709_s7 + $0x14c] sm:$0xf0] }
  0xbf   :  { %883 = vmatpush.bf16.msra.mxu0 %v4042_v35  ;;  %710 = vmatpush.bf16.msrb.mxu3 %v3958_v9  ;;  %v404_v9 = vld [vmem:[%s8708_s6 + $0x2] sm:$0x3] }
  0xc0   :  { %691 = vmatpush.bf16.msrb.mxu2 %v3954_v5  ;;  %905 = vmatpush.bf16.msra.mxu1 %v4022_v15  ;;  %v4282_v5 = vor.u32 %v5588_v2, %v4281_v0  ;;  %v5552_v15 = vld [vmem:[%s8709_s7 + $0x8c] sm:$0xf0]  ;;  %v6526_v26 = vperm.slane %v404_v9, 1  ;;  %v4234_v0 = vor.u32 %v5576_v55, %v4233_v54 }
  0xc1   :  { %v5536_v54 = vld [vmem:[%s8709_s7 + $0xc] sm:$0xf0] }
  0xc3   :  { %884 = vmatpush.bf16.msra.mxu0 %v4034_v48  ;;  %711 = vmatpush.bf16.msrb.mxu3 %v3950_v23  ;;  %v5660_v48 = vld [vmem:[%s8709_s7 + $0x3ec] sm:$0xf0] }
  0xc4   :  { %692 = vmatpush.bf16.msrb.mxu2 %v3946_v22  ;;  %906 = vmatpush.bf16.msra.mxu1 %v4014_v30  ;;  %v4570_v49 = vor.u32 %v5660_v48, %v4569_v47  ;;  %v4266_v22 = vor.u32 %v5584_v18, %v4265_v16  ;;  %v5548_v30 = vld [vmem:[%s8709_s7 + $0x6c] sm:$0xf0]  ;;  %v4217_v16 = vld [vmem:[%s8709_s7 + $0x120] sm:$0xf] }
  0xc7   :  { %885 = vmatpush.bf16.msra.mxu0 %v4026_v62  ;;  %v4153_v62 = vld [vmem:[%s8709_s7 + $0xa0] sm:$0xf] }
  0xc8   :  { %v4154_v1 = vor.u32 %v5556_v63, %v4153_v62 }
  0xcb   :  { %886 = vmatpush.bf16.msra.mxu0 %v4018_v10  ;;  %v203_v10 = vld [vmem:[%s8708_s6] sm:$0x3] }
  0xcf   :  { %887 = vmatpush.bf16.msra.mxu0 %v4010_v24  ;;  %v4521_v24 = vld [vmem:[%s8709_s7 + $0x380] sm:$0xf] }
 0x117   :  { %v171_v46 = vpop.f32.mrf.mxu1 }
 0x118   :  { %v172_v14 = vadd.f32 %v5885_v61, %v171_v46  ;;  %v4442_v46 = vor.u32 %v5628_v44, %v4441_v43  ;;  %v4378_v43 = vor.u32 %v5612_v39, %v4377_v38  ;;  %v5644_v44 = vld [vmem:[%s8709_s7 + $0x36c] sm:$0xf0] }
 0x11a   :  { %v181_v27 = vmax.f32 %v172_v14, 0.0  ;;  %v4137_v14 = vld [vmem:[%s8709_s7 + $0x80] sm:$0xf] }
 0x11b   :  { %v4138_v17 = vor.u32 %v5552_v15, %v4137_v14  ;;  %v4089_v14 = vld [vmem:[%s8709_s7 + $0x20] sm:$0xf]  ;;  %v5540_v15 = vld [vmem:[%s8709_s7 + $0x2c] sm:$0xf0] }
 0x11f   :  { %v173_v19 = vpop.f32.mrf.mxu1 }
 0x120   :  { %v174_v21 = vadd.f32 %v5885_v61, %v173_v19  ;;  %v4393_v19 = vld [vmem:[%s8709_s7 + $0x280] sm:$0xf] }
 0x121   :  { %v4394_v23 = vor.u32 %v5616_v20, %v4393_v19  ;;  %v4090_v19 = vor.u32 %v5540_v15, %v4089_v14  ;;  %v5572_v20 = vld [vmem:[%s8709_s7 + $0x12c] sm:$0xf0] }
 0x122   :  { %v182_v28 = vmax.f32 %v174_v21, 0.0  ;;  %v6518_v21 = vperm.slane %v404_v9, 0 }
 0x124   :  { %v185_v29 = vpack.c.bf16 %v182_v28, %v181_v27  ;;  %v4522_v27 = vor.u32 %v5648_v25, %v4521_v24  ;;  %v6528_v28 = vperm.slane %v203_v10, 0 }
 0x126   :  { %297 = vmatmul.bf16.vlgmr.msra.gmra.mxu2 %v185_v29  ;;  %316 = vmatmul.bf16.vlgmr.msra.gmra.mxu3 %v185_v29 }
 0x127   :  { %498 = vmatmul.bf16.vlgmr.msrb.gmra.mxu0 %v185_v29  ;;  %517 = vmatmul.bf16.vlgmr.msrb.gmra.mxu1 %v185_v29  ;;  %v176_v31 = vpop.f32.mrf.mxu1 }
 0x128   :  { %v177_v32 = vadd.f32 %v5885_v61, %v176_v31  ;;  %2553 = vmatpush.bf16.msra.mxu2 %v4186_v41  ;;  %2566 = vmatpush.bf16.msra.mxu3 %v4314_v45 }
 0x129   :  { %2579 = vmatpush.bf16.msrb.mxu0 %v4442_v46  ;;  %2592 = vmatpush.bf16.msrb.mxu1 %v4570_v49  ;;  %v6562_v46 = vperm.slane %v203_v10, 1  ;;  %v4506_v49 = vor.u32 %v5644_v44, %v4505_v40 }
 0x12a   :  { %v183_v35 = vmax.f32 %v177_v32, 0.0 }
 0x12c   :  { %2554 = vmatpush.bf16.msra.mxu2 %v4170_v53  ;;  %2567 = vmatpush.bf16.msra.mxu3 %v4298_v57  ;;  %v5916_v57 = vmov -inf  }
 0x12d   :  { %2580 = vmatpush.bf16.msrb.mxu0 %v4426_v58  ;;  %62 = vst [vmem:[#allocation2] sm:$0xff] %v5916_v57  ;;  %v6578_v58 = vperm.slane %v794_v42, 0 }
 0x12e   :  { %63 = vst [vmem:[#allocation2 + $0x8] sm:$0xff] %v5916_v57 }
 0x12f   :  { %v178_v33 = vpop.f32.mrf.mxu1 }
 0x130   :  { %v179_v34 = vadd.f32 %v5885_v61, %v178_v33  ;;  %v4554_v61 = vor.u32 %v5656_v60, %v4553_v59  ;;  %2555 = vmatpush.bf16.msra.mxu2 %v4154_v1  ;;  %2568 = vmatpush.bf16.msra.mxu3 %v4282_v5  ;;  %v4106_v59 = vor.u32 %v5544_v51, %v4105_v50  ;;  %v4361_v60 = vld [vmem:[%s8709_s7 + $0x240] sm:$0xf]  ;;  %v5608_v1 = vld [vmem:[%s8709_s7 + $0x24c] sm:$0xf0] }
 0x131   :  { %2581 = vmatpush.bf16.msrb.mxu0 %v4410_v6  ;;  %v4362_v5 = vor.u32 %v5608_v1, %v4361_v60  ;;  %v4489_v6 = vld [vmem:[%s8709_s7 + $0x340] sm:$0xf] }
 0x132   :  { %v184_v36 = vmax.f32 %v179_v34, 0.0  ;;  %2593 = vmatpush.bf16.msrb.mxu1 %v4554_v61  ;;  %v4249_v34 = vld [vmem:[%s8709_s7 + $0x160] sm:$0xf] }
 0x134   :  { %v186_v37 = vpack.c.bf16 %v184_v36, %v183_v35  ;;  %2556 = vmatpush.bf16.msra.mxu2 %v4138_v17  ;;  %2569 = vmatpush.bf16.msra.mxu3 %v4266_v22  ;;  %v5580_v35 = vld [vmem:[%s8709_s7 + $0x16c] sm:$0xf0]  ;;  %v4345_v22 = vld [vmem:[%s8709_s7 + $0x220] sm:$0xf] }
 0x135   :  { %2582 = vmatpush.bf16.msrb.mxu0 %v4394_v23  ;;  %v5604_v23 = vld [vmem:[%s8709_s7 + $0x22c] sm:$0xf0] }
 0x136   :  { %302 = vmatmul.bf16.gmra.mxu2 %v186_v37  ;;  %321 = vmatmul.bf16.gmra.mxu3 %v186_v37 }
 0x137   :  { %503 = vmatmul.bf16.gmra.mxu0 %v186_v37  ;;  %522 = vmatmul.bf16.gmra.mxu1 %v186_v37 }
 0x138   :  { %2594 = vmatpush.bf16.msrb.mxu1 %v4538_v11 }
 0x139   :  { %2583 = vmatpush.bf16.msrb.mxu0 %v4378_v43 }
 0x13c   :  { %2595 = vmatpush.bf16.msrb.mxu1 %v4522_v27  ;;  %v4218_v27 = vor.u32 %v5572_v20, %v4217_v16 }
 0x13d   :  { %2584 = vmatpush.bf16.msrb.mxu0 %v4362_v5  ;;  %v5600_v5 = vld [vmem:[%s8709_s7 + $0x20c] sm:$0xf0] }
 0x140   :  { %2596 = vmatpush.bf16.msrb.mxu1 %v4506_v49 }
 0x146   :  { %693 = vmatmul.bf16.vlgmr.msrb.gmra.mxu2 %v185_v29  ;;  %712 = vmatmul.bf16.vlgmr.msrb.gmra.mxu3 %v185_v29 }
 0x147   :  { %888 = vmatmul.bf16.vlgmr.msra.gmra.mxu0 %v185_v29  ;;  %907 = vmatmul.bf16.vlgmr.msra.gmra.mxu1 %v185_v29  ;;  %v4121_v29 = vld [vmem:[%s8709_s7 + $0x60] sm:$0xf] }
 0x148   :  { %v4122_v33 = vor.u32 %v5548_v30, %v4121_v29  ;;  %v4346_v29 = vor.u32 %v5604_v23, %v4345_v22  ;;  %v4473_v30 = vld [vmem:[%s8709_s7 + $0x320] sm:$0xf] }
 0x14a   :  { %2557 = vmatpush.bf16.msra.mxu2 %v4122_v33  ;;  %2585 = vmatpush.bf16.msrb.mxu0 %v4346_v29 }
 0x14e   :  { %2558 = vmatpush.bf16.msra.mxu2 %v4106_v59 }
 0x152   :  { %2559 = vmatpush.bf16.msra.mxu2 %v4090_v19  ;;  %v5692_v19 = vld [vmem:[%s8709_s7 + $0x4ec] sm:$0xf0] }
 0x156   :  { %698 = vmatmul.bf16.gmra.mxu2 %v186_v37  ;;  %717 = vmatmul.bf16.gmra.mxu3 %v186_v37 }
 0x157   :  { %893 = vmatmul.bf16.gmra.mxu0 %v186_v37  ;;  %912 = vmatmul.bf16.gmra.mxu1 %v186_v37  ;;  %v4250_v37 = vor.u32 %v5580_v35, %v4249_v34 }
 0x159   :  { %2570 = vmatpush.bf16.msra.mxu3 %v4250_v37 }
 0x15d   :  { %2571 = vmatpush.bf16.msra.mxu3 %v4234_v0 }
 0x161   :  { %2572 = vmatpush.bf16.msra.mxu3 %v4218_v27  ;;  %v4953_v27 = vld [vmem:[%s8709_s7 + $0x6e0] sm:$0xf] }
 0x1a4   :  { %v499_v12 = vpop.f32.mrf.mxu0  ;;  %v518_v13 = vpop.f32.mrf.mxu1 }
 0x1a5   :  { %v500_v36 = vadd.f32 %v499_v12, %v6518_v21  ;;  %v519_v41 = vadd.f32 %v518_v13, %v6526_v26  ;;  %v599_v12 = vld [vmem:[%s8708_s6 + $0x4] sm:$0x3]  ;;  %v4490_v13 = vor.u32 %v5640_v7, %v4489_v6  ;;  %v4457_v6 = vld [vmem:[%s8709_s7 + $0x300] sm:$0xf] }
 0x1a6   :  { %v6631_v44 = vperm.slane %v599_v12, 0 }
 0x1a7   :  { %v528_v56 = vmax.f32 %v500_v36, 0.0  ;;  %v529_v61 = vmax.f32 %v519_v41, 0.0  ;;  %2597 = vmatpush.bf16.msrb.mxu1 %v4490_v13 }
 0x1a9   :  { %v298_v31 = vpop.f32.mrf.mxu2  ;;  %v317_v32 = vpop.f32.mrf.mxu3 }
 0x1aa   :  { %v6560_v45 = vadd.f32 %v298_v31, %v6528_v28  ;;  %v318_v3 = vadd.f32 %v317_v32, %v6562_v46  ;;  %v5636_v31 = vld [vmem:[%s8709_s7 + $0x32c] sm:$0xf0] }
 0x1ab   :  { %v4474_v37 = vor.u32 %v5636_v31, %v4473_v30 }
 0x1ac   :  { %v501_v47 = vpop.f32.mrf.mxu0  ;;  %v520_v48 = vpop.f32.mrf.mxu1  ;;  %v327_v2 = vmax.f32 %v6560_v45, 0.0  ;;  %v328_v32 = vmax.f32 %v318_v3, 0.0  ;;  %v6633_v45 = vperm.slane %v599_v12, 1  ;;  %v4697_v12 = vld [vmem:[%s8709_s7 + $0x4e0] sm:$0xf] }
 0x1ad   :  { %v502_v52 = vadd.f32 %v501_v47, %v6518_v21  ;;  %v521_v53 = vadd.f32 %v520_v48, %v6526_v26  ;;  %2598 = vmatpush.bf16.msrb.mxu1 %v4474_v37  ;;  %v4698_v31 = vor.u32 %v5692_v19, %v4697_v12 }
 0x1af   :  { %v530_v62 = vmax.f32 %v502_v52, 0.0  ;;  %v531_v63 = vmax.f32 %v521_v53, 0.0  ;;  %v4073_v53 = vld [vmem:[%s8709_s7] sm:$0xf] }
 0x1b0   :  { %v4074_v60 = vor.u32 %v5536_v54, %v4073_v53 }
 0x1b1   :  { %v536_v8 = vmax.f32 %v528_v56, %v530_v62  ;;  %v543_v9 = vmax.f32 %v529_v61, %v531_v63  ;;  %v300_v10 = vpop.f32.mrf.mxu2  ;;  %v319_v11 = vpop.f32.mrf.mxu3  ;;  %v4201_v61 = vld [vmem:[%s8709_s7 + $0x100] sm:$0xf]  ;;  %v5568_v62 = vld [vmem:[%s8709_s7 + $0x10c] sm:$0xf0] }
 0x1b2   :  { %v301_v17 = vadd.f32 %v300_v10, %v6528_v28  ;;  %v320_v18 = vadd.f32 %v319_v11, %v6562_v46  ;;  %v4329_v63 = vld [vmem:[%s8709_s7 + $0x200] sm:$0xf]  ;;  %2560 = vmatpush.bf16.msra.mxu2 %v4074_v60  ;;  %v5632_v11 = vld [vmem:[%s8709_s7 + $0x30c] sm:$0xf0] }
 0x1b3   :  { %v537_v24 = vrot.slane %v536_v8, 4  ;;  %v544_v25 = vrot.slane %v543_v9, 4  ;;  %v4330_v10 = vor.u32 %v5600_v5, %v4329_v63  ;;  %v4937_v60 = vld [vmem:[%s8709_s7 + $0x6c0] sm:$0xf] }
 0x1b4   :  { %v329_v33 = vmax.f32 %v301_v17, 0.0  ;;  %v330_v34 = vmax.f32 %v320_v18, 0.0  ;;  %v504_v35 = vpop.f32.mrf.mxu0  ;;  %v523_v36 = vpop.f32.mrf.mxu1  ;;  %v4665_v63 = vld [vmem:[%s8709_s7 + $0x4a0] sm:$0xf] }
 0x1b5   :  { %v538_v38 = vmax.f32 %v536_v8, %v537_v24  ;;  %v545_v39 = vmax.f32 %v543_v9, %v544_v25  ;;  %v6626_v40 = vadd.f32 %v504_v35, %v6518_v21  ;;  %v6629_v41 = vadd.f32 %v523_v36, %v6526_v26  ;;  %v4825_v24 = vld [vmem:[%s8709_s7 + $0x5e0] sm:$0xf]  ;;  %v5724_v25 = vld [vmem:[%s8709_s7 + $0x5ec] sm:$0xf0]  ;;  %2586 = vmatpush.bf16.msrb.mxu0 %v4330_v10 }
 0x1b6   :  { %v335_v42 = vmax.f32 %v327_v2, %v329_v33  ;;  %v342_v43 = vmax.f32 %v328_v32, %v330_v34  ;;  %v4202_v9 = vor.u32 %v5568_v62, %v4201_v61  ;;  %v5081_v32 = vld [vmem:[%s8709_s7 + $0x7e0] sm:$0xf]  ;;  %v5788_v33 = vld [vmem:[%s8709_s7 + $0x7ec] sm:$0xf0]  ;;  %v4826_v37 = vor.u32 %v5724_v25, %v4825_v24  ;;  %2605 = vmatpush.bf16.msrb.mxu2 %v4698_v31 }
 0x1b7   :  { %v539_v47 = vrot.slane %v538_v38, 2  ;;  %v546_v48 = vrot.slane %v545_v39, 2  ;;  %v532_v49 = vmax.f32 %v6626_v40, 0.0  ;;  %v533_v50 = vmax.f32 %v6629_v41, 0.0  ;;  %v5752_v40 = vld [vmem:[%s8709_s7 + $0x6cc] sm:$0xf0] }
 0x1b8   :  { %v336_v51 = vrot.slane %v335_v42, 4  ;;  %v343_v52 = vrot.slane %v342_v43, 4  ;;  %2573 = vmatpush.bf16.msra.mxu3 %v4202_v9  ;;  %v5065_v61 = vld [vmem:[%s8709_s7 + $0x7c0] sm:$0xf]  ;;  %v5784_v62 = vld [vmem:[%s8709_s7 + $0x7cc] sm:$0xf0] }
 0x1b9   :  { %v6643_v55 = vmax.f32 %v538_v38, %v539_v47  ;;  %v547_v56 = vmax.f32 %v545_v39, %v546_v48  ;;  %v303_v57 = vpop.f32.mrf.mxu2  ;;  %v322_v59 = vpop.f32.mrf.mxu3  ;;  %v4681_v38 = vld [vmem:[%s8709_s7 + $0x4c0] sm:$0xf]  ;;  %v5082_v47 = vor.u32 %v5788_v33, %v5081_v32  ;;  %v5688_v48 = vld [vmem:[%s8709_s7 + $0x4cc] sm:$0xf0] }
 0x1ba   :  { %v337_v0 = vmax.f32 %v335_v42, %v336_v51  ;;  %v344_v1 = vmax.f32 %v342_v43, %v343_v52  ;;  %v6655_v2 = vadd.f32 %v303_v57, %v6528_v28  ;;  %v6658_v3 = vadd.f32 %v322_v59, %v6562_v46  ;;  %v4809_v51 = vld [vmem:[%s8709_s7 + $0x5c0] sm:$0xf]  ;;  %v5720_v59 = vld [vmem:[%s8709_s7 + $0x5cc] sm:$0xf0] }
 0x1bb   :  { %v541_v7 = vrot.slane %v6643_v55, 1  ;;  %v548_v8 = vrot.slane %v547_v56, 1  ;;  %v4682_v57 = vor.u32 %v5688_v48, %v4681_v38  ;;  %v4810_v5 = vor.u32 %v5720_v59, %v4809_v51  ;;  %v5748_v24 = vld [vmem:[%s8709_s7 + $0x6ac] sm:$0xf0]  ;;  %v5049_v25 = vld [vmem:[%s8709_s7 + $0x7a0] sm:$0xf] }
 0x1bc   :  { %v338_v13 = vrot.slane %v337_v0, 2  ;;  %v345_v14 = vrot.slane %v344_v1, 2  ;;  %v331_v15 = vmax.f32 %v6655_v2, 0.0  ;;  %v332_v16 = vmax.f32 %v6658_v3, 0.0  ;;  %v506_v17 = vpop.f32.mrf.mxu0  ;;  %v525_v18 = vpop.f32.mrf.mxu1  ;;  %2618 = vmatpush.bf16.msrb.mxu3 %v4826_v37  ;;  %v5780_v31 = vld [vmem:[%s8709_s7 + $0x7ac] sm:$0xf0] }
 0x1bd   :  { %v6678_v20 = vmax.f32 %v547_v56, %v548_v8  ;;  %v507_v22 = vadd.f32 %v506_v17, %v6518_v21  ;;  %v526_v23 = vadd.f32 %v525_v18, %v6526_v26  ;;  %v4458_v21 = vor.u32 %v5632_v11, %v4457_v6  ;;  %v5756_v26 = vld [vmem:[%s8709_s7 + $0x6ec] sm:$0xf0]  ;;  %v4793_v6 = vld [vmem:[%s8709_s7 + $0x5a0] sm:$0xf]  ;;  %2606 = vmatpush.bf16.msrb.mxu2 %v4682_v57 }
 0x1be   :  { %v6691_v29 = vmax.f32 %v337_v0, %v338_v13  ;;  %v346_v30 = vmax.f32 %v344_v1, %v345_v14  ;;  %v4954_v43 = vor.u32 %v5756_v26, %v4953_v27  ;;  %v5066_v13 = vor.u32 %v5784_v62, %v5065_v61  ;;  %v5716_v14 = vld [vmem:[%s8709_s7 + $0x5ac] sm:$0xf0]  ;;  %v4649_v26 = vld [vmem:[%s8709_s7 + $0x480] sm:$0xf] }
 0x1bf   :  { %v569_v34 = vrot.slane %v6678_v20, 6  ;;  %v534_v35 = vmax.f32 %v507_v22, 0.0  ;;  %v535_v36 = vmax.f32 %v526_v23, 0.0  ;;  %2599 = vmatpush.bf16.msrb.mxu1 %v4458_v21  ;;  %v4921_v23 = vld [vmem:[%s8709_s7 + $0x6a0] sm:$0xf]  ;;  %v4794_v37 = vor.u32 %v5716_v14, %v4793_v6 }
 0x1c0   :  { %v340_v39 = vrot.slane %v6691_v29, 1  ;;  %v347_v42 = vrot.slane %v346_v30, 1  ;;  %2631 = vmatpush.bf16.msra.mxu0 %v4954_v43  ;;  %2619 = vmatpush.bf16.msrb.mxu3 %v4810_v5  ;;  %v5680_v32 = vld [vmem:[%s8709_s7 + $0x48c] sm:$0xf0]  ;;  %v4922_v38 = vor.u32 %v5748_v24, %v4921_v23  ;;  %v4905_v43 = vld [vmem:[%s8709_s7 + $0x680] sm:$0xf]  ;;  %v542_v57 = vmax.f32 %v6643_v55, %v541_v7 }
 0x1c1   :  { %v550_v52 = vmax.f32 %v532_v49, %v534_v35  ;;  %v557_v53 = vmax.f32 %v533_v50, %v535_v36  ;;  %v305_v54 = vpop.f32.mrf.mxu2  ;;  %v324_v56 = vpop.f32.mrf.mxu3  ;;  %v5017_v14 = vld [vmem:[%s8709_s7 + $0x760] sm:$0xf] }
 0x1c2   :  { %v6726_v49 = vmax.f32 %v346_v30, %v347_v42  ;;  %v306_v41 = vadd.f32 %v305_v54, %v6528_v28  ;;  %v325_v50 = vadd.f32 %v324_v56, %v6562_v46  ;;  %v4938_v28 = vor.u32 %v5752_v40, %v4937_v60  ;;  %v5684_v46 = vld [vmem:[%s8709_s7 + $0x4ac] sm:$0xf0]  ;;  %v5033_v40 = vld [vmem:[%s8709_s7 + $0x780] sm:$0xf] }
 0x1c3   :  { %v551_v0 = vrot.slane %v550_v52, 4  ;;  %v558_v1 = vrot.slane %v557_v53, 4  ;;  %2644 = vmatpush.bf16.msra.mxu1 %v5082_v47  ;;  %v4666_v21 = vor.u32 %v5684_v46, %v4665_v63  ;;  %v5712_v42 = vld [vmem:[%s8709_s7 + $0x58c] sm:$0xf0]  ;;  %v4650_v54 = vor.u32 %v5680_v32, %v4649_v26  ;;  %v4617_v24 = vld [vmem:[%s8709_s7 + $0x440] sm:$0xf] }
 0x1c4   :  { %v368_v8 = vrot.slane %v6726_v49, 6  ;;  %v333_v9 = vmax.f32 %v306_v41, 0.0  ;;  %v334_v10 = vmax.f32 %v325_v50, 0.0  ;;  %v889_v11 = vpop.f32.mrf.mxu0  ;;  %v908_v12 = vpop.f32.mrf.mxu1  ;;  %2632 = vmatpush.bf16.msra.mxu0 %v4938_v28  ;;  %v5744_v56 = vld [vmem:[%s8709_s7 + $0x68c] sm:$0xf0]  ;;  %2620 = vmatpush.bf16.msrb.mxu3 %v4794_v37  ;;  %v6825_v20 = vmax.f32 %v6691_v29, %v340_v39 }
 0x1c5   :  { %v552_v17 = vmax.f32 %v550_v52, %v551_v0  ;;  %v559_v18 = vmax.f32 %v557_v53, %v558_v1  ;;  %v6750_v19 = vadd.f32 %v889_v11, %v6578_v58  ;;  %v6753_v22 = vadd.f32 %v908_v12, %v6588_v4  ;;  %2607 = vmatpush.bf16.msrb.mxu2 %v4666_v21  ;;  %v5776_v41 = vld [vmem:[%s8709_s7 + $0x78c] sm:$0xf0]  ;;  %v4633_v50 = vld [vmem:[%s8709_s7 + $0x460] sm:$0xf] }
 0x1c6   :  { %v349_v27 = vmax.f32 %v331_v15, %v333_v9  ;;  %v356_v30 = vmax.f32 %v332_v16, %v334_v10  ;;  %v4777_v16 = vld [vmem:[%s8709_s7 + $0x580] sm:$0xf]  ;;  %v5050_v53 = vor.u32 %v5780_v31, %v5049_v25  ;;  %v4906_v7 = vor.u32 %v5744_v56, %v4905_v43  ;;  %v5676_v63 = vld [vmem:[%s8709_s7 + $0x46c] sm:$0xf0] }
 0x1c7   :  { %v553_v33 = vrot.slane %v552_v17, 2  ;;  %v560_v2 = vrot.slane %v559_v18, 2  ;;  %v918_v15 = vmax.f32 %v6750_v19, 0.0  ;;  %v919_v3 = vmax.f32 %v6753_v22, 0.0  ;;  %2645 = vmatpush.bf16.msra.mxu1 %v5066_v13  ;;  %v4761_v0 = vld [vmem:[%s8709_s7 + $0x560] sm:$0xf] }
 0x1c8   :  { %v350_v35 = vrot.slane %v349_v27, 4  ;;  %v357_v36 = vrot.slane %v356_v30, 4  ;;  %2633 = vmatpush.bf16.msra.mxu0 %v4922_v38  ;;  %v4778_v55 = vor.u32 %v5712_v42, %v4777_v16  ;;  %v571_v1 = vsel %vm90_vm0, %v542_v57, %v569_v34  ;;  %v5708_v9 = vld [vmem:[%s8709_s7 + $0x56c] sm:$0xf0]  ;;  %v4889_v10 = vld [vmem:[%s8709_s7 + $0x660] sm:$0xf] }
 0x1c9   :  { %v554_v47 = vmax.f32 %v552_v17, %v553_v33  ;;  %v561_v48 = vmax.f32 %v559_v18, %v560_v2  ;;  %v6788_v51 = vpop.f32.mrf.mxu2  ;;  %v6790_v52 = vpop.f32.mrf.mxu3  ;;  %2608 = vmatpush.bf16.msrb.mxu2 %v4650_v54  ;;  %v5740_v13 = vld [vmem:[%s8709_s7 + $0x66c] sm:$0xf0]  ;;  %v5034_v39 = vor.u32 %v5776_v41, %v5033_v40  ;;  %v4634_v23 = vor.u32 %v5676_v63, %v4633_v50  ;;  %v4745_v16 = vld [vmem:[%s8709_s7 + $0x540] sm:$0xf] }
 0x1ca   :  { %v351_v59 = vmax.f32 %v349_v27, %v350_v35  ;;  %v358_v60 = vmax.f32 %v356_v30, %v357_v36  ;;  %v5772_v17 = vld [vmem:[%s8709_s7 + $0x76c] sm:$0xf0]  ;;  %2621 = vmatpush.bf16.msrb.mxu3 %v4778_v55  ;;  %v4762_v31 = vor.u32 %v5708_v9, %v4761_v0  ;;  %v4890_v33 = vor.u32 %v5740_v13, %v4889_v10 }
 0x1cb   :  { %v555_v61 = vrot.slane %v554_v47, 1  ;;  %v562_v62 = vrot.slane %v561_v48, 1  ;;  %2646 = vmatpush.bf16.msra.mxu1 %v5050_v53  ;;  %v5672_v25 = vld [vmem:[%s8709_s7 + $0x44c] sm:$0xf0]  ;;  %v5018_v2 = vor.u32 %v5772_v17, %v5017_v14  ;;  %v714_v57 = vadd.f32 %v6790_v52, %v6633_v45 }
 0x1cc   :  { %v352_v5 = vrot.slane %v351_v59, 2  ;;  %v359_v28 = vrot.slane %v358_v60, 2  ;;  %v891_v46 = vpop.f32.mrf.mxu0  ;;  %v910_v6 = vpop.f32.mrf.mxu1  ;;  %2634 = vmatpush.bf16.msra.mxu0 %v4906_v7  ;;  %v5704_v35 = vld [vmem:[%s8709_s7 + $0x54c] sm:$0xf0]  ;;  %v695_v22 = vadd.f32 %v6788_v51, %v6631_v44  ;;  %v564_v7 = vld [vmem:[#allocation2 + $0x4] sm:$0xf]  ;;  %v370_v19 = vsel %vm90_vm0, %v6825_v20, %v368_v8 }
 0x1cd   :  { %v563_v34 = vmax.f32 %v561_v48, %v562_v62  ;;  %v892_v11 = vadd.f32 %v891_v46, %v6578_v58  ;;  %v911_v12 = vadd.f32 %v910_v6, %v6588_v4  ;;  %v556_v27 = vmax.f32 %v554_v47, %v555_v61  ;;  %2609 = vmatpush.bf16.msrb.mxu2 %v4634_v23  ;;  %v4873_v48 = vld [vmem:[%s8709_s7 + $0x640] sm:$0xf]  ;;  %v5736_v53 = vld [vmem:[%s8709_s7 + $0x64c] sm:$0xf0] }
 0x1ce   :  { %v353_v18 = vmax.f32 %v351_v59, %v352_v5  ;;  %v360_v29 = vmax.f32 %v358_v60, %v359_v28  ;;  %v4618_v47 = vor.u32 %v5672_v25, %v4617_v24  ;;  %2622 = vmatpush.bf16.msrb.mxu3 %v4762_v31  ;;  %v4746_v40 = vor.u32 %v5704_v35, %v4745_v16  ;;  %v5001_v8 = vld [vmem:[%s8709_s7 + $0x740] sm:$0xf]  ;;  %v5768_v20 = vld [vmem:[%s8709_s7 + $0x74c] sm:$0xf0] }
 0x1cf   :  { %v570_v30 = vrot.slane %v563_v34, 6  ;;  %v921_v21 = vmax.f32 %v911_v12, 0.0  ;;  %2647 = vmatpush.bf16.msra.mxu1 %v5034_v39  ;;  %v920_v37 = vmax.f32 %v892_v11, 0.0  ;;  %v4874_v52 = vor.u32 %v5736_v53, %v4873_v48  ;;  %v5732_v48 = vld [vmem:[%s8709_s7 + $0x62c] sm:$0xf0] }
 0x1d0   :  { %v354_v26 = vrot.slane %v353_v18, 1  ;;  %v361_v32 = vrot.slane %v360_v29, 1  ;;  %2635 = vmatpush.bf16.msra.mxu0 %v4890_v33  ;;  %v723_v34 = vmax.f32 %v695_v22, 0.0  ;;  %v4729_v33 = vld [vmem:[%s8709_s7 + $0x520] sm:$0xf] }
 0x1d1   :  { %v572_v36 = vsel %vm90_vm0, %v556_v27, %v570_v30  ;;  %v933_v38 = vmax.f32 %v919_v3, %v921_v21  ;;  %v696_v42 = vpop.f32.mrf.mxu2  ;;  %v715_v43 = vpop.f32.mrf.mxu3  ;;  %2610 = vmatpush.bf16.msrb.mxu2 %v4618_v47  ;;  %v926_v51 = vmax.f32 %v918_v15, %v920_v37  ;;  %v4857_v37 = vld [vmem:[%s8709_s7 + $0x620] sm:$0xf] }
 0x1d2   :  { %v575_v54 = vrot.slane %v572_v36, 7  ;;  %v362_v56 = vmax.f32 %v360_v29, %v361_v32  ;;  %v697_v59 = vadd.f32 %v696_v42, %v6631_v44  ;;  %v716_v60 = vadd.f32 %v715_v43, %v6633_v45  ;;  %2623 = vmatpush.bf16.msrb.mxu3 %v4746_v40  ;;  %v363_v29 = vld [vmem:[#allocation2] sm:$0xf]  ;;  %v5668_v32 = vld [vmem:[%s8709_s7 + $0x42c] sm:$0xf0] }
 0x1d3   :  { %v934_v3 = vrot.slane %v933_v38, 4  ;;  %v355_v50 = vmax.f32 %v353_v18, %v354_v26  ;;  %2648 = vmatpush.bf16.msra.mxu1 %v5018_v2  ;;  %v927_v13 = vrot.slane %v926_v51, 4  ;;  %v4601_v26 = vld [vmem:[%s8709_s7 + $0x420] sm:$0xf]  ;;  %v5700_v36 = vld [vmem:[%s8709_s7 + $0x52c] sm:$0xf0] }
 0x1d4   :  { %v576_v41 = vsel %vm377_vm3, %v575_v54, %v571_v1  ;;  %v369_v61 = vrot.slane %v362_v56, 6  ;;  %v894_v62 = vpop.f32.mrf.mxu0  ;;  %v913_v55 = vpop.f32.mrf.mxu1  ;;  %v725_v0 = vmax.f32 %v697_v59, 0.0  ;;  %v726_v5 = vmax.f32 %v716_v60, 0.0  ;;  %2636 = vmatpush.bf16.msra.mxu0 %v4874_v52  ;;  %v4985_v53 = vld [vmem:[%s8709_s7 + $0x720] sm:$0xf] }
 0x1d5   :  { %v577_v63 = vsel %vm379_vm4, %v575_v54, %v576_v41  ;;  %v724_v1 = vmax.f32 %v714_v57, 0.0  ;;  %v935_v6 = vmax.f32 %v933_v38, %v934_v3  ;;  %v895_v49 = vadd.f32 %v894_v62, %v6578_v58  ;;  %v5664_v41 = vld [vmem:[%s8709_s7 + $0x40c] sm:$0xf0] }
 0x1d6   :  { %v578_v28 = vsel %vm381_vm5, %v575_v54, %v577_v63  ;;  %v371_v46 = vsel %vm90_vm0, %v355_v50, %v369_v61  ;;  %v731_v14 = vmax.f32 %v723_v34, %v725_v0  ;;  %v914_v30 = vadd.f32 %v913_v55, %v6588_v4  ;;  %v4713_v63 = vld [vmem:[%s8709_s7 + $0x500] sm:$0xf] }
 0x1d7   :  { %v579_v9 = vsel %vm383_vm6, %v575_v54, %v578_v28  ;;  %v376_v10 = vrot.slane %v371_v46, 7  ;;  %v738_v11 = vmax.f32 %v724_v1, %v726_v5  ;;  %v936_v23 = vrot.slane %v935_v6, 2  ;;  %v5764_v54 = vld [vmem:[%s8709_s7 + $0x72c] sm:$0xf0]  ;;  %v4841_v1 = vld [vmem:[%s8709_s7 + $0x600] sm:$0xf] }
 0x1d8   :  { %v581_v15 = vmax.f32 %v564_v7, %v579_v9  ;;  %v928_v16 = vmax.f32 %v926_v51, %v927_v13  ;;  %v732_v35 = vrot.slane %v731_v14, 4  ;;  %v922_v57 = vmax.f32 %v895_v49, 0.0  ;;  %v5696_v51 = vld [vmem:[%s8709_s7 + $0x50c] sm:$0xf0] }
 0x1d9   :  { %v378_v12 = vsel %vm377_vm3, %v376_v10, %v370_v19  ;;  %v699_v17 = vpop.f32.mrf.mxu2  ;;  %v718_v18 = vpop.f32.mrf.mxu3  ;;  %v739_v25 = vrot.slane %v738_v11, 4  ;;  %v937_v38 = vmax.f32 %v935_v6, %v936_v23  ;;  %v5002_v59 = vor.u32 %v5768_v20, %v5001_v8  ;;  %v5728_v6 = vld [vmem:[%s8709_s7 + $0x60c] sm:$0xf0] }
 0x1da   :  { %582 = vst [vmem:[#allocation2 + $0x4] sm:$0xf] %v581_v15  ;;  %v380_v39 = vsel %vm379_vm4, %v376_v10, %v378_v12  ;;  %v700_v42 = vadd.f32 %v699_v17, %v6631_v44  ;;  %v4602_v22 = vor.u32 %v5668_v32, %v4601_v26  ;;  %v719_v3 = vadd.f32 %v718_v18, %v6633_v45  ;;  %v4969_v15 = vld [vmem:[%s8709_s7 + $0x700] sm:$0xf]  ;;  %v5562_v26 = vld [vmem:[%s8709_s7 + $0xe4] sm:$0xf] }
 0x1db   :  { %v382_v24 = vsel %vm381_vm5, %v376_v10, %v380_v39  ;;  %v740_v56 = vmax.f32 %v738_v11, %v739_v25  ;;  %v929_v50 = vrot.slane %v928_v16, 2  ;;  %v6922_v61 = vmax.f32 %v731_v14, %v732_v35  ;;  %2649 = vmatpush.bf16.msra.mxu1 %v5002_v59  ;;  %v5760_v11 = vld [vmem:[%s8709_s7 + $0x70c] sm:$0xf0]  ;;  %v5594_v35 = vld [vmem:[%s8709_s7 + $0x1e4] sm:$0xf] }
 0x1dc   :  { %v384_v27 = vsel %vm383_vm6, %v376_v10, %v382_v24  ;;  %v896_v21 = vpop.f32.mrf.mxu0  ;;  %v915_v31 = vpop.f32.mrf.mxu1  ;;  %2611 = vmatpush.bf16.msrb.mxu2 %v4602_v22  ;;  %v4730_v52 = vor.u32 %v5700_v36, %v4729_v33  ;;  %v4858_v7 = vor.u32 %v5732_v48, %v4857_v37  ;;  %v938_v0 = vrot.slane %v937_v38, 1 }
 0x1dd   :  { %v386_v2 = vmax.f32 %v363_v29, %v384_v27  ;;  %v897_v43 = vadd.f32 %v896_v21, %v6578_v58  ;;  %v916_v47 = vadd.f32 %v915_v31, %v6588_v4  ;;  %v4585_v58 = vld [vmem:[%s8709_s7 + $0x400] sm:$0xf]  ;;  %v923_v4 = vmax.f32 %v914_v30, 0.0 }
 0x1de   :  { %v727_v5 = vmax.f32 %v700_v42, 0.0  ;;  %v741_v9 = vrot.slane %v740_v56, 2  ;;  %2624 = vmatpush.bf16.msrb.mxu3 %v4730_v52  ;;  %2637 = vmatpush.bf16.msra.mxu0 %v4858_v7  ;;  %v4986_v19 = vor.u32 %v5764_v54, %v4985_v53  ;;  %v728_v12 = vmax.f32 %v719_v3, 0.0  ;;  %v4315_v42 = vld [vmem:[%s8709_s7 + $0x1f0] sm:$0xf0] }
 0x1df   :  { %387 = vst [vmem:[#allocation2] sm:$0xf] %v386_v2  ;;  %v924_v60 = vmax.f32 %v897_v43, 0.0  ;;  %v925_v40 = vmax.f32 %v916_v47, 0.0  ;;  %v4586_v17 = vor.u32 %v5664_v41, %v4585_v58  ;;  %v6944_v39 = vmax.f32 %v928_v16, %v929_v50  ;;  %v4187_v16 = vld [vmem:[%s8709_s7 + $0xf0] sm:$0xf0] }
 0x1e0   :  { %2650 = vmatpush.bf16.msra.mxu1 %v4986_v19  ;;  %v4970_v49 = vor.u32 %v5760_v11, %v4969_v15  ;;  %v6946_v27 = vmax.f32 %v937_v38, %v938_v0  ;;  %v734_v30 = vrot.slane %v6922_v61, 2  ;;  %v742_v32 = vmax.f32 %v740_v56, %v741_v9  ;;  %v5626_v43 = vld [vmem:[%s8709_s7 + $0x2e4] sm:$0xf]  ;;  %v4443_v53 = vld [vmem:[%s8709_s7 + $0x2f0] sm:$0xf0] }
 0x1e1   :  { %v701_v62 = vpop.f32.mrf.mxu2  ;;  %v720_v55 = vpop.f32.mrf.mxu3  ;;  %v940_v28 = vmax.f32 %v922_v57, %v924_v60  ;;  %v947_v46 = vmax.f32 %v923_v4, %v925_v40  ;;  %2612 = vmatpush.bf16.msrb.mxu2 %v4586_v17  ;;  %v931_v36 = vrot.slane %v6944_v39, 1  ;;  %v5658_v54 = vld [vmem:[%s8709_s7 + $0x3e4] sm:$0xf]  ;;  %v4571_v56 = vld [vmem:[%s8709_s7 + $0x3f0] sm:$0xf0]  ;;  %v4190_v40 = vor.u32 %v5562_v26, %v4187_v16 }
 0x1e2   :  { %v702_v10 = vadd.f32 %v701_v62, %v6631_v44  ;;  %v721_v34 = vadd.f32 %v720_v55, %v6633_v45  ;;  %v4714_v44 = vor.u32 %v5696_v51, %v4713_v63  ;;  %v4842_v45 = vor.u32 %v5728_v6, %v4841_v1  ;;  %v5558_v63 = vld [vmem:[%s8709_s7 + $0xc4] sm:$0xf]  ;;  %v4299_v0 = vld [vmem:[%s8709_s7 + $0x1d0] sm:$0xf0] }
 0x1e3   :  { %v941_v13 = vrot.slane %v940_v28, 4  ;;  %v948_v14 = vrot.slane %v947_v46, 4  ;;  %v959_v57 = vrot.slane %v6946_v27, 6  ;;  %v6976_v59 = vmax.f32 %v6922_v61, %v734_v30  ;;  %v4171_v61 = vld [vmem:[%s8709_s7 + $0xd0] sm:$0xf0] }
 0x1e4   :  { %v729_v18 = vmax.f32 %v702_v10, 0.0  ;;  %v730_v29 = vmax.f32 %v721_v34, 0.0  ;;  %2625 = vmatpush.bf16.msrb.mxu3 %v4714_v44  ;;  %2638 = vmatpush.bf16.msra.mxu0 %v4842_v45  ;;  %v743_v4 = vrot.slane %v742_v32, 1  ;;  %v4318_v55 = vor.u32 %v5594_v35, %v4315_v42  ;;  %v5590_v51 = vld [vmem:[%s8709_s7 + $0x1c4] sm:$0xf] }
 0x1e5   :  { %v942_v23 = vmax.f32 %v940_v28, %v941_v13  ;;  %v949_v24 = vmax.f32 %v947_v46, %v948_v14  ;;  %2651 = vmatpush.bf16.msra.mxu1 %v4970_v49  ;;  %v4446_v52 = vor.u32 %v5626_v43, %v4443_v53  ;;  %v4574_v7 = vor.u32 %v5658_v54, %v4571_v56  ;;  %v5622_v11 = vld [vmem:[%s8709_s7 + $0x2c4] sm:$0xf]  ;;  %v4283_v26 = vld [vmem:[%s8709_s7 + $0x1b0] sm:$0xf0] }
 0x1e6   :  { %v976_v25 = vld [vmem:[#allocation2] sm:$0xff]  ;;  %v745_v8 = vmax.f32 %v727_v5, %v729_v18  ;;  %v752_v20 = vmax.f32 %v728_v12, %v730_v29  ;;  %v4427_v12 = vld [vmem:[%s8709_s7 + $0x2d0] sm:$0xf0]  ;;  %v744_v13 = vmax.f32 %v742_v32, %v743_v4  ;;  %v5654_v18 = vld [vmem:[%s8709_s7 + $0x3c4] sm:$0xf]  ;;  %v932_v44 = vmax.f32 %v6944_v39, %v931_v36 }
 0x1e7   :  { %980 = vst [vmem:[#allocation1] ss:$4 sm:$0xff] %v976_v25  ;;  %v943_v21 = vrot.slane %v942_v23, 2  ;;  %v950_v31 = vrot.slane %v949_v24, 2  ;;  %v4555_v29 = vld [vmem:[%s8709_s7 + $0x3d0] sm:$0xf0] }
 0x1e8   :  { %v746_v33 = vrot.slane %v745_v8, 4  ;;  %v753_v2 = vrot.slane %v752_v20, 4  ;;  %v736_v45 = vrot.slane %v6976_v59, 1  ;;  %v4155_v39 = vld [vmem:[%s8709_s7 + $0xb0] sm:$0xf0]  ;;  %v961_v30 = vsel %vm90_vm0, %v932_v44, %v959_v57 }
 0x1e9   :  { %v944_v37 = vmax.f32 %v942_v23, %v943_v21  ;;  %v951_v38 = vmax.f32 %v949_v24, %v950_v31  ;;  %v5554_v24 = vld [vmem:[%s8709_s7 + $0xa4] sm:$0xf]  ;;  %v4430_v21 = vor.u32 %v5622_v11, %v4427_v12  ;;  %v4558_v31 = vor.u32 %v5654_v18, %v4555_v29  ;;  %v954_v43 = vld [vmem:[#allocation2 + $0xc] sm:$0xf] }
 0x1ea   :  { %v747_v47 = vmax.f32 %v745_v8, %v746_v33  ;;  %v754_v48 = vmax.f32 %v752_v20, %v753_v2  ;;  %v4174_v8 = vor.u32 %v5558_v63, %v4171_v61  ;;  %v4302_v20 = vor.u32 %v5590_v51, %v4299_v0  ;;  %v5586_v27 = vld [vmem:[%s8709_s7 + $0x1a4] sm:$0xf]  ;;  %v4411_v33 = vld [vmem:[%s8709_s7 + $0x2b0] sm:$0xf0]  ;;  %v759_v63 = vld [vmem:[#allocation2 + $0x8] sm:$0xf] }
 0x1eb   :  { %v945_v22 = vrot.slane %v944_v37, 1  ;;  %v952_v58 = vrot.slane %v951_v38, 1  ;;  %v5618_v32 = vld [vmem:[%s8709_s7 + $0x2a4] sm:$0xf]  ;;  %v764_v2 = vrot.slane %v744_v13, 6  ;;  %v737_v42 = vmax.f32 %v6976_v59, %v736_v45 }
 0x1ec   :  { %v748_v3 = vrot.slane %v747_v47, 2  ;;  %v755_v60 = vrot.slane %v754_v48, 2  ;;  %v4286_v56 = vor.u32 %v5586_v27, %v4283_v26  ;;  %v5550_v57 = vld [vmem:[%s8709_s7 + $0x84] sm:$0xf]  ;;  %v4251_v12 = vld [vmem:[%s8709_s7 + $0x170] sm:$0xf0] }
 0x1ed   :  { %v953_v41 = vmax.f32 %v951_v38, %v952_v58  ;;  %v946_v10 = vmax.f32 %v944_v37, %v945_v22  ;;  %v5650_v37 = vld [vmem:[%s8709_s7 + $0x3a4] sm:$0xf]  ;;  %v4539_v38 = vld [vmem:[%s8709_s7 + $0x3b0] sm:$0xf0] }
 0x1ee   :  { %v983_v50 = vld.sshfl [vmem:[#allocation1] sm:$0xff pattern:$0x73625140]  ;;  %v984_v62 = vld.sshfl [vmem:[#allocation1 + $0x8] sm:$0xff pattern:$0x73625140]  ;;  %v749_v5 = vmax.f32 %v747_v47, %v748_v3  ;;  %v756_v28 = vmax.f32 %v754_v48, %v755_v60  ;;  %v4158_v48 = vor.u32 %v5554_v24, %v4155_v39  ;;  %v4414_v3 = vor.u32 %v5618_v32, %v4411_v33 }
 0x1ef   :  { %v6990_v46 = vpack.c.bf16 %v983_v50, %v983_v50  ;;  %v6992_v1 = vpack.c.bf16 %v984_v62, %v984_v62  ;;  %v985_v6 = vld.sshfl [vmem:[#allocation1 + $0x10] sm:$0xff pattern:$0x73625140]  ;;  %v986_v9 = vld.sshfl [vmem:[#allocation1 + $0x18] sm:$0xff pattern:$0x73625140]  ;;  %v4542_v60 = vor.u32 %v5650_v37, %v4539_v38  ;;  %v766_v50 = vsel %vm90_vm0, %v737_v42, %v764_v2 }
 0x1f0   :  { %v960_v34 = vrot.slane %v953_v41, 6  ;;  %v6994_v19 = vpack.c.bf16 %v985_v6, %v985_v6  ;;  %v6996_v15 = vpack.c.bf16 %v986_v9, %v986_v9  ;;  %v750_v14 = vrot.slane %v749_v5, 1  ;;  %v4139_v22 = vld [vmem:[%s8709_s7 + $0x90] sm:$0xf0]  ;;  %v5582_v59 = vld [vmem:[%s8709_s7 + $0x184] sm:$0xf] }
 0x1f1   :  { %v757_v17 = vrot.slane %v756_v28, 1  ;;  %2561 = vmatmul.bf16.vlgmr.msra.gmra.mxu2 %v6990_v46  ;;  %2574 = vmatmul.bf16.vlgmr.msra.gmra.mxu3 %v6992_v1  ;;  %v5614_v41 = vld [vmem:[%s8709_s7 + $0x284] sm:$0xf]  ;;  %v4142_v0 = vor.u32 %v5550_v57, %v4139_v22  ;;  %v4123_v6 = vld [vmem:[%s8709_s7 + $0x70] sm:$0xf0] }
 0x1f2   :  { %v962_v23 = vsel %vm90_vm0, %v946_v10, %v960_v34  ;;  %2587 = vmatmul.bf16.vlgmr.msrb.gmra.mxu0 %v6994_v19  ;;  %2600 = vmatmul.bf16.vlgmr.msrb.gmra.mxu1 %v6996_v15  ;;  %v751_v35 = vmax.f32 %v749_v5, %v750_v14  ;;  %v5578_v11 = vld [vmem:[%s8709_s7 + $0x164] sm:$0xf]  ;;  %v4507_v29 = vld [vmem:[%s8709_s7 + $0x370] sm:$0xf0] }
 0x1f3   :  { %v965_v25 = vrot.slane %v962_v23, 7  ;;  %v758_v49 = vmax.f32 %v756_v28, %v757_v17  ;;  %2657 = vmatpush.bf16.msra.mxu2 %v4190_v40  ;;  %2670 = vmatpush.bf16.msra.mxu3 %v4318_v55  ;;  %v4267_v40 = vld [vmem:[%s8709_s7 + $0x190] sm:$0xf0]  ;;  %v5546_v28 = vld [vmem:[%s8709_s7 + $0x64] sm:$0xf]  ;;  %v4254_v23 = vor.u32 %v5578_v11, %v4251_v12 }
 0x1f4   :  { %2683 = vmatpush.bf16.msrb.mxu0 %v4446_v52  ;;  %2696 = vmatpush.bf16.msrb.mxu1 %v4574_v7  ;;  %v4395_v55 = vld [vmem:[%s8709_s7 + $0x290] sm:$0xf0]  ;;  %v5646_v52 = vld [vmem:[%s8709_s7 + $0x384] sm:$0xf]  ;;  %v4270_v5 = vor.u32 %v5582_v59, %v4267_v40  ;;  %v4126_v45 = vor.u32 %v5546_v28, %v4123_v6 }
 0x1f5   :  { %v966_v16 = vsel %vm377_vm3, %v965_v25, %v961_v30  ;;  %v765_v36 = vrot.slane %v758_v49, 6  ;;  %v4523_v7 = vld [vmem:[%s8709_s7 + $0x390] sm:$0xf0]  ;;  %v4398_v10 = vor.u32 %v5614_v41, %v4395_v55  ;;  %v5610_v13 = vld [vmem:[%s8709_s7 + $0x264] sm:$0xf] }
 0x1f6   :  { %v967_v47 = vsel %vm379_vm4, %v965_v25, %v966_v16  ;;  %v4526_v34 = vor.u32 %v5646_v52, %v4523_v7  ;;  %v4379_v17 = vld [vmem:[%s8709_s7 + $0x270] sm:$0xf0]  ;;  %v5642_v18 = vld [vmem:[%s8709_s7 + $0x364] sm:$0xf] }
 0x1f7   :  { %v968_v53 = vsel %vm381_vm5, %v965_v25, %v967_v47  ;;  %v767_v54 = vsel %vm90_vm0, %v751_v35, %v765_v36  ;;  %2658 = vmatpush.bf16.msra.mxu2 %v4174_v8  ;;  %2671 = vmatpush.bf16.msra.mxu3 %v4302_v20  ;;  %v5542_v24 = vld [vmem:[%s8709_s7 + $0x44] sm:$0xf]  ;;  %v4382_v8 = vor.u32 %v5610_v13, %v4379_v17  ;;  %v4235_v39 = vld [vmem:[%s8709_s7 + $0x150] sm:$0xf0] }
 0x1f8   :  { %v969_v58 = vsel %vm383_vm6, %v965_v25, %v968_v53  ;;  %v770_v4 = vrot.slane %v767_v54, 7  ;;  %2684 = vmatpush.bf16.msrb.mxu0 %v4430_v21  ;;  %2697 = vmatpush.bf16.msrb.mxu1 %v4558_v31  ;;  %v4107_v25 = vld [vmem:[%s8709_s7 + $0x50] sm:$0xf0]  ;;  %v5574_v49 = vld [vmem:[%s8709_s7 + $0x144] sm:$0xf]  ;;  %v4510_v20 = vor.u32 %v5642_v18, %v4507_v29 }
 0x1f9   :  { %v971_v62 = vmax.f32 %v954_v43, %v969_v58  ;;  %v5606_v27 = vld [vmem:[%s8709_s7 + $0x244] sm:$0xf]  ;;  %v4363_v30 = vld [vmem:[%s8709_s7 + $0x250] sm:$0xf0]  ;;  %v4110_v26 = vor.u32 %v5542_v24, %v4107_v25  ;;  %v4238_v32 = vor.u32 %v5574_v49, %v4235_v39 }
 0x1fa   :  { %v771_v61 = vsel %vm377_vm3, %v770_v4, %v766_v50  ;;  %v5638_v21 = vld [vmem:[%s8709_s7 + $0x344] sm:$0xf]  ;;  %v4491_v31 = vld [vmem:[%s8709_s7 + $0x350] sm:$0xf0]  ;;  %v4366_v16 = vor.u32 %v5606_v27, %v4363_v30 }
 0x1fb   :  { %972 = vst [vmem:[#allocation2 + $0xc] sm:$0xf] %v971_v62  ;;  %v772_v51 = vsel %vm379_vm4, %v770_v4, %v771_v61  ;;  %2659 = vmatpush.bf16.msra.mxu2 %v4158_v48  ;;  %2672 = vmatpush.bf16.msra.mxu3 %v4286_v56  ;;  %v5538_v33 = vld [vmem:[%s8709_s7 + $0x24] sm:$0xf]  ;;  %v4091_v2 = vld [vmem:[%s8709_s7 + $0x30] sm:$0xf0]  ;;  %v4494_v35 = vor.u32 %v5638_v21, %v4491_v31 }
 0x1fc   :  { %v773_v9 = vsel %vm381_vm5, %v770_v4, %v772_v51  ;;  %2685 = vmatpush.bf16.msrb.mxu0 %v4414_v3  ;;  %2698 = vmatpush.bf16.msrb.mxu1 %v4542_v60  ;;  %v5570_v36 = vld [vmem:[%s8709_s7 + $0x124] sm:$0xf]  ;;  %v4219_v37 = vld [vmem:[%s8709_s7 + $0x130] sm:$0xf0]  ;;  %v4094_v53 = vor.u32 %v5538_v33, %v4091_v2 }
 0x1fd   :  { %v774_v14 = vsel %vm383_vm6, %v770_v4, %v773_v9  ;;  %v5602_v38 = vld [vmem:[%s8709_s7 + $0x224] sm:$0xf]  ;;  %v4347_v42 = vld [vmem:[%s8709_s7 + $0x230] sm:$0xf0]  ;;  %v4222_v54 = vor.u32 %v5570_v36, %v4219_v37 }
 0x1fe   :  { %v776_v44 = vmax.f32 %v759_v63, %v774_v14  ;;  %v5634_v43 = vld [vmem:[%s8709_s7 + $0x324] sm:$0xf]  ;;  %v4475_v47 = vld [vmem:[%s8709_s7 + $0x330] sm:$0xf0]  ;;  %v4350_v59 = vor.u32 %v5602_v38, %v4347_v42 }
 0x1ff   :  { %2660 = vmatpush.bf16.msra.mxu2 %v4142_v0  ;;  %2673 = vmatpush.bf16.msra.mxu3 %v4270_v5  ;;  %v5534_v48 = vld [vmem:[%s8709_s7 + $0x4] sm:$0xf]  ;;  %v4075_v56 = vld [vmem:[%s8709_s7 + $0x10] sm:$0xf0]  ;;  %v4478_v58 = vor.u32 %v5634_v43, %v4475_v47 }
 0x200   :  { %777 = vst [vmem:[#allocation2 + $0x8] sm:$0xf] %v776_v44  ;;  %2686 = vmatpush.bf16.msrb.mxu0 %v4398_v10  ;;  %2699 = vmatpush.bf16.msrb.mxu1 %v4526_v34  ;;  %v5566_v57 = vld [vmem:[%s8709_s7 + $0x104] sm:$0xf]  ;;  %v4203_v4 = vld [vmem:[%s8709_s7 + $0x110] sm:$0xf0]  ;;  %v4078_v50 = vor.u32 %v5534_v48, %v4075_v56 }
 0x201   :  { %v5598_v3 = vld [vmem:[%s8709_s7 + $0x204] sm:$0xf]  ;;  %v4331_v60 = vld [vmem:[%s8709_s7 + $0x210] sm:$0xf0]  ;;  %v4206_v62 = vor.u32 %v5566_v57, %v4203_v4 }
 0x202   :  { %v5630_v40 = vld [vmem:[%s8709_s7 + $0x304] sm:$0xf]  ;;  %v4459_v41 = vld [vmem:[%s8709_s7 + $0x310] sm:$0xf0]  ;;  %v4334_v55 = vor.u32 %v5598_v3, %v4331_v60 }
 0x203   :  { %2661 = vmatpush.bf16.msra.mxu2 %v4126_v45  ;;  %2674 = vmatpush.bf16.msra.mxu3 %v4254_v23  ;;  %v4462_v52 = vor.u32 %v5630_v40, %v4459_v41  ;;  %v5690_v7 = vld [vmem:[%s8709_s7 + $0x4e4] sm:$0xf]  ;;  %v4699_v63 = vld [vmem:[%s8709_s7 + $0x4f0] sm:$0xf0] }
 0x204   :  { %2687 = vmatpush.bf16.msrb.mxu0 %v4382_v8  ;;  %2700 = vmatpush.bf16.msrb.mxu1 %v4510_v20  ;;  %v5722_v61 = vld [vmem:[%s8709_s7 + $0x5e4] sm:$0xf]  ;;  %v4827_v51 = vld [vmem:[%s8709_s7 + $0x5f0] sm:$0xf0]  ;;  %v4702_v34 = vor.u32 %v5690_v7, %v4699_v63 }
 0x205   :  { %v5754_v0 = vld [vmem:[%s8709_s7 + $0x6e4] sm:$0xf]  ;;  %v4955_v5 = vld [vmem:[%s8709_s7 + $0x6f0] sm:$0xf0]  ;;  %v4830_v29 = vor.u32 %v5722_v61, %v4827_v51 }
 0x206   :  { %v5786_v28 = vld [vmem:[%s8709_s7 + $0x7e4] sm:$0xf]  ;;  %v5083_v6 = vld [vmem:[%s8709_s7 + $0x7f0] sm:$0xf0]  ;;  %v4958_v23 = vor.u32 %v5754_v0, %v4955_v5 }
 0x207   :  { %2662 = vmatpush.bf16.msra.mxu2 %v4110_v26  ;;  %2675 = vmatpush.bf16.msra.mxu3 %v4238_v32  ;;  %v977_v22 = vld [vmem:[#allocation2 + $0x8] sm:$0xff]  ;;  %v5686_v11 = vld [vmem:[%s8709_s7 + $0x4c4] sm:$0xf]  ;;  %v5086_v24 = vor.u32 %v5786_v28, %v5083_v6 }
 0x208   :  { %2688 = vmatpush.bf16.msrb.mxu0 %v4366_v16  ;;  %2701 = vmatpush.bf16.msrb.mxu1 %v4494_v35  ;;  %982 = vst [vmem:[#allocation1 + $0x20] ss:$4 sm:$0xff] %v977_v22  ;;  %v4683_v12 = vld [vmem:[%s8709_s7 + $0x4d0] sm:$0xf0]  ;;  %v5718_v25 = vld [vmem:[%s8709_s7 + $0x5c4] sm:$0xf] }
 0x209   :  { %v4811_v49 = vld [vmem:[%s8709_s7 + $0x5d0] sm:$0xf0]  ;;  %v5750_v8 = vld [vmem:[%s8709_s7 + $0x6c4] sm:$0xf]  ;;  %v4686_v30 = vor.u32 %v5686_v11, %v4683_v12 }
 0x20a   :  { %v4939_v20 = vld [vmem:[%s8709_s7 + $0x6d0] sm:$0xf0]  ;;  %v5782_v39 = vld [vmem:[%s8709_s7 + $0x7c4] sm:$0xf]  ;;  %v4814_v21 = vor.u32 %v5718_v25, %v4811_v49 }
 0x20b   :  { %2663 = vmatpush.bf16.msra.mxu2 %v4094_v53  ;;  %2676 = vmatpush.bf16.msra.mxu3 %v4222_v54  ;;  %v5067_v27 = vld [vmem:[%s8709_s7 + $0x7d0] sm:$0xf0]  ;;  %v5682_v31 = vld [vmem:[%s8709_s7 + $0x4a4] sm:$0xf]  ;;  %v4942_v32 = vor.u32 %v5750_v8, %v4939_v20 }
 0x20c   :  { %2689 = vmatpush.bf16.msrb.mxu0 %v4350_v59  ;;  %2702 = vmatpush.bf16.msrb.mxu1 %v4478_v58  ;;  %v4667_v26 = vld [vmem:[%s8709_s7 + $0x4b0] sm:$0xf0]  ;;  %v5070_v33 = vor.u32 %v5782_v39, %v5067_v27  ;;  %v5714_v2 = vld [vmem:[%s8709_s7 + $0x5a4] sm:$0xf] }
 0x20d   :  { %v4795_v16 = vld [vmem:[%s8709_s7 + $0x5b0] sm:$0xf0]  ;;  %v5746_v35 = vld [vmem:[%s8709_s7 + $0x6a4] sm:$0xf]  ;;  %v4670_v42 = vor.u32 %v5682_v31, %v4667_v26 }
 0x20e   :  { %v4923_v36 = vld [vmem:[%s8709_s7 + $0x6b0] sm:$0xf0]  ;;  %v5778_v37 = vld [vmem:[%s8709_s7 + $0x7a4] sm:$0xf]  ;;  %v4798_v43 = vor.u32 %v5714_v2, %v4795_v16 }
 0x20f   :  { %2664 = vmatpush.bf16.msra.mxu2 %v4078_v50  ;;  %2677 = vmatpush.bf16.msra.mxu3 %v4206_v62  ;;  %v987_v9 = vld.sshfl [vmem:[#allocation1 + $0x20] sm:$0xff pattern:$0x73625140]  ;;  %v988_v10 = vld.sshfl [vmem:[#allocation1 + $0x28] sm:$0xff pattern:$0x73625140]  ;;  %v4926_v53 = vor.u32 %v5746_v35, %v4923_v36 }
 0x210   :  { %2690 = vmatpush.bf16.msrb.mxu0 %v4334_v55  ;;  %2703 = vmatpush.bf16.msrb.mxu1 %v4462_v52  ;;  %v7203_v13 = vpack.c.bf16 %v987_v9, %v987_v9  ;;  %v7205_v14 = vpack.c.bf16 %v988_v10, %v988_v10  ;;  %v989_v17 = vld.sshfl [vmem:[#allocation1 + $0x30] sm:$0xff pattern:$0x73625140]  ;;  %v990_v18 = vld.sshfl [vmem:[#allocation1 + $0x38] sm:$0xff pattern:$0x73625140] }
 0x211   :  { %v7207_v44 = vpack.c.bf16 %v989_v17, %v989_v17  ;;  %v7209_v45 = vpack.c.bf16 %v990_v18, %v990_v18  ;;  %v5051_v38 = vld [vmem:[%s8709_s7 + $0x7b0] sm:$0xf0]  ;;  %v5678_v47 = vld [vmem:[%s8709_s7 + $0x484] sm:$0xf] }
 0x212   :  { %2613 = vmatmul.bf16.vlgmr.msrb.gmra.mxu2 %v7203_v13  ;;  %2626 = vmatmul.bf16.vlgmr.msrb.gmra.mxu3 %v7205_v14  ;;  %v4651_v48 = vld [vmem:[%s8709_s7 + $0x490] sm:$0xf0]  ;;  %v5054_v54 = vor.u32 %v5778_v37, %v5051_v38  ;;  %v5710_v56 = vld [vmem:[%s8709_s7 + $0x584] sm:$0xf] }
 0x213   :  { %2639 = vmatmul.bf16.vlgmr.msra.gmra.mxu0 %v7207_v44  ;;  %2652 = vmatmul.bf16.vlgmr.msra.gmra.mxu1 %v7209_v45  ;;  %v4779_v57 = vld [vmem:[%s8709_s7 + $0x590] sm:$0xf0]  ;;  %v5742_v22 = vld [vmem:[%s8709_s7 + $0x684] sm:$0xf]  ;;  %v4654_v3 = vor.u32 %v5678_v47, %v4651_v48 }
 0x214   :  { %2709 = vmatpush.bf16.msrb.mxu2 %v4702_v34  ;;  %2722 = vmatpush.bf16.msrb.mxu3 %v4830_v29  ;;  %v4907_v59 = vld [vmem:[%s8709_s7 + $0x690] sm:$0xf0]  ;;  %v5774_v58 = vld [vmem:[%s8709_s7 + $0x784] sm:$0xf]  ;;  %v4782_v60 = vor.u32 %v5710_v56, %v4779_v57  ;;  %v4321_v56 = vld [vmem:[%s8709_s7 + $0x1e8] sm:$0xf] }
 0x215   :  { %2735 = vmatpush.bf16.msra.mxu0 %v4958_v23  ;;  %2748 = vmatpush.bf16.msra.mxu1 %v5086_v24  ;;  %v5035_v4 = vld [vmem:[%s8709_s7 + $0x790] sm:$0xf0]  ;;  %v5674_v40 = vld [vmem:[%s8709_s7 + $0x464] sm:$0xf]  ;;  %v4910_v50 = vor.u32 %v5742_v22, %v4907_v59  ;;  %v5597_v57 = vld [vmem:[%s8709_s7 + $0x1f4] sm:$0xf0] }
 0x216   :  { %v4635_v41 = vld [vmem:[%s8709_s7 + $0x470] sm:$0xf0]  ;;  %v5038_v62 = vor.u32 %v5774_v58, %v5035_v4  ;;  %v5706_v55 = vld [vmem:[%s8709_s7 + $0x564] sm:$0xf]  ;;  %v4449_v22 = vld [vmem:[%s8709_s7 + $0x2e8] sm:$0xf] }
 0x217   :  { %v4763_v52 = vld [vmem:[%s8709_s7 + $0x570] sm:$0xf0]  ;;  %v5738_v7 = vld [vmem:[%s8709_s7 + $0x664] sm:$0xf]  ;;  %v4638_v0 = vor.u32 %v5674_v40, %v4635_v41  ;;  %v5629_v4 = vld [vmem:[%s8709_s7 + $0x2f4] sm:$0xf0] }
 0x218   :  { %2710 = vmatpush.bf16.msrb.mxu2 %v4686_v30  ;;  %2723 = vmatpush.bf16.msrb.mxu3 %v4814_v21  ;;  %v4891_v63 = vld [vmem:[%s8709_s7 + $0x670] sm:$0xf0]  ;;  %v5770_v61 = vld [vmem:[%s8709_s7 + $0x764] sm:$0xf]  ;;  %v4766_v5 = vor.u32 %v5706_v55, %v4763_v52  ;;  %v4177_v55 = vld [vmem:[%s8709_s7 + $0xc8] sm:$0xf] }
 0x219   :  { %2736 = vmatpush.bf16.msra.mxu0 %v4942_v32  ;;  %2749 = vmatpush.bf16.msra.mxu1 %v5070_v33  ;;  %v5019_v51 = vld [vmem:[%s8709_s7 + $0x770] sm:$0xf0]  ;;  %v5670_v28 = vld [vmem:[%s8709_s7 + $0x444] sm:$0xf]  ;;  %v4894_v9 = vor.u32 %v5738_v7, %v4891_v63  ;;  %v5561_v52 = vld [vmem:[%s8709_s7 + $0xd4] sm:$0xf0]  ;;  %v4450_v7 = vor.u32 %v5629_v4, %v4449_v22 }
 0x21a   :  { %v4619_v6 = vld [vmem:[%s8709_s7 + $0x450] sm:$0xf0]  ;;  %v5022_v10 = vor.u32 %v5770_v61, %v5019_v51  ;;  %v5702_v34 = vld [vmem:[%s8709_s7 + $0x544] sm:$0xf]  ;;  %v4305_v61 = vld [vmem:[%s8709_s7 + $0x1c8] sm:$0xf] }
 0x21b   :  { %v4747_v11 = vld [vmem:[%s8709_s7 + $0x550] sm:$0xf0]  ;;  %v5734_v12 = vld [vmem:[%s8709_s7 + $0x644] sm:$0xf]  ;;  %v4622_v23 = vor.u32 %v5670_v28, %v4619_v6  ;;  %v5593_v51 = vld [vmem:[%s8709_s7 + $0x1d4] sm:$0xf0] }
 0x21c   :  { %2711 = vmatpush.bf16.msrb.mxu2 %v4670_v42  ;;  %2724 = vmatpush.bf16.msrb.mxu3 %v4798_v43  ;;  %v4875_v17 = vld [vmem:[%s8709_s7 + $0x650] sm:$0xf0]  ;;  %v5766_v18 = vld [vmem:[%s8709_s7 + $0x744] sm:$0xf]  ;;  %v4750_v24 = vor.u32 %v5702_v34, %v4747_v11  ;;  %v4561_v28 = vld [vmem:[%s8709_s7 + $0x3c8] sm:$0xf] }
 0x21d   :  { %2737 = vmatpush.bf16.msra.mxu0 %v4926_v53  ;;  %2750 = vmatpush.bf16.msra.mxu1 %v5054_v54  ;;  %v5003_v29 = vld [vmem:[%s8709_s7 + $0x750] sm:$0xf0]  ;;  %v5666_v25 = vld [vmem:[%s8709_s7 + $0x424] sm:$0xf]  ;;  %v4878_v8 = vor.u32 %v5734_v12, %v4875_v17  ;;  %v4193_v53 = vld [vmem:[%s8709_s7 + $0xe8] sm:$0xf] }
 0x21e   :  { %v4603_v49 = vld [vmem:[%s8709_s7 + $0x430] sm:$0xf0]  ;;  %v5006_v20 = vor.u32 %v5766_v18, %v5003_v29  ;;  %v5698_v39 = vld [vmem:[%s8709_s7 + $0x524] sm:$0xf]  ;;  %v5565_v54 = vld [vmem:[%s8709_s7 + $0xf4] sm:$0xf0] }
 0x21f   :  { %v4731_v27 = vld [vmem:[%s8709_s7 + $0x530] sm:$0xf0]  ;;  %v5730_v30 = vld [vmem:[%s8709_s7 + $0x624] sm:$0xf]  ;;  %v4606_v33 = vor.u32 %v5666_v25, %v4603_v49  ;;  %v5657_v6 = vld [vmem:[%s8709_s7 + $0x3d4] sm:$0xf0] }
 0x220   :  { %2712 = vmatpush.bf16.msrb.mxu2 %v4654_v3  ;;  %2725 = vmatpush.bf16.msrb.mxu3 %v4782_v60  ;;  %v4859_v21 = vld [vmem:[%s8709_s7 + $0x630] sm:$0xf0]  ;;  %v5762_v31 = vld [vmem:[%s8709_s7 + $0x724] sm:$0xf]  ;;  %v4734_v2 = vor.u32 %v5698_v39, %v4731_v27  ;;  %v4577_v3 = vld [vmem:[%s8709_s7 + $0x3e8] sm:$0xf]  ;;  %v4562_v17 = vor.u32 %v5657_v6, %v4561_v28 }
 0x221   :  { %2738 = vmatpush.bf16.msra.mxu0 %v4910_v50  ;;  %2751 = vmatpush.bf16.msra.mxu1 %v5038_v62  ;;  %v4987_v26 = vld [vmem:[%s8709_s7 + $0x730] sm:$0xf0]  ;;  %v5662_v32 = vld [vmem:[%s8709_s7 + $0x404] sm:$0xf]  ;;  %v4862_v37 = vor.u32 %v5730_v30, %v4859_v21  ;;  %v5661_v60 = vld [vmem:[%s8709_s7 + $0x3f4] sm:$0xf0]  ;;  %v4194_v50 = vor.u32 %v5565_v54, %v4193_v53  ;;  %v4322_v62 = vor.u32 %v5597_v57, %v4321_v56 }
 0x222   :  { %2665 = vmatmul.bf16.vlgmr.msra.gmra.mxu2 %v6990_v46  ;;  %2678 = vmatmul.bf16.vlgmr.msra.gmra.mxu3 %v6992_v1  ;;  %v4587_v16 = vld [vmem:[%s8709_s7 + $0x410] sm:$0xf0]  ;;  %v5694_v35 = vld [vmem:[%s8709_s7 + $0x504] sm:$0xf]  ;;  %v4990_v38 = vor.u32 %v5762_v31, %v4987_v26  ;;  %v4578_v63 = vor.u32 %v5661_v60, %v4577_v3  ;;  %v4161_v34 = vld [vmem:[%s8709_s7 + $0xa8] sm:$0xf] }
 0x223   :  { %2691 = vmatmul.bf16.vlgmr.msrb.gmra.mxu0 %v6994_v19  ;;  %2704 = vmatmul.bf16.vlgmr.msrb.gmra.mxu1 %v6996_v15  ;;  %v4715_v36 = vld [vmem:[%s8709_s7 + $0x510] sm:$0xf0]  ;;  %v5726_v42 = vld [vmem:[%s8709_s7 + $0x604] sm:$0xf]  ;;  %v4590_v59 = vor.u32 %v5662_v32, %v4587_v16  ;;  %v5557_v11 = vld [vmem:[%s8709_s7 + $0xb4] sm:$0xf0] }
 0x224   :  { %2713 = vmatpush.bf16.msrb.mxu2 %v4638_v0  ;;  %2726 = vmatpush.bf16.msrb.mxu3 %v4766_v5  ;;  %v4843_v43 = vld [vmem:[%s8709_s7 + $0x610] sm:$0xf0]  ;;  %v5758_v47 = vld [vmem:[%s8709_s7 + $0x704] sm:$0xf]  ;;  %v4718_v58 = vor.u32 %v5694_v35, %v4715_v36  ;;  %v4433_v0 = vld [vmem:[%s8709_s7 + $0x2c8] sm:$0xf] }
 0x225   :  { %2739 = vmatpush.bf16.msra.mxu0 %v4894_v9  ;;  %2752 = vmatpush.bf16.msra.mxu1 %v5022_v10  ;;  %v4971_v48 = vld [vmem:[%s8709_s7 + $0x710] sm:$0xf0]  ;;  %v4846_v40 = vor.u32 %v5726_v42, %v4843_v43  ;;  %v5625_v5 = vld [vmem:[%s8709_s7 + $0x2d4] sm:$0xf0]  ;;  %v4178_v9 = vor.u32 %v5561_v52, %v4177_v55  ;;  %v4306_v10 = vor.u32 %v5593_v51, %v4305_v61  ;;  %v4289_v18 = vld [vmem:[%s8709_s7 + $0x1a8] sm:$0xf] }
 0x226   :  { %v4974_v41 = vor.u32 %v5758_v47, %v4971_v48  ;;  %v4434_v12 = vor.u32 %v5625_v5, %v4433_v0  ;;  %v5589_v29 = vld [vmem:[%s8709_s7 + $0x1b4] sm:$0xf0]  ;;  %v4545_v25 = vld [vmem:[%s8709_s7 + $0x3a8] sm:$0xf] }
 0x227   :  { %v5653_v49 = vld [vmem:[%s8709_s7 + $0x3b4] sm:$0xf0]  ;;  %v4145_v39 = vld [vmem:[%s8709_s7 + $0x88] sm:$0xf] }
 0x228   :  { %2714 = vmatpush.bf16.msrb.mxu2 %v4622_v23  ;;  %2727 = vmatpush.bf16.msrb.mxu3 %v4750_v24  ;;  %v4417_v23 = vld [vmem:[%s8709_s7 + $0x2a8] sm:$0xf]  ;;  %v5621_v24 = vld [vmem:[%s8709_s7 + $0x2b4] sm:$0xf0]  ;;  %v4546_v21 = vor.u32 %v5653_v49, %v4545_v25 }
 0x229   :  { %2740 = vmatpush.bf16.msra.mxu0 %v4878_v8  ;;  %2753 = vmatpush.bf16.msra.mxu1 %v5006_v20  ;;  %v4162_v8 = vor.u32 %v5557_v11, %v4161_v34  ;;  %v4290_v20 = vor.u32 %v5589_v29, %v4289_v18  ;;  %v5553_v27 = vld [vmem:[%s8709_s7 + $0x94] sm:$0xf0]  ;;  %v4418_v30 = vor.u32 %v5621_v24, %v4417_v23  ;;  %v4273_v31 = vld [vmem:[%s8709_s7 + $0x188] sm:$0xf] }
 0x22a   :  { %v5585_v26 = vld [vmem:[%s8709_s7 + $0x194] sm:$0xf0]  ;;  %v4401_v32 = vld [vmem:[%s8709_s7 + $0x288] sm:$0xf]  ;;  %v4146_v35 = vor.u32 %v5553_v27, %v4145_v39 }
 0x22b   :  { %v5649_v16 = vld [vmem:[%s8709_s7 + $0x394] sm:$0xf0]  ;;  %v4274_v36 = vor.u32 %v5585_v26, %v4273_v31  ;;  %v4257_v47 = vld [vmem:[%s8709_s7 + $0x168] sm:$0xf] }
 0x22c   :  { %2715 = vmatpush.bf16.msrb.mxu2 %v4606_v33  ;;  %2728 = vmatpush.bf16.msrb.mxu3 %v4734_v2  ;;  %v5617_v33 = vld [vmem:[%s8709_s7 + $0x294] sm:$0xf0]  ;;  %v4529_v2 = vld [vmem:[%s8709_s7 + $0x388] sm:$0xf] }
 0x22d   :  { %2741 = vmatpush.bf16.msra.mxu0 %v4862_v37  ;;  %2754 = vmatpush.bf16.msra.mxu1 %v4990_v38  ;;  %v4129_v37 = vld [vmem:[%s8709_s7 + $0x68] sm:$0xf]  ;;  %v5549_v38 = vld [vmem:[%s8709_s7 + $0x74] sm:$0xf0]  ;;  %v4402_v42 = vor.u32 %v5617_v33, %v4401_v32  ;;  %v4530_v43 = vor.u32 %v5649_v16, %v4529_v2 }
 0x22e   :  { %v5581_v48 = vld [vmem:[%s8709_s7 + $0x174] sm:$0xf0]  ;;  %v4385_v53 = vld [vmem:[%s8709_s7 + $0x268] sm:$0xf]  ;;  %v4130_v22 = vor.u32 %v5549_v38, %v4129_v37 }
 0x22f   :  { %v5613_v54 = vld [vmem:[%s8709_s7 + $0x274] sm:$0xf0]  ;;  %v4513_v56 = vld [vmem:[%s8709_s7 + $0x368] sm:$0xf] }
 0x230   :  { %2716 = vmatpush.bf16.msrb.mxu2 %v4590_v59  ;;  %2729 = vmatpush.bf16.msrb.mxu3 %v4718_v58  ;;  %v5645_v57 = vld [vmem:[%s8709_s7 + $0x374] sm:$0xf0]  ;;  %v4258_v59 = vor.u32 %v5581_v48, %v4257_v47  ;;  %v4113_v58 = vld [vmem:[%s8709_s7 + $0x48] sm:$0xf]  ;;  %v4386_v3 = vor.u32 %v5613_v54, %v4385_v53 }
 0x231   :  { %2742 = vmatpush.bf16.msra.mxu0 %v4846_v40  ;;  %2755 = vmatpush.bf16.msra.mxu1 %v4974_v41  ;;  %v5545_v4 = vld [vmem:[%s8709_s7 + $0x54] sm:$0xf0]  ;;  %v4514_v60 = vor.u32 %v5645_v57, %v4513_v56  ;;  %v4241_v40 = vld [vmem:[%s8709_s7 + $0x148] sm:$0xf] }
 0x232   :  { %v5577_v41 = vld [vmem:[%s8709_s7 + $0x154] sm:$0xf0]  ;;  %v4497_v55 = vld [vmem:[%s8709_s7 + $0x348] sm:$0xf] }
 0x233   :  { %2717 = vmatmul.bf16.vlgmr.msrb.gmra.mxu2 %v7203_v13  ;;  %2730 = vmatmul.bf16.vlgmr.msrb.gmra.mxu3 %v7205_v14  ;;  %v5641_v52 = vld [vmem:[%s8709_s7 + $0x354] sm:$0xf0]  ;;  %v4097_v61 = vld [vmem:[%s8709_s7 + $0x28] sm:$0xf] }
 0x234   :  { %2761 = vmatpush.bf16.msra.mxu2 %v4194_v50  ;;  %2774 = vmatpush.bf16.msra.mxu3 %v4322_v62  ;;  %v4369_v50 = vld [vmem:[%s8709_s7 + $0x248] sm:$0xf]  ;;  %v5609_v62 = vld [vmem:[%s8709_s7 + $0x254] sm:$0xf0]  ;;  %v4498_v5 = vor.u32 %v5641_v52, %v4497_v55 }
 0x235   :  { %2787 = vmatpush.bf16.msrb.mxu0 %v4450_v7  ;;  %2800 = vmatpush.bf16.msrb.mxu1 %v4578_v63  ;;  %v4114_v7 = vor.u32 %v5545_v4, %v4113_v58  ;;  %v4242_v63 = vor.u32 %v5577_v41, %v4241_v40  ;;  %v5541_v51 = vld [vmem:[%s8709_s7 + $0x34] sm:$0xf0]  ;;  %v4370_v0 = vor.u32 %v5609_v62, %v4369_v50  ;;  %v4225_v28 = vld [vmem:[%s8709_s7 + $0x128] sm:$0xf] }
 0x236   :  { %2743 = vmatmul.bf16.vlgmr.msra.gmra.mxu0 %v7207_v44  ;;  %2756 = vmatmul.bf16.vlgmr.msra.gmra.mxu1 %v7209_v45  ;;  %v5573_v6 = vld [vmem:[%s8709_s7 + $0x134] sm:$0xf0]  ;;  %v4481_v34 = vld [vmem:[%s8709_s7 + $0x328] sm:$0xf] }
 0x237   :  { %v5637_v11 = vld [vmem:[%s8709_s7 + $0x334] sm:$0xf0]  ;;  %v4226_v18 = vor.u32 %v5573_v6, %v4225_v28  ;;  %v4209_v23 = vld [vmem:[%s8709_s7 + $0x108] sm:$0xf] }
 0x238   :  { %2762 = vmatpush.bf16.msra.mxu2 %v4178_v9  ;;  %2775 = vmatpush.bf16.msra.mxu3 %v4306_v10  ;;  %v4353_v9 = vld [vmem:[%s8709_s7 + $0x228] sm:$0xf]  ;;  %v5605_v10 = vld [vmem:[%s8709_s7 + $0x234] sm:$0xf0]  ;;  %v4482_v49 = vor.u32 %v5637_v11, %v4481_v34 }
 0x239   :  { %2788 = vmatpush.bf16.msrb.mxu0 %v4434_v12  ;;  %2801 = vmatpush.bf16.msrb.mxu1 %v4562_v17  ;;  %v4081_v12 = vld [vmem:[%s8709_s7 + $0x8] sm:$0xf]  ;;  %v4098_v17 = vor.u32 %v5541_v51, %v4097_v61  ;;  %v5537_v29 = vld [vmem:[%s8709_s7 + $0x14] sm:$0xf0]  ;;  %v4354_v25 = vor.u32 %v5605_v10, %v4353_v9 }
 0x23a   :  { %v5569_v24 = vld [vmem:[%s8709_s7 + $0x114] sm:$0xf0]  ;;  %v4465_v39 = vld [vmem:[%s8709_s7 + $0x308] sm:$0xf]  ;;  %v4082_v33 = vor.u32 %v5537_v29, %v4081_v12 }
 0x23b   :  { %v5633_v27 = vld [vmem:[%s8709_s7 + $0x314] sm:$0xf0]  ;;  %v4833_v31 = vld [vmem:[%s8709_s7 + $0x5e8] sm:$0xf]  ;;  %v4210_v2 = vor.u32 %v5569_v24, %v4209_v23 }
 0x23c   :  { %2763 = vmatpush.bf16.msra.mxu2 %v4162_v8  ;;  %2776 = vmatpush.bf16.msra.mxu3 %v4290_v20  ;;  %v4337_v8 = vld [vmem:[%s8709_s7 + $0x208] sm:$0xf]  ;;  %v5601_v20 = vld [vmem:[%s8709_s7 + $0x214] sm:$0xf0]  ;;  %v4466_v38 = vor.u32 %v5633_v27, %v4465_v39 }
 0x23d   :  { %2789 = vmatpush.bf16.msrb.mxu0 %v4418_v30  ;;  %2802 = vmatpush.bf16.msrb.mxu1 %v4546_v21  ;;  %v4705_v30 = vld [vmem:[%s8709_s7 + $0x4e8] sm:$0xf]  ;;  %v5693_v21 = vld [vmem:[%s8709_s7 + $0x4f4] sm:$0xf0]  ;;  %v4338_v37 = vor.u32 %v5601_v20, %v4337_v8 }
 0x23e   :  { %v5725_v26 = vld [vmem:[%s8709_s7 + $0x5f4] sm:$0xf0]  ;;  %v4961_v32 = vld [vmem:[%s8709_s7 + $0x6e8] sm:$0xf] }
 0x23f   :  { %v5757_v16 = vld [vmem:[%s8709_s7 + $0x6f4] sm:$0xf0]  ;;  %v4689_v47 = vld [vmem:[%s8709_s7 + $0x4c8] sm:$0xf] }
 0x240   :  { %2764 = vmatpush.bf16.msra.mxu2 %v4146_v35  ;;  %2777 = vmatpush.bf16.msra.mxu3 %v4274_v36  ;;  %v5089_v35 = vld [vmem:[%s8709_s7 + $0x7e8] sm:$0xf]  ;;  %v5789_v36 = vld [vmem:[%s8709_s7 + $0x7f4] sm:$0xf0]  ;;  %v4962_v53 = vor.u32 %v5757_v16, %v4961_v32 }
 0x241   :  { %2790 = vmatpush.bf16.msrb.mxu0 %v4402_v42  ;;  %2803 = vmatpush.bf16.msrb.mxu1 %v4530_v43  ;;  %v4706_v42 = vor.u32 %v5693_v21, %v4705_v30  ;;  %v4834_v43 = vor.u32 %v5725_v26, %v4833_v31  ;;  %v5689_v48 = vld [vmem:[%s8709_s7 + $0x4d4] sm:$0xf0]  ;;  %v5090_v54 = vor.u32 %v5789_v36, %v5089_v35  ;;  %v4817_v56 = vld [vmem:[%s8709_s7 + $0x5c8] sm:$0xf] }
 0x242   :  { %v5721_v57 = vld [vmem:[%s8709_s7 + $0x5d4] sm:$0xf0]  ;;  %v5073_v58 = vld [vmem:[%s8709_s7 + $0x7c8] sm:$0xf] }
 0x243   :  { %v5785_v4 = vld [vmem:[%s8709_s7 + $0x7d4] sm:$0xf0]  ;;  %v4673_v40 = vld [vmem:[%s8709_s7 + $0x4a8] sm:$0xf] }
 0x244   :  { %2765 = vmatpush.bf16.msra.mxu2 %v4130_v22  ;;  %2778 = vmatpush.bf16.msra.mxu3 %v4258_v59  ;;  %v4945_v22 = vld [vmem:[%s8709_s7 + $0x6c8] sm:$0xf]  ;;  %v5753_v59 = vld [vmem:[%s8709_s7 + $0x6d4] sm:$0xf0]  ;;  %v5074_v62 = vor.u32 %v5785_v4, %v5073_v58 }
 0x245   :  { %2791 = vmatpush.bf16.msrb.mxu0 %v4386_v3  ;;  %2804 = vmatpush.bf16.msrb.mxu1 %v4514_v60  ;;  %v4690_v3 = vor.u32 %v5689_v48, %v4689_v47  ;;  %v4818_v60 = vor.u32 %v5721_v57, %v4817_v56  ;;  %v5685_v41 = vld [vmem:[%s8709_s7 + $0x4b4] sm:$0xf0]  ;;  %v4946_v50 = vor.u32 %v5753_v59, %v4945_v22  ;;  %v4801_v55 = vld [vmem:[%s8709_s7 + $0x5a8] sm:$0xf] }
 0x246   :  { %v5717_v52 = vld [vmem:[%s8709_s7 + $0x5b4] sm:$0xf0]  ;;  %v5057_v61 = vld [vmem:[%s8709_s7 + $0x7a8] sm:$0xf] }
 0x247   :  { %v5781_v51 = vld [vmem:[%s8709_s7 + $0x7b4] sm:$0xf0]  ;;  %v4657_v28 = vld [vmem:[%s8709_s7 + $0x488] sm:$0xf] }
 0x248   :  { %2766 = vmatpush.bf16.msra.mxu2 %v4114_v7  ;;  %2779 = vmatpush.bf16.msra.mxu3 %v4242_v63  ;;  %v4929_v7 = vld [vmem:[%s8709_s7 + $0x6a8] sm:$0xf]  ;;  %v5749_v63 = vld [vmem:[%s8709_s7 + $0x6b4] sm:$0xf0]  ;;  %v5058_v10 = vor.u32 %v5781_v51, %v5057_v61 }
 0x249   :  { %2792 = vmatpush.bf16.msrb.mxu0 %v4370_v0  ;;  %2805 = vmatpush.bf16.msrb.mxu1 %v4498_v5  ;;  %v4674_v0 = vor.u32 %v5685_v41, %v4673_v40  ;;  %v4802_v5 = vor.u32 %v5717_v52, %v4801_v55  ;;  %v5681_v6 = vld [vmem:[%s8709_s7 + $0x494] sm:$0xf0]  ;;  %v4930_v9 = vor.u32 %v5749_v63, %v4929_v7  ;;  %v4785_v34 = vld [vmem:[%s8709_s7 + $0x588] sm:$0xf] }
 0x24a   :  { %v5713_v11 = vld [vmem:[%s8709_s7 + $0x594] sm:$0xf0]  ;;  %v4913_v12 = vld [vmem:[%s8709_s7 + $0x688] sm:$0xf]  ;;  %v4658_v23 = vor.u32 %v5681_v6, %v4657_v28 }
 0x24b   :  { %v5777_v29 = vld [vmem:[%s8709_s7 + $0x794] sm:$0xf0]  ;;  %v4786_v24 = vor.u32 %v5713_v11, %v4785_v34  ;;  %v4769_v39 = vld [vmem:[%s8709_s7 + $0x568] sm:$0xf]  ;;  %v5595_v34 = vld [vmem:[%s8709_s7 + $0x1ec] sm:$0xf] }
 0x24c   :  { %2767 = vmatpush.bf16.msra.mxu2 %v4098_v17  ;;  %2780 = vmatpush.bf16.msra.mxu3 %v4226_v18  ;;  %v5745_v17 = vld [vmem:[%s8709_s7 + $0x694] sm:$0xf0]  ;;  %v5041_v18 = vld [vmem:[%s8709_s7 + $0x788] sm:$0xf]  ;;  %v4323_v11 = vld [vmem:[%s8709_s7 + $0x1f8] sm:$0xf0] }
 0x24d   :  { %2793 = vmatpush.bf16.msrb.mxu0 %v4354_v25  ;;  %2806 = vmatpush.bf16.msrb.mxu1 %v4482_v49  ;;  %v4641_v25 = vld [vmem:[%s8709_s7 + $0x468] sm:$0xf]  ;;  %v5677_v49 = vld [vmem:[%s8709_s7 + $0x474] sm:$0xf0]  ;;  %v4914_v8 = vor.u32 %v5745_v17, %v4913_v12  ;;  %v5042_v20 = vor.u32 %v5777_v29, %v5041_v18  ;;  %v5627_v12 = vld [vmem:[%s8709_s7 + $0x2ec] sm:$0xf] }
 0x24e   :  { %v5709_v27 = vld [vmem:[%s8709_s7 + $0x574] sm:$0xf0]  ;;  %v4897_v30 = vld [vmem:[%s8709_s7 + $0x668] sm:$0xf]  ;;  %v4642_v32 = vor.u32 %v5677_v49, %v4641_v25  ;;  %v4451_v29 = vld [vmem:[%s8709_s7 + $0x2f8] sm:$0xf0] }
 0x24f   :  { %v5741_v21 = vld [vmem:[%s8709_s7 + $0x674] sm:$0xf0]  ;;  %v5025_v31 = vld [vmem:[%s8709_s7 + $0x768] sm:$0xf] }
 0x250   :  { %2768 = vmatpush.bf16.msra.mxu2 %v4082_v33  ;;  %2781 = vmatpush.bf16.msra.mxu3 %v4210_v2  ;;  %v5773_v26 = vld [vmem:[%s8709_s7 + $0x774] sm:$0xf0]  ;;  %v4770_v33 = vor.u32 %v5709_v27, %v4769_v39  ;;  %v4625_v2 = vld [vmem:[%s8709_s7 + $0x448] sm:$0xf]  ;;  %v4898_v35 = vor.u32 %v5741_v21, %v4897_v30  ;;  %v5559_v39 = vld [vmem:[%s8709_s7 + $0xcc] sm:$0xf]  ;;  %v4454_v30 = vor.u32 %v5627_v12, %v4451_v29 }
 0x251   :  { %2794 = vmatpush.bf16.msrb.mxu0 %v4338_v37  ;;  %2807 = vmatpush.bf16.msrb.mxu1 %v4466_v38  ;;  %v5673_v16 = vld [vmem:[%s8709_s7 + $0x454] sm:$0xf0]  ;;  %v5026_v36 = vor.u32 %v5773_v26, %v5025_v31  ;;  %v4753_v37 = vld [vmem:[%s8709_s7 + $0x548] sm:$0xf]  ;;  %v4179_v27 = vld [vmem:[%s8709_s7 + $0xd8] sm:$0xf0] }
 0x252   :  { %v5705_v38 = vld [vmem:[%s8709_s7 + $0x554] sm:$0xf0]  ;;  %v5009_v47 = vld [vmem:[%s8709_s7 + $0x748] sm:$0xf]  ;;  %v5591_v31 = vld [vmem:[%s8709_s7 + $0x1cc] sm:$0xf] }
 0x253   :  { %2769 = vmatmul.bf16.vlgmr.msra.gmra.mxu2 %v6990_v46  ;;  %2782 = vmatmul.bf16.vlgmr.msra.gmra.mxu3 %v6992_v1  ;;  %v5769_v48 = vld [vmem:[%s8709_s7 + $0x754] sm:$0xf0]  ;;  %v4609_v56 = vld [vmem:[%s8709_s7 + $0x428] sm:$0xf]  ;;  %v4307_v26 = vld [vmem:[%s8709_s7 + $0x1d8] sm:$0xf0] }
 0x254   :  { %2813 = vmatpush.bf16.msrb.mxu2 %v4706_v42  ;;  %2826 = vmatpush.bf16.msrb.mxu3 %v4834_v43  ;;  %v4881_v42 = vld [vmem:[%s8709_s7 + $0x648] sm:$0xf]  ;;  %v5737_v43 = vld [vmem:[%s8709_s7 + $0x654] sm:$0xf0]  ;;  %v5010_v59 = vor.u32 %v5769_v48, %v5009_v47 }
 0x255   :  { %2839 = vmatpush.bf16.msra.mxu0 %v4962_v53  ;;  %2852 = vmatpush.bf16.msra.mxu1 %v5090_v54  ;;  %v4626_v53 = vor.u32 %v5673_v16, %v4625_v2  ;;  %v4754_v54 = vor.u32 %v5705_v38, %v4753_v37  ;;  %v5669_v57 = vld [vmem:[%s8709_s7 + $0x434] sm:$0xf0]  ;;  %v4882_v22 = vor.u32 %v5737_v43, %v4881_v42  ;;  %v4737_v58 = vld [vmem:[%s8709_s7 + $0x528] sm:$0xf]  ;;  %v5655_v2 = vld [vmem:[%s8709_s7 + $0x3cc] sm:$0xf] }
 0x256   :  { %2795 = vmatmul.bf16.vlgmr.msrb.gmra.mxu0 %v6994_v19  ;;  %2808 = vmatmul.bf16.vlgmr.msrb.gmra.mxu1 %v6996_v15  ;;  %v5701_v4 = vld [vmem:[%s8709_s7 + $0x534] sm:$0xf0]  ;;  %v4993_v40 = vld [vmem:[%s8709_s7 + $0x728] sm:$0xf]  ;;  %v4563_v16 = vld [vmem:[%s8709_s7 + $0x3d8] sm:$0xf0] }
 0x257   :  { %v5765_v41 = vld [vmem:[%s8709_s7 + $0x734] sm:$0xf0]  ;;  %v4738_v55 = vor.u32 %v5701_v4, %v4737_v58  ;;  %v4721_v7 = vld [vmem:[%s8709_s7 + $0x508] sm:$0xf]  ;;  %v5555_v37 = vld [vmem:[%s8709_s7 + $0xac] sm:$0xf]  ;;  %v4566_v47 = vor.u32 %v5655_v2, %v4563_v16 }
 0x258   :  { %2814 = vmatpush.bf16.msrb.mxu2 %v4690_v3  ;;  %2827 = vmatpush.bf16.msrb.mxu3 %v4818_v60  ;;  %v4865_v3 = vld [vmem:[%s8709_s7 + $0x628] sm:$0xf]  ;;  %v5733_v60 = vld [vmem:[%s8709_s7 + $0x634] sm:$0xf0]  ;;  %v4994_v51 = vor.u32 %v5765_v41, %v4993_v40  ;;  %v4163_v38 = vld [vmem:[%s8709_s7 + $0xb8] sm:$0xf0] }
 0x259   :  { %2840 = vmatpush.bf16.msra.mxu0 %v4946_v50  ;;  %2853 = vmatpush.bf16.msra.mxu1 %v5074_v62  ;;  %v4593_v50 = vld [vmem:[%s8709_s7 + $0x408] sm:$0xf]  ;;  %v4610_v62 = vor.u32 %v5669_v57, %v4609_v56  ;;  %v5665_v52 = vld [vmem:[%s8709_s7 + $0x414] sm:$0xf0]  ;;  %v4866_v61 = vor.u32 %v5733_v60, %v4865_v3  ;;  %v7830_v42 = vld [vmem:[%s8710_s8] sm:$0xf]  ;;  %v4166_v3 = vor.u32 %v5555_v37, %v4163_v38 }
 0x25a   :  { %v5697_v63 = vld [vmem:[%s8709_s7 + $0x514] sm:$0xf0]  ;;  %v4977_v28 = vld [vmem:[%s8709_s7 + $0x708] sm:$0xf]  ;;  %v4594_v17 = vor.u32 %v5665_v52, %v4593_v50  ;;  %v4291_v56 = vld [vmem:[%s8709_s7 + $0x1b8] sm:$0xf0] }
 0x25b   :  { %v5761_v6 = vld [vmem:[%s8709_s7 + $0x714] sm:$0xf0]  ;;  %v4722_v18 = vor.u32 %v5697_v63, %v4721_v7  ;;  %v5619_v57 = vld [vmem:[%s8709_s7 + $0x2ac] sm:$0xf]  ;;  %v4547_v58 = vld [vmem:[%s8709_s7 + $0x3b8] sm:$0xf0] }
 0x25c   :  { %2815 = vmatpush.bf16.msrb.mxu2 %v4674_v0  ;;  %2828 = vmatpush.bf16.msrb.mxu3 %v4802_v5  ;;  %v4849_v0 = vld [vmem:[%s8709_s7 + $0x608] sm:$0xf]  ;;  %v5729_v5 = vld [vmem:[%s8709_s7 + $0x614] sm:$0xf0]  ;;  %v4978_v49 = vor.u32 %v5761_v6, %v4977_v28  ;;  %v1265_v4 = vperm.slane %v7830_v42, 0 }
 0x25d   :  { %2841 = vmatpush.bf16.msra.mxu0 %v4930_v9  ;;  %2854 = vmatpush.bf16.msra.mxu1 %v5058_v10  ;;  %v5563_v9 = vld [vmem:[%s8709_s7 + $0xec] sm:$0xf]  ;;  %v4195_v10 = vld [vmem:[%s8709_s7 + $0xf8] sm:$0xf0]  ;;  %v4850_v25 = vor.u32 %v5729_v5, %v4849_v0 }
 0x25e   :  { %v5551_v40 = vld [vmem:[%s8709_s7 + $0x8c] sm:$0xf]  ;;  %v4147_v41 = vld [vmem:[%s8709_s7 + $0x98] sm:$0xf0] }
 0x25f   :  { %v4275_v52 = vld [vmem:[%s8709_s7 + $0x198] sm:$0xf0]  ;;  %v5615_v7 = vld [vmem:[%s8709_s7 + $0x28c] sm:$0xf]  ;;  %v4150_v6 = vor.u32 %v5551_v40, %v4147_v41 }
 0x260   :  { %2816 = vmatpush.bf16.msrb.mxu2 %v4658_v23  ;;  %2829 = vmatpush.bf16.msrb.mxu3 %v4786_v24  ;;  %v5659_v23 = vld [vmem:[%s8709_s7 + $0x3ec] sm:$0xf]  ;;  %v4579_v24 = vld [vmem:[%s8709_s7 + $0x3f8] sm:$0xf0] }
 0x261   :  { %2842 = vmatpush.bf16.msra.mxu0 %v4914_v8  ;;  %2855 = vmatpush.bf16.msra.mxu1 %v5042_v20  ;;  %v4198_v8 = vor.u32 %v5563_v9, %v4195_v10  ;;  %v4326_v20 = vor.u32 %v5595_v34, %v4323_v11  ;;  %v4582_v21 = vor.u32 %v5659_v23, %v4579_v24  ;;  %v5647_v0 = vld [vmem:[%s8709_s7 + $0x38c] sm:$0xf]  ;;  %v4531_v5 = vld [vmem:[%s8709_s7 + $0x398] sm:$0xf0] }
 0x262   :  { %v5547_v10 = vld [vmem:[%s8709_s7 + $0x6c] sm:$0xf]  ;;  %v4131_v34 = vld [vmem:[%s8709_s7 + $0x78] sm:$0xf0] }
 0x263   :  { %v5579_v23 = vld [vmem:[%s8709_s7 + $0x16c] sm:$0xf]  ;;  %v4259_v24 = vld [vmem:[%s8709_s7 + $0x178] sm:$0xf0] }
 0x264   :  { %2817 = vmatpush.bf16.msrb.mxu2 %v4642_v32  ;;  %2830 = vmatpush.bf16.msrb.mxu3 %v4770_v33  ;;  %v5623_v32 = vld [vmem:[%s8709_s7 + $0x2cc] sm:$0xf]  ;;  %v4435_v33 = vld [vmem:[%s8709_s7 + $0x2d8] sm:$0xf0] }
 0x265   :  { %2843 = vmatpush.bf16.msra.mxu0 %v4898_v35  ;;  %2856 = vmatpush.bf16.msra.mxu1 %v5026_v36  ;;  %v4182_v35 = vor.u32 %v5559_v39, %v4179_v27  ;;  %v4310_v36 = vor.u32 %v5591_v31, %v4307_v26  ;;  %v4438_v43 = vor.u32 %v5623_v32, %v4435_v33  ;;  %v4115_v31 = vld [vmem:[%s8709_s7 + $0x58] sm:$0xf0]  ;;  %v5575_v33 = vld [vmem:[%s8709_s7 + $0x14c] sm:$0xf] }
 0x266   :  { %v4134_v27 = vor.u32 %v5547_v10, %v4131_v34  ;;  %v4243_v2 = vld [vmem:[%s8709_s7 + $0x158] sm:$0xf0]  ;;  %v5607_v16 = vld [vmem:[%s8709_s7 + $0x24c] sm:$0xf] }
 0x267   :  { %v4371_v38 = vld [vmem:[%s8709_s7 + $0x258] sm:$0xf0]  ;;  %v5535_v41 = vld [vmem:[%s8709_s7 + $0xc] sm:$0xf] }
 0x268   :  { %2818 = vmatpush.bf16.msrb.mxu2 %v4626_v53  ;;  %2831 = vmatpush.bf16.msrb.mxu3 %v4754_v54  ;;  %v5587_v54 = vld [vmem:[%s8709_s7 + $0x1ac] sm:$0xf]  ;;  %v4483_v40 = vld [vmem:[%s8709_s7 + $0x338] sm:$0xf0] }
 0x269   :  { %2844 = vmatpush.bf16.msra.mxu0 %v4882_v22  ;;  %2857 = vmatpush.bf16.msra.mxu1 %v5010_v59  ;;  %v4419_v22 = vld [vmem:[%s8709_s7 + $0x2b8] sm:$0xf0]  ;;  %v5651_v59 = vld [vmem:[%s8709_s7 + $0x3ac] sm:$0xf]  ;;  %v4294_v60 = vor.u32 %v5587_v54, %v4291_v56  ;;  %v4246_v54 = vor.u32 %v5575_v33, %v4243_v2 }
 0x26a   :  { %v4422_v50 = vor.u32 %v5619_v57, %v4419_v22  ;;  %v4099_v56 = vld [vmem:[%s8709_s7 + $0x38] sm:$0xf0]  ;;  %v4374_v57 = vor.u32 %v5607_v16, %v4371_v38  ;;  %v5723_v10 = vld [vmem:[%s8709_s7 + $0x5ec] sm:$0xf] }
 0x26b   :  { %v4835_v34 = vld [vmem:[%s8709_s7 + $0x5f8] sm:$0xf0]  ;;  %v5783_v33 = vld [vmem:[%s8709_s7 + $0x7cc] sm:$0xf] }
 0x26c   :  { %2819 = vmatpush.bf16.msrb.mxu2 %v4610_v62  ;;  %2832 = vmatpush.bf16.msrb.mxu3 %v4738_v55  ;;  %v4550_v62 = vor.u32 %v5651_v59, %v4547_v58  ;;  %v5583_v55 = vld [vmem:[%s8709_s7 + $0x18c] sm:$0xf]  ;;  %v4227_v58 = vld [vmem:[%s8709_s7 + $0x138] sm:$0xf0] }
 0x26d   :  { %2845 = vmatpush.bf16.msra.mxu0 %v4866_v61  ;;  %2858 = vmatpush.bf16.msra.mxu1 %v4994_v51  ;;  %v4403_v51 = vld [vmem:[%s8709_s7 + $0x298] sm:$0xf0]  ;;  %v4278_v9 = vor.u32 %v5583_v55, %v4275_v52  ;;  %v5571_v59 = vld [vmem:[%s8709_s7 + $0x12c] sm:$0xf] }
 0x26e   :  { %v4406_v12 = vor.u32 %v5615_v7, %v4403_v51  ;;  %v4083_v55 = vld [vmem:[%s8709_s7 + $0x18] sm:$0xf0]  ;;  %v5567_v52 = vld [vmem:[%s8709_s7 + $0x10c] sm:$0xf] }
 0x26f   :  { %v2588_v48 = vpop.f32.mrf.mxu0  ;;  %v7832_v53 = vpop.f32.mrf.mxu1  ;;  %v4211_v7 = vld [vmem:[%s8709_s7 + $0x118] sm:$0xf0]  ;;  %v5599_v51 = vld [vmem:[%s8709_s7 + $0x20c] sm:$0xf] }
 0x270   :  { %2820 = vmatpush.bf16.msrb.mxu2 %v4594_v17  ;;  %2833 = vmatpush.bf16.msrb.mxu3 %v4722_v18  ;;  %v4534_v17 = vor.u32 %v5647_v0, %v4531_v5  ;;  %v4339_v0 = vld [vmem:[%s8709_s7 + $0x218] sm:$0xf0]  ;;  %v5631_v5 = vld [vmem:[%s8709_s7 + $0x30c] sm:$0xf] }
 0x271   :  { %2846 = vmatpush.bf16.msra.mxu0 %v4850_v25  ;;  %2859 = vmatpush.bf16.msra.mxu1 %v4978_v49  ;;  %v5611_v25 = vld [vmem:[%s8709_s7 + $0x26c] sm:$0xf]  ;;  %v4387_v49 = vld [vmem:[%s8709_s7 + $0x278] sm:$0xf0] }
 0x272   :  { %v4390_v26 = vor.u32 %v5611_v25, %v4387_v49  ;;  %v5075_v2 = vld [vmem:[%s8709_s7 + $0x7d8] sm:$0xf0] }
 0x273   :  { %2821 = vmatmul.bf16.vlgmr.msrb.gmra.mxu2 %v7203_v13  ;;  %2834 = vmatmul.bf16.vlgmr.msrb.gmra.mxu3 %v7205_v14  ;;  %v4675_v38 = vld [vmem:[%s8709_s7 + $0x4b8] sm:$0xf0] }
 0x274   :  { %2865 = vmatpush.bf16.msra.mxu2 %v4198_v8  ;;  %2878 = vmatpush.bf16.msra.mxu3 %v4326_v20  ;;  %v2562_v63 = vpop.f32.mrf.mxu2  ;;  %v2575_v61 = vpop.f32.mrf.mxu3  ;;  %v5643_v8 = vld [vmem:[%s8709_s7 + $0x36c] sm:$0xf]  ;;  %v4515_v20 = vld [vmem:[%s8709_s7 + $0x378] sm:$0xf0] }
 0x275   :  { %2891 = vmatpush.bf16.msrb.mxu0 %v4454_v30  ;;  %2904 = vmatpush.bf16.msrb.mxu1 %v4582_v21  ;;  %v2563_v28 = vadd.f32 %v2562_v63, %v1265_v4  ;;  %v4262_v30 = vor.u32 %v5579_v23, %v4259_v24  ;;  %v5543_v21 = vld [vmem:[%s8709_s7 + $0x4c] sm:$0xf]  ;;  %v4518_v32 = vor.u32 %v5643_v8, %v4515_v20  ;;  %v5091_v23 = vld [vmem:[%s8709_s7 + $0x7f8] sm:$0xf0] }
 0x276   :  { %2847 = vmatmul.bf16.vlgmr.msra.gmra.mxu0 %v7207_v44  ;;  %2860 = vmatmul.bf16.vlgmr.msra.gmra.mxu1 %v7209_v45  ;;  %v5603_v4 = vld [vmem:[%s8709_s7 + $0x22c] sm:$0xf]  ;;  %v4342_v24 = vor.u32 %v5599_v51, %v4339_v0  ;;  %v4838_v8 = vor.u32 %v5723_v10, %v4835_v34  ;;  %v4899_v34 = vld [vmem:[%s8709_s7 + $0x678] sm:$0xf0] }
 0x277   :  { %v2576_v11 = vadd.f32 %v2575_v61, %v2563_v28  ;;  %v2590_v18 = vpop.f32.mrf.mxu0  ;;  %v2603_v29 = vpop.f32.mrf.mxu1  ;;  %v4467_v28 = vld [vmem:[%s8709_s7 + $0x318] sm:$0xf0]  ;;  %v5687_v20 = vld [vmem:[%s8709_s7 + $0x4cc] sm:$0xf] }
 0x278   :  { %2866 = vmatpush.bf16.msra.mxu2 %v4182_v35  ;;  %2879 = vmatpush.bf16.msra.mxu3 %v4310_v36  ;;  %v4963_v18 = vld [vmem:[%s8709_s7 + $0x6f8] sm:$0xf0]  ;;  %v5787_v29 = vld [vmem:[%s8709_s7 + $0x7ec] sm:$0xf]  ;;  %v4470_v25 = vor.u32 %v5631_v5, %v4467_v28 }
 0x279   :  { %2892 = vmatpush.bf16.msrb.mxu0 %v4438_v43  ;;  %2905 = vmatpush.bf16.msrb.mxu1 %v4566_v47  ;;  %v2589_v39 = vadd.f32 %v2588_v48, %v2576_v11  ;;  %v5639_v43 = vld [vmem:[%s8709_s7 + $0x34c] sm:$0xf]  ;;  %v4499_v47 = vld [vmem:[%s8709_s7 + $0x358] sm:$0xf0]  ;;  %v4118_v48 = vor.u32 %v5543_v21, %v4115_v31 }
 0x27a   :  { %v4502_v22 = vor.u32 %v5639_v43, %v4499_v47  ;;  %v5755_v11 = vld [vmem:[%s8709_s7 + $0x6ec] sm:$0xf]  ;;  %v4819_v31 = vld [vmem:[%s8709_s7 + $0x5d8] sm:$0xf0]  ;;  %v5078_v47 = vor.u32 %v5783_v33, %v5075_v2 }
 0x27b   :  { %v7921_v35 = vadd.f32 %v7832_v53, %v2589_v39  ;;  %v5539_v53 = vld [vmem:[%s8709_s7 + $0x2c] sm:$0xf]  ;;  %v4691_v39 = vld [vmem:[%s8709_s7 + $0x4d8] sm:$0xf0] }
 0x27c   :  { %2867 = vmatpush.bf16.msra.mxu2 %v4166_v3  ;;  %2880 = vmatpush.bf16.msra.mxu3 %v4294_v60  ;;  %v2564_v36 = vpop.f32.mrf.mxu2  ;;  %v2577_v37 = vpop.f32.mrf.mxu3  ;;  %v4355_v3 = vld [vmem:[%s8709_s7 + $0x238] sm:$0xf0]  ;;  %v5635_v60 = vld [vmem:[%s8709_s7 + $0x32c] sm:$0xf]  ;;  %v4694_v16 = vor.u32 %v5687_v20, %v4691_v39 }
 0x27d   :  { %2893 = vmatpush.bf16.msrb.mxu0 %v4422_v50  ;;  %2906 = vmatpush.bf16.msrb.mxu1 %v4550_v62  ;;  %v4102_v50 = vor.u32 %v5539_v53, %v4099_v56  ;;  %v4230_v62 = vor.u32 %v5571_v59, %v4227_v58  ;;  %v4358_v63 = vor.u32 %v5603_v4, %v4355_v3  ;;  %v5719_v21 = vld [vmem:[%s8709_s7 + $0x5cc] sm:$0xf]  ;;  %v4931_v56 = vld [vmem:[%s8709_s7 + $0x6b8] sm:$0xf0] }
 0x27e   :  { %v4486_v61 = vor.u32 %v5635_v60, %v4483_v40  ;;  %v4822_v36 = vor.u32 %v5719_v21, %v4819_v31  ;;  %v5683_v37 = vld [vmem:[%s8709_s7 + $0x4ac] sm:$0xf]  ;;  %v4659_v3 = vld [vmem:[%s8709_s7 + $0x498] sm:$0xf0] }
 0x27f   :  { %v5747_v53 = vld [vmem:[%s8709_s7 + $0x6ac] sm:$0xf]  ;;  %v4787_v40 = vld [vmem:[%s8709_s7 + $0x598] sm:$0xf0] }
 0x280   :  { %2868 = vmatpush.bf16.msra.mxu2 %v4150_v6  ;;  %2881 = vmatpush.bf16.msra.mxu3 %v4278_v9  ;;  %v5691_v6 = vld [vmem:[%s8709_s7 + $0x4ec] sm:$0xf]  ;;  %v4707_v9 = vld [vmem:[%s8709_s7 + $0x4f8] sm:$0xf0] }
 0x281   :  { %2894 = vmatpush.bf16.msrb.mxu0 %v4406_v12  ;;  %2907 = vmatpush.bf16.msrb.mxu1 %v4534_v17  ;;  %v4086_v12 = vor.u32 %v5535_v41, %v4083_v55  ;;  %v4214_v17 = vor.u32 %v5567_v52, %v4211_v7  ;;  %v4710_v49 = vor.u32 %v5691_v6, %v4707_v9  ;;  %v5679_v4 = vld [vmem:[%s8709_s7 + $0x48c] sm:$0xf]  ;;  %v5043_v55 = vld [vmem:[%s8709_s7 + $0x798] sm:$0xf0] }
 0x282   :  { %v5711_v60 = vld [vmem:[%s8709_s7 + $0x58c] sm:$0xf]  ;;  %v4662_v52 = vor.u32 %v5679_v4, %v4659_v3  ;;  %v4771_v9 = vld [vmem:[%s8709_s7 + $0x578] sm:$0xf0] }
 0x283   :  { %v5743_v41 = vld [vmem:[%s8709_s7 + $0x68c] sm:$0xf]  ;;  %v4790_v7 = vor.u32 %v5711_v60, %v4787_v40  ;;  %v4755_v39 = vld [vmem:[%s8709_s7 + $0x558] sm:$0xf0] }
 0x284   :  { %2869 = vmatpush.bf16.msra.mxu2 %v4134_v27  ;;  %2882 = vmatpush.bf16.msra.mxu3 %v4262_v30  ;;  %v4966_v27 = vor.u32 %v5755_v11, %v4963_v18  ;;  %v5094_v30 = vor.u32 %v5787_v29, %v5091_v23  ;;  %v5707_v6 = vld [vmem:[%s8709_s7 + $0x56c] sm:$0xf]  ;;  %v5011_v31 = vld [vmem:[%s8709_s7 + $0x758] sm:$0xf0] }
 0x285   :  { %2895 = vmatpush.bf16.msrb.mxu0 %v4390_v26  ;;  %2908 = vmatpush.bf16.msrb.mxu1 %v4518_v32  ;;  %v5751_v26 = vld [vmem:[%s8709_s7 + $0x6cc] sm:$0xf]  ;;  %v4947_v32 = vld [vmem:[%s8709_s7 + $0x6d8] sm:$0xf0]  ;;  %v4774_v18 = vor.u32 %v5707_v6, %v4771_v9 }
 0x286   :  { %v4950_v43 = vor.u32 %v5751_v26, %v4947_v32  ;;  %v5739_v10 = vld [vmem:[%s8709_s7 + $0x66c] sm:$0xf]  ;;  %v4611_v2 = vld [vmem:[%s8709_s7 + $0x438] sm:$0xf0] }
 0x287   :  { %v5771_v11 = vld [vmem:[%s8709_s7 + $0x76c] sm:$0xf]  ;;  %v4595_v3 = vld [vmem:[%s8709_s7 + $0x418] sm:$0xf0] }
 0x288   :  { %2870 = vmatpush.bf16.msra.mxu2 %v4118_v48  ;;  %2883 = vmatpush.bf16.msra.mxu3 %v4246_v54  ;;  %v5715_v48 = vld [vmem:[%s8709_s7 + $0x5ac] sm:$0xf]  ;;  %v4803_v54 = vld [vmem:[%s8709_s7 + $0x5b8] sm:$0xf0] }
 0x289   :  { %2896 = vmatpush.bf16.msrb.mxu0 %v4374_v57  ;;  %2909 = vmatpush.bf16.msrb.mxu1 %v4502_v22  ;;  %v5779_v57 = vld [vmem:[%s8709_s7 + $0x7ac] sm:$0xf]  ;;  %v5059_v22 = vld [vmem:[%s8709_s7 + $0x7b8] sm:$0xf0] }
 0x28a   :  { %v5703_v20 = vld [vmem:[%s8709_s7 + $0x54c] sm:$0xf]  ;;  %v4723_v40 = vld [vmem:[%s8709_s7 + $0x518] sm:$0xf0] }
 0x28b   :  { %v5767_v21 = vld [vmem:[%s8709_s7 + $0x74c] sm:$0xf]  ;;  %v4758_v32 = vor.u32 %v5703_v20, %v4755_v39 }
 0x28c   :  { %2871 = vmatpush.bf16.msra.mxu2 %v4102_v50  ;;  %2884 = vmatpush.bf16.msra.mxu3 %v4230_v62  ;;  %v4915_v50 = vld [vmem:[%s8709_s7 + $0x698] sm:$0xf0]  ;;  %v5775_v62 = vld [vmem:[%s8709_s7 + $0x78c] sm:$0xf] }
 0x28d   :  { %2897 = vmatpush.bf16.msrb.mxu0 %v4358_v63  ;;  %2910 = vmatpush.bf16.msrb.mxu1 %v4486_v61  ;;  %v5675_v63 = vld [vmem:[%s8709_s7 + $0x46c] sm:$0xf]  ;;  %v4643_v61 = vld [vmem:[%s8709_s7 + $0x478] sm:$0xf0]  ;;  %v4918_v51 = vor.u32 %v5743_v41, %v4915_v50  ;;  %v5046_v0 = vor.u32 %v5775_v62, %v5043_v55 }
 0x28e   :  { %v5667_v33 = vld [vmem:[%s8709_s7 + $0x42c] sm:$0xf]  ;;  %v4851_v50 = vld [vmem:[%s8709_s7 + $0x618] sm:$0xf0] }
 0x28f   :  { %v5663_v4 = vld [vmem:[%s8709_s7 + $0x40c] sm:$0xf]  ;;  %v4979_v55 = vld [vmem:[%s8709_s7 + $0x718] sm:$0xf0] }
 0x290   :  { %2872 = vmatpush.bf16.msra.mxu2 %v4086_v12  ;;  %2885 = vmatpush.bf16.msra.mxu3 %v4214_v17  ;;  %v8056_v59 = vpop.f32.mrf.mxu0  ;;  %v8058_v58 = vpop.f32.mrf.mxu1  ;;  %v5027_v12 = vld [vmem:[%s8709_s7 + $0x778] sm:$0xf0]  ;;  %v4646_v17 = vor.u32 %v5675_v63, %v4643_v61  ;;  %v5727_v41 = vld [vmem:[%s8709_s7 + $0x60c] sm:$0xf]  ;;  %v5217_v63 = vld [vmem:[%s8711_s9 + $0xf0] sm:$0xf] }
 0x291   :  { %2898 = vmatpush.bf16.msrb.mxu0 %v4342_v24  ;;  %2911 = vmatpush.bf16.msrb.mxu1 %v4470_v25  ;;  %v5671_v24 = vld [vmem:[%s8709_s7 + $0x44c] sm:$0xf]  ;;  %v4627_v25 = vld [vmem:[%s8709_s7 + $0x458] sm:$0xf0]  ;;  %v5821_v61 = vld [vmem:[%s8711_s9 + $0xf4] sm:$0xf0]  ;;  %v4854_v6 = vor.u32 %v5727_v41, %v4851_v50 }
 0x292   :  { %v4630_v26 = vor.u32 %v5671_v24, %v4627_v25  ;;  %v5759_v62 = vld [vmem:[%s8709_s7 + $0x70c] sm:$0xf]  ;;  %v5819_v24 = vld [vmem:[%s8711_s9 + $0xe4] sm:$0xf0] }
 0x293   :  { %2873 = vmatmul.bf16.vlgmr.msra.gmra.mxu2 %v6990_v46  ;;  %2886 = vmatmul.bf16.vlgmr.msra.gmra.mxu3 %v6992_v1  ;;  %v4678_v46 = vor.u32 %v5683_v37, %v4675_v38  ;;  %v4806_v1 = vor.u32 %v5715_v48, %v4803_v54  ;;  %v5731_v48 = vld [vmem:[%s8709_s7 + $0x62c] sm:$0xf]  ;;  %v4867_v54 = vld [vmem:[%s8709_s7 + $0x638] sm:$0xf0]  ;;  %v4982_v9 = vor.u32 %v5759_v62, %v4979_v55  ;;  %v5811_v50 = vld [vmem:[%s8711_s9 + $0xa4] sm:$0xf0] }
 0x294   :  { %2917 = vmatpush.bf16.msrb.mxu2 %v4710_v49  ;;  %2930 = vmatpush.bf16.msrb.mxu3 %v4838_v8  ;;  %v4902_v49 = vor.u32 %v5739_v10, %v4899_v34  ;;  %v5030_v8 = vor.u32 %v5771_v11, %v5027_v12  ;;  %v5218_v12 = vor.u32 %v5821_v61, %v5217_v63  ;;  %v5835_v62 = vld [vmem:[%s8711_s9 + $0x164] sm:$0xf0] }
 0x295   :  { %2943 = vmatpush.bf16.msra.mxu0 %v4966_v27  ;;  %2956 = vmatpush.bf16.msra.mxu1 %v5094_v30  ;;  %v8090_v5 = vpop.f32.mrf.mxu2  ;;  %v8092_v28 = vpop.f32.mrf.mxu3  ;;  %v5735_v27 = vld [vmem:[%s8709_s7 + $0x64c] sm:$0xf]  ;;  %v4883_v30 = vld [vmem:[%s8709_s7 + $0x658] sm:$0xf0] }
 0x296   :  { %2899 = vmatmul.bf16.vlgmr.msrb.gmra.mxu0 %v6994_v19  ;;  %2912 = vmatmul.bf16.vlgmr.msrb.gmra.mxu1 %v6996_v15  ;;  %v4934_v19 = vor.u32 %v5747_v53, %v4931_v56  ;;  %v5062_v15 = vor.u32 %v5779_v57, %v5059_v22  ;;  %v5763_v53 = vld [vmem:[%s8709_s7 + $0x72c] sm:$0xf]  ;;  %v4995_v56 = vld [vmem:[%s8709_s7 + $0x738] sm:$0xf0]  ;;  %v4614_v57 = vor.u32 %v5667_v33, %v4611_v2  ;;  %v5129_v2 = vld [vmem:[%s8711_s9 + $0x40] sm:$0xf] }
 0x297   :  { %v4998_v60 = vor.u32 %v5763_v53, %v4995_v56  ;;  %v5797_v53 = vld [vmem:[%s8711_s9 + $0x34] sm:$0xf0]  ;;  %v5281_v56 = vld [vmem:[%s8711_s9 + $0x170] sm:$0xf] }
 0x298   :  { %2918 = vmatpush.bf16.msrb.mxu2 %v4694_v16  ;;  %2931 = vmatpush.bf16.msrb.mxu3 %v4822_v36  ;;  %v2642_v29 = vpop.f32.mrf.mxu0  ;;  %v2655_v23 = vpop.f32.mrf.mxu1  ;;  %v4886_v16 = vor.u32 %v5735_v27, %v4883_v30  ;;  %v5014_v36 = vor.u32 %v5767_v21, %v5011_v31  ;;  %v5137_v27 = vld [vmem:[%s8711_s9 + $0x50] sm:$0xf]  ;;  %v5801_v30 = vld [vmem:[%s8711_s9 + $0x54] sm:$0xf0] }
 0x299   :  { %2944 = vmatpush.bf16.msra.mxu0 %v4950_v43  ;;  %2957 = vmatpush.bf16.msra.mxu1 %v5078_v47  ;;  %v5699_v43 = vld [vmem:[%s8709_s7 + $0x52c] sm:$0xf]  ;;  %v4739_v47 = vld [vmem:[%s8709_s7 + $0x538] sm:$0xf0]  ;;  %v5803_v29 = vld [vmem:[%s8711_s9 + $0x64] sm:$0xf0] }
 0x29a   :  { %v4742_v22 = vor.u32 %v5699_v43, %v4739_v47  ;;  %v5209_v23 = vld [vmem:[%s8711_s9 + $0xe0] sm:$0xf]  ;;  %v5201_v21 = vld [vmem:[%s8711_s9 + $0xd0] sm:$0xf]  ;;  %v5817_v31 = vld [vmem:[%s8711_s9 + $0xd4] sm:$0xf0] }
 0x29b   :  { %v5210_v39 = vor.u32 %v5819_v24, %v5209_v23  ;;  %v5202_v33 = vor.u32 %v5817_v31, %v5201_v21  ;;  %v5097_v23 = vld [vmem:[%s8711_s9] sm:$0xf]  ;;  %v5831_v31 = vld [vmem:[%s8711_s9 + $0x144] sm:$0xf0] }
 0x29c   :  { %2919 = vmatpush.bf16.msrb.mxu2 %v4678_v46  ;;  %2932 = vmatpush.bf16.msrb.mxu3 %v4806_v1  ;;  %v5257_v21 = vld [vmem:[%s8711_s9 + $0x140] sm:$0xf] }
 0x29d   :  { %2945 = vmatpush.bf16.msra.mxu0 %v4934_v19  ;;  %2958 = vmatpush.bf16.msra.mxu1 %v5062_v15  ;;  %v2616_v37 = vpop.f32.mrf.mxu2  ;;  %v2629_v38 = vpop.f32.mrf.mxu3  ;;  %v5695_v19 = vld [vmem:[%s8709_s7 + $0x50c] sm:$0xf]  ;;  %v4870_v15 = vor.u32 %v5731_v48, %v4867_v54  ;;  %v5121_v54 = vld [vmem:[%s8711_s9 + $0x30] sm:$0xf] }
 0x2a0   :  { %2920 = vmatpush.bf16.msrb.mxu2 %v4662_v52  ;;  %2933 = vmatpush.bf16.msrb.mxu3 %v4790_v7  ;;  %v8160_v46 = vpop.f32.mrf.mxu0  ;;  %v8162_v1 = vpop.f32.mrf.mxu1  ;;  %v5153_v52 = vld [vmem:[%s8711_s9 + $0x70] sm:$0xf]  ;;  %v5805_v7 = vld [vmem:[%s8711_s9 + $0x74] sm:$0xf0] }
 0x2a1   :  { %2946 = vmatpush.bf16.msra.mxu0 %v4918_v51  ;;  %2959 = vmatpush.bf16.msra.mxu1 %v5046_v0  ;;  %v4598_v51 = vor.u32 %v5663_v4, %v4595_v3  ;;  %v4726_v0 = vor.u32 %v5695_v19, %v4723_v40  ;;  %v5154_v11 = vor.u32 %v5805_v7, %v5153_v52  ;;  %v5177_v40 = vld [vmem:[%s8711_s9 + $0xa0] sm:$0xf] }
 0x2a2   :  { %v5122_v4 = vor.u32 %v5797_v53, %v5121_v54  ;;  %v5211_v54 = vld [vmem:[%s8711_s9 + $0xe8] sm:$0xf0] }
 0x2a4   :  { %2921 = vmatpush.bf16.msrb.mxu2 %v4646_v17  ;;  %2934 = vmatpush.bf16.msrb.mxu3 %v4774_v18  ;;  %v1266_v17 = vperm.slane %v7830_v42, 1  ;;  %v5145_v18 = vld [vmem:[%s8711_s9 + $0x60] sm:$0xf] }
 0x2a5   :  { %2947 = vmatpush.bf16.msra.mxu0 %v4902_v49  ;;  %2960 = vmatpush.bf16.msra.mxu1 %v5030_v8  ;;  %v2666_v10 = vpop.f32.mrf.mxu2  ;;  %v2679_v34 = vpop.f32.mrf.mxu3  ;;  %v5146_v20 = vor.u32 %v5803_v29, %v5145_v18 }
 0x2a6   :  { %v2667_v8 = vadd.f32 %v2666_v10, %v1266_v17  ;;  %v5793_v10 = vld [vmem:[%s8711_s9 + $0x14] sm:$0xf0] }
 0x2a8   :  { %2922 = vmatpush.bf16.msrb.mxu2 %v4630_v26  ;;  %2935 = vmatpush.bf16.msrb.mxu3 %v4758_v32  ;;  %v2694_v25 = vpop.f32.mrf.mxu0  ;;  %v2707_v49 = vpop.f32.mrf.mxu1  ;;  %v2680_v32 = vadd.f32 %v2679_v34, %v2667_v8  ;;  %v5169_v34 = vld [vmem:[%s8711_s9 + $0x90] sm:$0xf]  ;;  %v5791_v8 = vld [vmem:[%s8711_s9 + $0x4] sm:$0xf0] }
 0x2a9   :  { %2948 = vmatpush.bf16.msra.mxu0 %v4886_v16  ;;  %2961 = vmatpush.bf16.msra.mxu1 %v5014_v36  ;;  %v5799_v16 = vld [vmem:[%s8711_s9 + $0x44] sm:$0xf0]  ;;  %v2615_v36 = vadd.f32 %v8090_v5, %v7921_v35  ;;  %v5185_v35 = vld [vmem:[%s8711_s9 + $0xb0] sm:$0xf]  ;;  %v5813_v5 = vld [vmem:[%s8711_s9 + $0xb4] sm:$0xf0] }
 0x2aa   :  { %v2693_v37 = vadd.f32 %v8160_v46, %v2680_v32  ;;  %v5130_v47 = vor.u32 %v5799_v16, %v5129_v2  ;;  %v5186_v3 = vor.u32 %v5813_v5, %v5185_v35  ;;  %v5219_v32 = vld [vmem:[%s8711_s9 + $0xf8] sm:$0xf0]  ;;  %v5098_v16 = vor.u32 %v5791_v8, %v5097_v23  ;;  %v5241_v5 = vld [vmem:[%s8711_s9 + $0x120] sm:$0xf]  ;;  %v5810_v8 = vld [vmem:[%s8711_s9 + $0xa4] sm:$0xf] }
 0x2ab   :  { %v2628_v46 = vadd.f32 %v8092_v28, %v2615_v36 }
 0x2ac   :  { %2923 = vmatpush.bf16.msrb.mxu2 %v4614_v57  ;;  %2936 = vmatpush.bf16.msrb.mxu3 %v4742_v22  ;;  %v5837_v57 = vld [vmem:[%s8711_s9 + $0x174] sm:$0xf0]  ;;  %v2706_v19 = vadd.f32 %v8162_v1, %v2693_v37  ;;  %v5273_v1 = vld [vmem:[%s8711_s9 + $0x160] sm:$0xf]  ;;  %v5802_v37 = vld [vmem:[%s8711_s9 + $0x64] sm:$0xf] }
 0x2ad   :  { %2949 = vmatpush.bf16.msra.mxu0 %v4870_v15  ;;  %2962 = vmatpush.bf16.msra.mxu1 %v4998_v60  ;;  %v2668_v26 = vpop.f32.mrf.mxu2  ;;  %v5282_v22 = vor.u32 %v5837_v57, %v5281_v56  ;;  %v5113_v15 = vld [vmem:[%s8711_s9 + $0x20] sm:$0xf]  ;;  %v5795_v60 = vld [vmem:[%s8711_s9 + $0x24] sm:$0xf0]  ;;  %v5274_v52 = vor.u32 %v5835_v62, %v5273_v1  ;;  %v2641_v7 = vadd.f32 %v8056_v59, %v2628_v46  ;;  %v5809_v59 = vld [vmem:[%s8711_s9 + $0x94] sm:$0xf0] }
 0x2ae   :  { %v5170_v49 = vor.u32 %v5809_v59, %v5169_v34  ;;  %v5155_v26 = vld [vmem:[%s8711_s9 + $0x78] sm:$0xf0]  ;;  %v5827_v56 = vld [vmem:[%s8711_s9 + $0x124] sm:$0xf0]  ;;  %v5798_v1 = vld [vmem:[%s8711_s9 + $0x44] sm:$0xf] }
 0x2af   :  { %v2654_v29 = vadd.f32 %v8058_v58, %v2641_v7  ;;  %v5807_v58 = vld [vmem:[%s8711_s9 + $0x84] sm:$0xf0]  ;;  %v5131_v62 = vld [vmem:[%s8711_s9 + $0x48] sm:$0xf0] }
 0x2b0   :  { %2924 = vmatpush.bf16.msrb.mxu2 %v4598_v51  ;;  %2937 = vmatpush.bf16.msrb.mxu3 %v4726_v0  ;;  %v5114_v0 = vor.u32 %v5795_v60, %v5113_v15  ;;  %v5203_v15 = vld [vmem:[%s8711_s9 + $0xd8] sm:$0xf0]  ;;  %v5242_v60 = vor.u32 %v5827_v56, %v5241_v5  ;;  %v5259_v5 = vld [vmem:[%s8711_s9 + $0x148] sm:$0xf0] }
 0x2b1   :  { %2950 = vmatpush.bf16.msra.mxu0 %v4854_v6  ;;  %2963 = vmatpush.bf16.msra.mxu1 %v4982_v9  ;;  %v5178_v6 = vor.u32 %v5811_v50, %v5177_v40  ;;  %v5105_v9 = vld [vmem:[%s8711_s9 + $0x10] sm:$0xf]  ;;  %v2969_v2 = vmax.f32 %v2654_v29, 0.0 }
 0x2b2   :  { %v5106_v25 = vor.u32 %v5793_v10, %v5105_v9  ;;  %v5233_v40 = vld [vmem:[%s8711_s9 + $0x110] sm:$0xf]  ;;  %v5796_v9 = vld [vmem:[%s8711_s9 + $0x34] sm:$0xf]  ;;  %v5283_v10 = vld [vmem:[%s8711_s9 + $0x178] sm:$0xf0] }
 0x2b3   :  { %2925 = vmatmul.bf16.vlgmr.msrb.gmra.mxu2 %v7203_v13  ;;  %2938 = vmatmul.bf16.vlgmr.msrb.gmra.mxu3 %v7205_v14  ;;  %v2681_v13 = vpop.f32.mrf.mxu3  ;;  %v5138_v14 = vor.u32 %v5801_v30, %v5137_v27  ;;  %v2744_v38 = vpop.f32.mrf.mxu0  ;;  %v5804_v30 = vld [vmem:[%s8711_s9 + $0x74] sm:$0xf]  ;;  %v8358_v57 = vpack.c.bf16 %v2969_v2, %v2969_v2 }
 0x2b4   :  { %3367 = vmatpush.bf16.msra.mxu2 %v5154_v11  ;;  %3380 = vmatpush.bf16.msra.mxu3 %v5218_v12  ;;  %v2757_v43 = vpop.f32.mrf.mxu1  ;;  %v5265_v11 = vld [vmem:[%s8711_s9 + $0x150] sm:$0xf]  ;;  %v5833_v12 = vld [vmem:[%s8711_s9 + $0x154] sm:$0xf0]  ;;  %v5820_v13 = vld [vmem:[%s8711_s9 + $0xf4] sm:$0xf] }
 0x2b5   :  { %2951 = vmatmul.bf16.vlgmr.msra.gmra.mxu0 %v7207_v44  ;;  %2964 = vmatmul.bf16.vlgmr.msra.gmra.mxu1 %v7209_v45  ;;  %v5193_v44 = vld [vmem:[%s8711_s9 + $0xc0] sm:$0xf]  ;;  %v5815_v45 = vld [vmem:[%s8711_s9 + $0xc4] sm:$0xf0]  ;;  %v5266_v18 = vor.u32 %v5833_v12, %v5265_v11  ;;  %v5222_v36 = vor.u32 %v5820_v13, %v5219_v32  ;;  %v5123_v11 = vld [vmem:[%s8711_s9 + $0x38] sm:$0xf0] }
 0x2b6   :  { %v5194_v48 = vor.u32 %v5815_v45, %v5193_v44  ;;  %v2718_v41 = vpop.f32.mrf.mxu2  ;;  %3393 = vmatpush.bf16.msrb.mxu0 %v5282_v22  ;;  %v5158_v45 = vor.u32 %v5804_v30, %v5155_v26  ;;  %v5812_v12 = vld [vmem:[%s8711_s9 + $0xb4] sm:$0xf]  ;;  %v5126_v23 = vor.u32 %v5796_v9, %v5123_v11  ;;  %v5107_v32 = vld [vmem:[%s8711_s9 + $0x18] sm:$0xf0]  ;;  %v5851_v11 = vld [vmem:[%s8711_s9 + $0x1e4] sm:$0xf0] }
 0x2b7   :  { %v2719_v55 = vadd.f32 %v2718_v41, %v2706_v19  ;;  %v5816_v19 = vld [vmem:[%s8711_s9 + $0xd4] sm:$0xf]  ;;  %v5825_v41 = vld [vmem:[%s8711_s9 + $0x114] sm:$0xf0] }
 0x2b8   :  { %3368 = vmatpush.bf16.msra.mxu2 %v5146_v20  ;;  %3381 = vmatpush.bf16.msra.mxu3 %v5210_v39  ;;  %v5161_v20 = vld [vmem:[%s8711_s9 + $0x80] sm:$0xf]  ;;  %v5206_v50 = vor.u32 %v5816_v19, %v5203_v15  ;;  %v5234_v7 = vor.u32 %v5825_v41, %v5233_v40  ;;  %v5792_v13 = vld [vmem:[%s8711_s9 + $0x14] sm:$0xf]  ;;  %v5251_v15 = vld [vmem:[%s8711_s9 + $0x138] sm:$0xf0] }
 0x2b9   :  { %v5162_v44 = vor.u32 %v5807_v58, %v5161_v20  ;;  %v5179_v20 = vld [vmem:[%s8711_s9 + $0xa8] sm:$0xf0]  ;;  %v5834_v58 = vld [vmem:[%s8711_s9 + $0x164] sm:$0xf]  ;;  %v5828_v19 = vld [vmem:[%s8711_s9 + $0x134] sm:$0xf] }
 0x2ba   :  { %3394 = vmatpush.bf16.msrb.mxu0 %v5274_v52  ;;  %v5195_v52 = vld [vmem:[%s8711_s9 + $0xc8] sm:$0xf0]  ;;  %v5182_v26 = vor.u32 %v5810_v8, %v5179_v20  ;;  %v1267_v40 = vperm.slane %v7830_v42, 2  ;;  %v5826_v41 = vld [vmem:[%s8711_s9 + $0x124] sm:$0xf] }
 0x2bb   :  { %v2731_v28 = vpop.f32.mrf.mxu3  ;;  %v2746_v61 = vpop.f32.mrf.mxu0  ;;  %v5824_v42 = vld [vmem:[%s8711_s9 + $0x114] sm:$0xf] }
 0x2bc   :  { %3369 = vmatpush.bf16.msra.mxu2 %v5138_v14  ;;  %3382 = vmatpush.bf16.msra.mxu3 %v5202_v33  ;;  %v2732_v63 = vadd.f32 %v2731_v28, %v2719_v55  ;;  %v2759_v51 = vpop.f32.mrf.mxu1  ;;  %v5258_v14 = vor.u32 %v5831_v31, %v5257_v21  ;;  %v5814_v55 = vld [vmem:[%s8711_s9 + $0xc4] sm:$0xf]  ;;  %v5823_v61 = vld [vmem:[%s8711_s9 + $0x104] sm:$0xf0] }
 0x2bd   :  { %v5836_v51 = vld [vmem:[%s8711_s9 + $0x174] sm:$0xf] }
 0x2be   :  { %v2745_v17 = vadd.f32 %v2744_v38, %v2732_v63  ;;  %v2720_v39 = vpop.f32.mrf.mxu2  ;;  %3395 = vmatpush.bf16.msrb.mxu0 %v5266_v18  ;;  %v5249_v38 = vld [vmem:[%s8711_s9 + $0x130] sm:$0xf]  ;;  %v5225_v63 = vld [vmem:[%s8711_s9 + $0x100] sm:$0xf]  ;;  %v5286_v29 = vor.u32 %v5836_v51, %v5283_v10 }
 0x2bf   :  { %v5226_v18 = vor.u32 %v5823_v61, %v5225_v63  ;;  %v5275_v39 = vld [vmem:[%s8711_s9 + $0x168] sm:$0xf0]  ;;  %v5853_v61 = vld [vmem:[%s8711_s9 + $0x1f4] sm:$0xf0]  ;;  %v5337_v10 = vld [vmem:[%s8711_s9 + $0x1e0] sm:$0xf] }
 0x2c0   :  { %3370 = vmatpush.bf16.msra.mxu2 %v5130_v47  ;;  %3383 = vmatpush.bf16.msra.mxu3 %v5194_v48  ;;  %v2758_v24 = vadd.f32 %v2757_v43, %v2745_v17  ;;  %v5829_v43 = vld [vmem:[%s8711_s9 + $0x134] sm:$0xf0]  ;;  %v5147_v47 = vld [vmem:[%s8711_s9 + $0x68] sm:$0xf0]  ;;  %v5818_v48 = vld [vmem:[%s8711_s9 + $0xe4] sm:$0xf]  ;;  %v5278_v21 = vor.u32 %v5834_v58, %v5275_v39 }
 0x2c1   :  { %v5250_v53 = vor.u32 %v5829_v43, %v5249_v38  ;;  %v5150_v22 = vor.u32 %v5802_v37, %v5147_v47  ;;  %v5214_v46 = vor.u32 %v5818_v48, %v5211_v54  ;;  %v5187_v17 = vld [vmem:[%s8711_s9 + $0xb8] sm:$0xf0]  ;;  %v5110_v37 = vor.u32 %v5792_v13, %v5107_v32  ;;  %v5790_v43 = vld [vmem:[%s8711_s9 + $0x4] sm:$0xf]  ;;  %v5099_v47 = vld [vmem:[%s8711_s9 + $0x8] sm:$0xf0] }
 0x2c2   :  { %v2970_v33 = vmax.f32 %v2758_v24, 0.0  ;;  %3396 = vmatpush.bf16.msrb.mxu0 %v5258_v14  ;;  %v5190_v24 = vor.u32 %v5812_v12, %v5187_v17  ;;  %v5808_v14 = vld [vmem:[%s8711_s9 + $0x94] sm:$0xf]  ;;  %v5806_v48 = vld [vmem:[%s8711_s9 + $0x84] sm:$0xf]  ;;  %v5338_v17 = vor.u32 %v5851_v11, %v5337_v10 }
 0x2c3   :  { %v2733_v27 = vpop.f32.mrf.mxu3  ;;  %v5163_v54 = vld [vmem:[%s8711_s9 + $0x88] sm:$0xf0]  ;;  %v5847_v39 = vld [vmem:[%s8711_s9 + $0x1c4] sm:$0xf0] }
 0x2c4   :  { %3371 = vmatpush.bf16.msra.mxu2 %v5122_v4  ;;  %3384 = vmatpush.bf16.msra.mxu3 %v5186_v3  ;;  %v8350_v35 = vpack.c.bf16 %v2970_v33, %v2970_v33  ;;  %v5800_v4 = vld [vmem:[%s8711_s9 + $0x54] sm:$0xf]  ;;  %v5139_v3 = vld [vmem:[%s8711_s9 + $0x58] sm:$0xf0] }
 0x2c5   :  { %v5142_v28 = vor.u32 %v5800_v4, %v5139_v3  ;;  %v5102_v4 = vor.u32 %v5790_v43, %v5099_v47  ;;  %v5166_v3 = vor.u32 %v5806_v48, %v5163_v54  ;;  %v5839_v43 = vld [vmem:[%s8711_s9 + $0x184] sm:$0xf0]  ;;  %v5852_v47 = vld [vmem:[%s8711_s9 + $0x1f4] sm:$0xf]  ;;  %v5347_v54 = vld [vmem:[%s8711_s9 + $0x1f8] sm:$0xf0] }
 0x2c6   :  { %3397 = vmatpush.bf16.msrb.mxu0 %v5250_v53  ;;  %v5830_v53 = vld [vmem:[%s8711_s9 + $0x144] sm:$0xf] }
 0x2c8   :  { %3372 = vmatpush.bf16.msra.mxu2 %v5114_v0  ;;  %3385 = vmatpush.bf16.msra.mxu3 %v5178_v6  ;;  %v5134_v0 = vor.u32 %v5798_v1, %v5131_v62  ;;  %v5198_v6 = vor.u32 %v5814_v55, %v5195_v52  ;;  %v5235_v62 = vld [vmem:[%s8711_s9 + $0x118] sm:$0xf0] }
 0x2c9   :  { %v5238_v55 = vor.u32 %v5824_v42, %v5235_v62 }
 0x2ca   :  { %3398 = vmatpush.bf16.msrb.mxu0 %v5242_v60  ;;  %v5254_v60 = vor.u32 %v5828_v19, %v5251_v15  ;;  %v5848_v15 = vld [vmem:[%s8711_s9 + $0x1d4] sm:$0xf] }
 0x2cc   :  { %3373 = vmatpush.bf16.msra.mxu2 %v5106_v25  ;;  %3386 = vmatpush.bf16.msra.mxu3 %v5170_v49  ;;  %v5794_v25 = vld [vmem:[%s8711_s9 + $0x24] sm:$0xf]  ;;  %v5115_v49 = vld [vmem:[%s8711_s9 + $0x28] sm:$0xf0] }
 0x2cd   :  { %v5118_v31 = vor.u32 %v5794_v25, %v5115_v49 }
 0x2ce   :  { %3399 = vmatpush.bf16.msrb.mxu0 %v5234_v7  ;;  %v5822_v7 = vld [vmem:[%s8711_s9 + $0x104] sm:$0xf] }
 0x2d0   :  { %3374 = vmatpush.bf16.msra.mxu2 %v5098_v16  ;;  %3387 = vmatpush.bf16.msra.mxu3 %v5162_v44  ;;  %v5171_v16 = vld [vmem:[%s8711_s9 + $0x98] sm:$0xf0]  ;;  %v5832_v44 = vld [vmem:[%s8711_s9 + $0x154] sm:$0xf] }
 0x2d1   :  { %v5174_v38 = vor.u32 %v5808_v14, %v5171_v16 }
 0x2d2   :  { %3400 = vmatpush.bf16.msrb.mxu0 %v5226_v18 }
 0x2d3   :  { %3375 = vmatmul.bf16.vlgmr.msra.gmra.mxu2 %v8358_v57  ;;  %3388 = vmatmul.bf16.vlgmr.msra.gmra.mxu3 %v8350_v35  ;;  %v8407_v34 = vpop.f32.mrf.mxu0  ;;  %v8409_v59 = vpop.f32.mrf.mxu1 }
 0x2d4   :  { %3419 = vmatpush.bf16.msrb.mxu2 %v5158_v45  ;;  %3432 = vmatpush.bf16.msrb.mxu3 %v5222_v36  ;;  %v5267_v45 = vld [vmem:[%s8711_s9 + $0x158] sm:$0xf0] }
 0x2d5   :  { %v5270_v36 = vor.u32 %v5832_v44, %v5267_v45  ;;  %v5297_v45 = vld [vmem:[%s8711_s9 + $0x190] sm:$0xf] }
 0x2d6   :  { %v2770_v27 = vpop.f32.mrf.mxu2  ;;  %v2783_v30 = vpop.f32.mrf.mxu3  ;;  %3445 = vmatpush.bf16.msra.mxu0 %v5286_v29 }
 0x2d7   :  { %v2771_v1 = vadd.f32 %v2770_v27, %v1267_v40  ;;  %v5313_v27 = vld [vmem:[%s8711_s9 + $0x1b0] sm:$0xf] }
 0x2d8   :  { %3420 = vmatpush.bf16.msrb.mxu2 %v5150_v22  ;;  %3433 = vmatpush.bf16.msrb.mxu3 %v5214_v46  ;;  %v5262_v46 = vor.u32 %v5830_v53, %v5259_v5  ;;  %v5350_v53 = vor.u32 %v5852_v47, %v5347_v54 }
 0x2d9   :  { %v2784_v52 = vadd.f32 %v2783_v30, %v2771_v1  ;;  %v5323_v1 = vld [vmem:[%s8711_s9 + $0x1c8] sm:$0xf0] }
 0x2da   :  { %3446 = vmatpush.bf16.msra.mxu0 %v5278_v21 }
 0x2db   :  { %v2798_v33 = vpop.f32.mrf.mxu0  ;;  %v2811_v2 = vpop.f32.mrf.mxu1  ;;  %v2797_v51 = vadd.f32 %v8407_v34, %v2784_v52  ;;  %v5329_v34 = vld [vmem:[%s8711_s9 + $0x1d0] sm:$0xf]  ;;  %v5844_v52 = vld [vmem:[%s8711_s9 + $0x1b4] sm:$0xf] }
 0x2dc   :  { %3421 = vmatpush.bf16.msrb.mxu2 %v5142_v28  ;;  %3434 = vmatpush.bf16.msrb.mxu3 %v5206_v50  ;;  %v5243_v28 = vld [vmem:[%s8711_s9 + $0x128] sm:$0xf0]  ;;  %v5305_v33 = vld [vmem:[%s8711_s9 + $0x1a0] sm:$0xf]  ;;  %v5843_v2 = vld [vmem:[%s8711_s9 + $0x1a4] sm:$0xf0] }
 0x2dd   :  { %v5246_v50 = vor.u32 %v5826_v41, %v5243_v28  ;;  %v2810_v12 = vadd.f32 %v8409_v59, %v2797_v51  ;;  %v5321_v59 = vld [vmem:[%s8711_s9 + $0x1c0] sm:$0xf]  ;;  %v5306_v44 = vor.u32 %v5843_v2, %v5305_v33 }
 0x2de   :  { %v2772_v56 = vpop.f32.mrf.mxu2  ;;  %v2785_v22 = vpop.f32.mrf.mxu3  ;;  %3447 = vmatpush.bf16.msra.mxu0 %v5270_v36  ;;  %v5322_v21 = vor.u32 %v5847_v39, %v5321_v59  ;;  %v5841_v36 = vld [vmem:[%s8711_s9 + $0x194] sm:$0xf0] }
 0x2df   :  { %v5850_v22 = vld [vmem:[%s8711_s9 + $0x1e4] sm:$0xf] }
 0x2e0   :  { %3422 = vmatpush.bf16.msrb.mxu2 %v5134_v0  ;;  %3435 = vmatpush.bf16.msrb.mxu3 %v5198_v6 }
 0x2e2   :  { %3448 = vmatpush.bf16.msra.mxu0 %v5262_v46  ;;  %v5339_v46 = vld [vmem:[%s8711_s9 + $0x1e8] sm:$0xf0] }
 0x2e4   :  { %3423 = vmatpush.bf16.msrb.mxu2 %v5126_v23  ;;  %3436 = vmatpush.bf16.msrb.mxu3 %v5190_v24  ;;  %v5849_v24 = vld [vmem:[%s8711_s9 + $0x1d4] sm:$0xf0] }
 0x2e5   :  { %v5330_v20 = vor.u32 %v5849_v24, %v5329_v34 }
 0x2e6   :  { %3449 = vmatpush.bf16.msra.mxu0 %v5254_v60  ;;  %v5331_v60 = vld [vmem:[%s8711_s9 + $0x1d8] sm:$0xf0] }
 0x2e7   :  { %v5334_v40 = vor.u32 %v5848_v15, %v5331_v60  ;;  %v5857_v15 = vld [vmem:[%s8713_s11 + $0x18] sm:$0xff] }
 0x2e8   :  { %3424 = vmatpush.bf16.msrb.mxu2 %v5118_v31  ;;  %3437 = vmatpush.bf16.msrb.mxu3 %v5182_v26  ;;  %v5845_v31 = vld [vmem:[%s8711_s9 + $0x1b4] sm:$0xf0] }
 0x2e9   :  { %v5314_v14 = vor.u32 %v5845_v31, %v5313_v27 }
 0x2ea   :  { %3450 = vmatpush.bf16.msra.mxu0 %v5246_v50  ;;  %v5846_v50 = vld [vmem:[%s8711_s9 + $0x1c4] sm:$0xf] }
 0x2eb   :  { %v5326_v42 = vor.u32 %v5846_v50, %v5323_v1  ;;  %v5855_v50 = vld [vmem:[%s8713_s11 + $0x8] sm:$0xff] }
 0x2ec   :  { %3425 = vmatpush.bf16.msrb.mxu2 %v5110_v37  ;;  %3438 = vmatpush.bf16.msrb.mxu3 %v5174_v38  ;;  %v5298_v37 = vor.u32 %v5841_v36, %v5297_v45  ;;  %v5289_v38 = vld [vmem:[%s8711_s9 + $0x180] sm:$0xf]  ;;  %v5867_v1 = vld [vmem:[%s8713_s11 + $0x68] sm:$0xff] }
 0x2ed   :  { %v5290_v48 = vor.u32 %v5839_v43, %v5289_v38 }
 0x2ee   :  { %3451 = vmatpush.bf16.msra.mxu0 %v5238_v55 }
 0x2f0   :  { %3426 = vmatpush.bf16.msrb.mxu2 %v5102_v4  ;;  %3439 = vmatpush.bf16.msrb.mxu3 %v5166_v3  ;;  %v5342_v4 = vor.u32 %v5850_v22, %v5339_v46  ;;  %v5860_v22 = vld [vmem:[%s8713_s11 + $0x30] sm:$0xff] }
 0x2f1   :  { %v5868_v46 = vld [vmem:[%s8713_s11 + $0x70] sm:$0xff] }
 0x2f3   :  { %3427 = vmatmul.bf16.vlgmr.msrb.gmra.mxu2 %v8358_v57  ;;  %3440 = vmatmul.bf16.vlgmr.msrb.gmra.mxu3 %v8350_v35  ;;  %v5227_v57 = vld [vmem:[%s8711_s9 + $0x108] sm:$0xf0]  ;;  %v5345_v35 = vld [vmem:[%s8711_s9 + $0x1f0] sm:$0xf]  ;;  %v2848_v0 = vpop.f32.mrf.mxu0  ;;  %v2861_v6 = vpop.f32.mrf.mxu1 }
 0x2f4   :  { %v5230_v63 = vor.u32 %v5822_v7, %v5227_v57  ;;  %v5346_v9 = vor.u32 %v5853_v61, %v5345_v35  ;;  %v5315_v7 = vld [vmem:[%s8711_s9 + $0x1b8] sm:$0xf0]  ;;  %v5842_v35 = vld [vmem:[%s8711_s9 + $0x1a4] sm:$0xf]  ;;  %v5889_v61 = vld [vmem:[%s8710_s8] sm:$0xf] }
 0x2f5   :  { %v5318_v57 = vor.u32 %v5844_v52, %v5315_v7  ;;  %v1268_v51 = vperm.slane %v5889_v61, 3  ;;  %v5864_v52 = vld [vmem:[%s8713_s11 + $0x50] sm:$0xff]  ;;  %v5863_v7 = vld [vmem:[%s8713_s11 + $0x48] sm:$0xff] }
 0x2f6   :  { %3406 = vmatpush.bf16.msrb.mxu1 %v5346_v9  ;;  %3452 = vmatpush.bf16.msra.mxu0 %v5230_v63  ;;  %v2822_v18 = vpop.f32.mrf.mxu2  ;;  %v2835_v29 = vpop.f32.mrf.mxu3  ;;  %v5307_v63 = vld [vmem:[%s8711_s9 + $0x1a8] sm:$0xf0]  ;;  %v5299_v9 = vld [vmem:[%s8711_s9 + $0x198] sm:$0xf0] }
 0x2f7   :  { %v2823_v23 = vadd.f32 %v2822_v18, %v2810_v12  ;;  %v5838_v12 = vld [vmem:[%s8711_s9 + $0x184] sm:$0xf] }
 0x2f9   :  { %v2836_v25 = vadd.f32 %v2835_v29, %v2823_v23 }
 0x2fa   :  { %3407 = vmatpush.bf16.msrb.mxu1 %v5338_v17  ;;  %v5291_v17 = vld [vmem:[%s8711_s9 + $0x188] sm:$0xf0] }
 0x2fb   :  { %v2850_v49 = vpop.f32.mrf.mxu0  ;;  %v2863_v8 = vpop.f32.mrf.mxu1  ;;  %v2849_v58 = vadd.f32 %v2848_v0, %v2836_v25  ;;  %v5310_v0 = vor.u32 %v5842_v35, %v5307_v63  ;;  %v5294_v29 = vor.u32 %v5838_v12, %v5291_v17  ;;  %v5877_v35 = vld [vmem:[%s8715_s13 + $0x38] sm:$0xff]  ;;  %v5876_v63 = vld [vmem:[%s8715_s13 + $0x30] sm:$0xff] }
 0x2fd   :  { %v2862_v30 = vadd.f32 %v2861_v6, %v2849_v58  ;;  %v5840_v6 = vld [vmem:[%s8711_s9 + $0x194] sm:$0xf] }
 0x2fe   :  { %3408 = vmatpush.bf16.msrb.mxu1 %v5330_v20  ;;  %v2824_v26 = vpop.f32.mrf.mxu2  ;;  %v2837_v13 = vpop.f32.mrf.mxu3  ;;  %v5302_v11 = vor.u32 %v5840_v6, %v5299_v9 }
 0x2ff   :  { %v2971_v32 = vmax.f32 %v2862_v30, 0.0 }
 0x301   :  { %v2975_v16 = vpack.c.bf16 %v2971_v32, %v2971_v32  ;;  %v3041_v32 = vld [vmem:[%s8712_s10] sm:$0x3] }
 0x302   :  { %3409 = vmatpush.bf16.msrb.mxu1 %v5322_v21 }
 0x303   :  { %3401 = vmatmul.bf16.vlgmr.msrb.gmra.mxu0 %v2975_v16 }
 0x304   :  { %3703 = vmatpush.bf16.msrb.mxu0 %v5877_v35 }
 0x306   :  { %3410 = vmatpush.bf16.msrb.mxu1 %v5314_v14  ;;  %v3043_v14 = vperm.slane %v3041_v32, 0 }
 0x308   :  { %3704 = vmatpush.bf16.msrb.mxu0 %v5876_v63 }
 0x30a   :  { %3411 = vmatpush.bf16.msrb.mxu1 %v5306_v44 }
 0x30e   :  { %3412 = vmatpush.bf16.msrb.mxu1 %v5298_v37  ;;  %v3044_v37 = vperm.slane %v3041_v32, 1 }
 0x312   :  { %3413 = vmatpush.bf16.msrb.mxu1 %v5290_v48 }
 0x313   :  { %v2900_v5 = vpop.f32.mrf.mxu0  ;;  %v2913_v56 = vpop.f32.mrf.mxu1  ;;  %3453 = vmatmul.bf16.vlgmr.msra.gmra.mxu0 %v2975_v16 }
 0x316   :  { %3458 = vmatpush.bf16.msra.mxu1 %v5350_v53  ;;  %v2874_v3 = vpop.f32.mrf.mxu2  ;;  %v2887_v19 = vpop.f32.mrf.mxu3 }
 0x317   :  { %v2875_v10 = vadd.f32 %v2874_v3, %v1268_v51 }
 0x319   :  { %v2888_v18 = vadd.f32 %v2887_v19, %v2875_v10  ;;  %v5858_v19 = vld [vmem:[%s8713_s11 + $0x20] sm:$0xff] }
 0x31a   :  { %3459 = vmatpush.bf16.msra.mxu1 %v5342_v4  ;;  %v5859_v4 = vld [vmem:[%s8713_s11 + $0x28] sm:$0xff] }
 0x31b   :  { %v2902_v41 = vpop.f32.mrf.mxu0  ;;  %v2915_v28 = vpop.f32.mrf.mxu1  ;;  %v2901_v23 = vadd.f32 %v2900_v5, %v2888_v18  ;;  %v5861_v5 = vld [vmem:[%s8713_s11 + $0x38] sm:$0xff] }
 0x31c   :  { %3607 = vmatpush.bf16.msra.mxu2 %v5861_v5 }
 0x31d   :  { %v2914_v25 = vadd.f32 %v2913_v56, %v2901_v23  ;;  %v5869_v56 = vld [vmem:[%s8713_s11 + $0x78] sm:$0xff] }
 0x31e   :  { %3460 = vmatpush.bf16.msra.mxu1 %v5334_v40  ;;  %v2876_v62 = vpop.f32.mrf.mxu2  ;;  %v2889_v55 = vpop.f32.mrf.mxu3  ;;  %3620 = vmatpush.bf16.msra.mxu3 %v5869_v56  ;;  %v5856_v40 = vld [vmem:[%s8713_s11 + $0x10] sm:$0xff] }
 0x31f   :  { %v5866_v62 = vld [vmem:[%s8713_s11 + $0x60] sm:$0xff]  ;;  %v5865_v55 = vld [vmem:[%s8713_s11 + $0x58] sm:$0xff] }
 0x320   :  { %3608 = vmatpush.bf16.msra.mxu2 %v5860_v22 }
 0x322   :  { %3461 = vmatpush.bf16.msra.mxu1 %v5326_v42  ;;  %3621 = vmatpush.bf16.msra.mxu3 %v5868_v46  ;;  %v5854_v42 = vld [vmem:[%s8713_s11] sm:$0xff] }
 0x324   :  { %3609 = vmatpush.bf16.msra.mxu2 %v5859_v4 }
 0x326   :  { %3462 = vmatpush.bf16.msra.mxu1 %v5318_v57  ;;  %3622 = vmatpush.bf16.msra.mxu3 %v5867_v1  ;;  %v5862_v57 = vld [vmem:[%s8713_s11 + $0x40] sm:$0xff]  ;;  %s3776_s11 = sshll.u32 %s5917_s25, 4  ;;  %s3777_s11 = int_to_ptr.vmem [resolvable:$true] %s3776_s11 }
 0x328   :  { %3610 = vmatpush.bf16.msra.mxu2 %v5858_v19 }
 0x32a   :  { %3463 = vmatpush.bf16.msra.mxu1 %v5310_v0  ;;  %3623 = vmatpush.bf16.msra.mxu3 %v5866_v62 }
 0x32c   :  { %3611 = vmatpush.bf16.msra.mxu2 %v5857_v15 }
 0x32e   :  { %3464 = vmatpush.bf16.msra.mxu1 %v5302_v11  ;;  %3624 = vmatpush.bf16.msra.mxu3 %v5865_v55 }
 0x330   :  { %3612 = vmatpush.bf16.msra.mxu2 %v5856_v40 }
 0x332   :  { %v2952_v34 = vpop.f32.mrf.mxu0  ;;  %v2965_v24 = vpop.f32.mrf.mxu1  ;;  %3465 = vmatpush.bf16.msra.mxu1 %v5294_v29  ;;  %3625 = vmatpush.bf16.msra.mxu3 %v5864_v52 }
 0x334   :  { %3613 = vmatpush.bf16.msra.mxu2 %v5855_v50 }
 0x336   :  { %v2926_v49 = vpop.f32.mrf.mxu2  ;;  %v2939_v8 = vpop.f32.mrf.mxu3  ;;  %3626 = vmatpush.bf16.msra.mxu3 %v5863_v7 }
 0x337   :  { %v2927_v20 = vadd.f32 %v2926_v49, %v2914_v25  ;;  %v5873_v25 = vld [vmem:[%s8715_s13 + $0x18] sm:$0xff]  ;;  %v5872_v49 = vld [vmem:[%s8715_s13 + $0x10] sm:$0xff] }
 0x338   :  { %3614 = vmatpush.bf16.msra.mxu2 %v5854_v42 }
 0x339   :  { %v2940_v58 = vadd.f32 %v2939_v8, %v2927_v20  ;;  %v5871_v8 = vld [vmem:[%s8715_s13 + $0x8] sm:$0xff]  ;;  %v5870_v20 = vld [vmem:[%s8715_s13] sm:$0xff] }
 0x33a   :  { %v2954_v59 = vpop.f32.mrf.mxu0  ;;  %v2967_v39 = vpop.f32.mrf.mxu1  ;;  %3627 = vmatpush.bf16.msra.mxu3 %v5862_v57 }
 0x33b   :  { %v2953_v27 = vadd.f32 %v2952_v34, %v2940_v58  ;;  %v5875_v34 = vld [vmem:[%s8715_s13 + $0x28] sm:$0xff]  ;;  %v5881_v58 = vld [vmem:[%s8717_s15 + $0x18] sm:$0xff]  ;;  %v5880_v59 = vld [vmem:[%s8717_s15 + $0x10] sm:$0xff] }
 0x33c   :  { %3705 = vmatpush.bf16.msrb.mxu0 %v5875_v34  ;;  %v5879_v39 = vld [vmem:[%s8717_s15 + $0x8] sm:$0xff] }
 0x33d   :  { %v2966_v30 = vadd.f32 %v2965_v24, %v2953_v27  ;;  %v5874_v24 = vld [vmem:[%s8715_s13 + $0x20] sm:$0xff] }
 0x33e   :  { %v2928_v21 = vpop.f32.mrf.mxu2  ;;  %v2941_v31 = vpop.f32.mrf.mxu3 }
 0x33f   :  { %v2972_v26 = vmax.f32 %v2966_v30, 0.0  ;;  %v5886_v21 = vld [vmem:[%s8714_s12] ss:$0 sm:$0xff] }
 0x340   :  { %3706 = vmatpush.bf16.msrb.mxu0 %v5874_v24 }
 0x341   :  { %v2976_v13 = vpack.c.bf16 %v2972_v26, %v2972_v26 }
 0x343   :  { %3414 = vmatmul.bf16.vlgmr.msrb.gmra.mxu1 %v2976_v13 }
 0x344   :  { %3707 = vmatpush.bf16.msrb.mxu0 %v5873_v25  ;;  %3761 = vmatpush.bf16.msrb.mxu1 %v5881_v58 }
 0x348   :  { %3708 = vmatpush.bf16.msrb.mxu0 %v5872_v49  ;;  %3762 = vmatpush.bf16.msrb.mxu1 %v5880_v59 }
 0x34c   :  { %3709 = vmatpush.bf16.msrb.mxu0 %v5871_v8  ;;  %3763 = vmatpush.bf16.msrb.mxu1 %v5879_v39 }
 0x350   :  { %3710 = vmatpush.bf16.msrb.mxu0 %v5870_v20 }
 0x353   :  { %3466 = vmatmul.bf16.vlgmr.msra.gmra.mxu1 %v2976_v13 }
 0x356   :  { %v3376_v33 = vpop.f32.mrf.mxu2  ;;  %v3389_v2 = vpop.f32.mrf.mxu3 }
 0x357   :  { %v3377_v16 = vadd.f32 %v3376_v33, %v3043_v14 }
 0x359   :  { %v3390_v44 = vadd.f32 %v3389_v2, %v3377_v16  ;;  %v5878_v2 = vld [vmem:[%s8717_s15] sm:$0xff] }
 0x35a   :  { %3764 = vmatpush.bf16.msrb.mxu1 %v5878_v2  ;;  %v5887_v16 = vld [vmem:[%s8716_s14] ss:$0 sm:$0xff] }
 0x35e   :  { %v3378_v45 = vpop.f32.mrf.mxu2  ;;  %v3391_v36 = vpop.f32.mrf.mxu3 }
 0x376   :  { %v3428_v38 = vpop.f32.mrf.mxu2  ;;  %v3441_v43 = vpop.f32.mrf.mxu3 }
 0x377   :  { %v3429_v47 = vadd.f32 %v3428_v38, %v3044_v37 }
 0x379   :  { %v3442_v48 = vadd.f32 %v3441_v43, %v3429_v47  ;;  %v5888_v43 = vld [vmem:[%s8718_s16] ss:$0 sm:$0xff] }
 0x37e   :  { %v3430_v54 = vpop.f32.mrf.mxu2  ;;  %v3443_v53 = vpop.f32.mrf.mxu3 }
 0x380   :  { %v3402_v3 = vpop.f32.mrf.mxu0 }
 0x381   :  { %v3403_v61 = vadd.f32 %v3402_v3, %v3390_v44 }
 0x388   :  { %v3404_v60 = vpop.f32.mrf.mxu0 }
 0x390   :  { %v3454_v41 = vpop.f32.mrf.mxu0 }
 0x391   :  { %v3455_v11 = vadd.f32 %v3454_v41, %v3442_v48 }
 0x398   :  { %v3456_v28 = vpop.f32.mrf.mxu0 }
 0x3c0   :  { %v3415_v51 = vpop.f32.mrf.mxu1 }
 0x3c1   :  { %v3416_v0 = vadd.f32 %v3415_v51, %v3403_v61 }
 0x3c3   :  { %v3471_v6 = vmax.f32 %v3416_v0, 0.0 }
 0x3c5   :  { %v3473_v9 = vpack.c.bf16 %v3471_v6, %v3471_v6 }
 0x3c7   :  { %3615 = vmatmul.bf16.vlgmr.msra.gmra.mxu2 %v3473_v9 }
 0x3c8   :  { %v3417_v10 = vpop.f32.mrf.mxu1 }
 0x3d0   :  { %v3467_v12 = vpop.f32.mrf.mxu1 }
 0x3d1   :  { %v3468_v17 = vadd.f32 %v3467_v12, %v3455_v11 }
 0x3d3   :  { %v3472_v18 = vmax.f32 %v3468_v17, 0.0 }
 0x3d5   :  { %v3474_v29 = vpack.c.bf16 %v3472_v18, %v3472_v18 }
 0x3d7   :  { %3628 = vmatmul.bf16.vlgmr.msra.gmra.mxu3 %v3474_v29 }
 0x3d8   :  { %v3469_v23 = vpop.f32.mrf.mxu1 }
 0x44a   :  { %v3616_v27 = vpop.f32.mrf.mxu2 }
 0x44b   :  { %v3617_v31 = vadd.f32 %v5886_v21, %v3616_v27 }
 0x452   :  { %v3618_v30 = vpop.f32.mrf.mxu2 }
 0x45a   :  { %v3629_v26 = vpop.f32.mrf.mxu3 }
 0x45b   :  { %v3630_v13 = vadd.f32 %v3629_v26, %v3617_v31 }
 0x45d   :  { %v3633_v32 = vmax.f32 %v3630_v13, 0.0 }
 0x45f   :  { %v3634_v14 = vpack.c.bf16 %v3633_v32, %v3633_v32 }
 0x461   :  { %3711 = vmatmul.bf16.vlgmr.msrb.gmra.mxu0 %v3634_v14 }
 0x462   :  { %v3631_v33 = vpop.f32.mrf.mxu3 }
 0x4de   :  { %v3712_v44 = vpop.f32.mrf.mxu0 }
 0x4df   :  { %v3713_v45 = vadd.f32 %v5887_v16, %v3712_v44 }
 0x4e1   :  { %v3716_v36 = vmax.f32 %v3713_v45, 0.0 }
 0x4e3   :  { %v3717_v37 = vpack.c.bf16 %v3716_v36, %v3716_v36 }
 0x4e5   :  { %5463 = vmatmul.msk.bf16.vlgmr.msrb.gmra.mxu1 %vm155_vm2, %v3717_v37 }
 0x4e6   :  { %v3714_v38 = vpop.f32.mrf.mxu0 }
 0x562   :  { %v3766_v47 = vpop.f32.mrf.mxu1 }
 0x563   :  { %v3767_v48 = vadd.f32 %v5888_v43, %v3766_v47 }
 0x565   :  { %3770 = vst [vmem:[#allocation3] sm:$0x3] %v3767_v48 }
 0x566   :  { %3781 = dma.vmem_to_hbm [thread:$0]  %s3777_s11, 32, %s3779_s2, [#allocation4]  }
 0x56a   :  { %v3768_v54 = vpop.f32.mrf.mxu1 }
 0x56b   :  { %5914 = dma.done.wait [#allocation4], 32  }
 0x56c   :  { %5915 = vsyncadd [#allocation4], 4294967264 }
 0x56d   :  { %3786 = vsyncpa [#allocation4], 1 }

</bundles_post_ra>
